<compile_context>
chip_gen: v7x
topology: tpu7x:2x2x1
jax: 0.10.0
libtpu: 0.0.40
codegen_flags: <defaults>
</compile_context>

<pallas_src>
import functools
import math

import jax
import jax.numpy as jnp
from jax.experimental import pallas as pl
from jax.experimental.pallas import tpu as pltpu


_VMEM_LIMIT_BYTES = 48 * 1024 * 1024   # > 16/32 MiB scoped defaults, < v7x 64 MiB physical


# ----------------------------- in-kernel helpers -----------------------------

def _layer_norm(x, w, b, eps=1e-5):
    # x: (T, E) f32; w, b: (1, E) f32 (biased variance, like F.layer_norm)
    mu = jnp.mean(x, axis=-1, keepdims=True)
    xc = x - mu
    var = jnp.mean(xc * xc, axis=-1, keepdims=True)
    return xc * jax.lax.rsqrt(var + eps) * w + b


def _gelu_exact(x):
    # F.gelu default (erf-based), computed in f32
    return 0.5 * x * (1.0 + jax.lax.erf(x * (1.0 / math.sqrt(2.0))))


# --------------------------------- kernels -----------------------------------

def emb_prep_kernel(emb_ref, pad_ref, embw_ref, embb_ref, ln1w_ref, ln1b_ref,
                    x_ref, xln_ref):
    """Embedding LayerNorm + padding zero-fill, fused with layer-0's pre-attn LN."""
    x = _layer_norm(emb_ref[0], embw_ref[...], embb_ref[...]) * (1.0 - pad_ref[0])
    x_ref[0] = x
    xln_ref[0] = _layer_norm(x, ln1w_ref[...], ln1b_ref[...]).astype(jnp.bfloat16)


def fused_layer_kernel(*refs, group_size, head_dim, fill_keypad, compute_delta):
    """One transformer layer.  grid = (B, H//G); the head-group axis accumulates the
    out-projection into a VMEM scratch and runs the FFN tail on its last step."""
    it = iter(refs)
    xln_ref = next(it)       # (1,T,E)      bf16  LN1(x) of this layer
    xres_ref = next(it)      # (1,T,E)      f32   residual stream x
    bias_ref = next(it)      # (1,G,T,T)    f32/bf16  previous layer's scores
    wqkv_ref = next(it)      # (1,E,3*G*Dh) bf16  [Q|K|V], Q pre-scaled
    bqkv_ref = next(it)      # (1,1,3*G*Dh) f32
    wout_ref = next(it)      # (1,G*Dh,E)   bf16
    outb_ref = next(it)      # (1,E)        f32
    ln2w_ref = next(it)      # (1,E)        f32
    ln2b_ref = next(it)      # (1,E)        f32
    fc1w_ref = next(it)      # (E,F)        bf16
    fc1b_ref = next(it)      # (1,F)        f32
    fc2w_ref = next(it)      # (F,E)        bf16
    fc2b_ref = next(it)      # (1,E)        f32
    nlnw_ref = next(it)      # (1,E)        f32   next layer's LN1
    nlnb_ref = next(it)      # (1,E)        f32
    keypad_ref = next(it) if (fill_keypad or compute_delta) else None   # (1,1,1,T)
    inmask_ref = next(it) if compute_delta else None                    # (1,G,T,T) f32
    newbias_ref = next(it)   # (1,G,T,T)
    xout_ref = next(it)      # (1,T,E) f32
    xlnout_ref = next(it)    # (1,T,E) bf16
    delta_ref = next(it) if compute_delta else None                     # (1,G,T,T) f32
    acc_ref = next(it)       # (T,E) f32 scratch (out-projection accumulator)

    hg = pl.program_id(1)
    G, Dh = group_size, head_dim
    GD = G * Dh

    # Grouped QKV projection: bf16 MXU operands, f32 accumulation, N = 3*G*Dh.
    xl = xln_ref[0]                                                    # (T, E) bf16
    qkv = jnp.dot(xl, wqkv_ref[0],
                  preferred_element_type=jnp.float32) + bqkv_ref[0]    # (T, 3GD) f32

    kp = keypad_ref[0, 0] if keypad_ref is not None else None          # (1, T) f32

    ctx_parts = []
    for g in range(G):            # static unroll over the heads of this group
        q = qkv[:, g * Dh:(g + 1) * Dh].astype(jnp.bfloat16)           # (T, Dh)
        k = qkv[:, GD + g * Dh:GD + (g + 1) * Dh].astype(jnp.bfloat16)
        v = qkv[:, 2 * GD + g * Dh:2 * GD + (g + 1) * Dh].astype(jnp.bfloat16)

        b = bias_ref[0, g].astype(jnp.float32)                         # (T, T) f32
        if fill_keypad:
            b = jnp.where(kp > 0.5, -jnp.inf, b)

        # scores = q @ k^T + bias  (pre-softmax; becomes next layer's attn bias)
        s = jax.lax.dot_general(q, k, (((1,), (1,)), ((), ())),
                                preferred_element_type=jnp.float32) + b
        newbias_ref[0, g] = s.astype(newbias_ref.dtype)

        # softmax statistics stay f32; reciprocal goes to the EUP slot
        m = jnp.max(s, axis=-1, keepdims=True)
        p = jnp.exp(s - m)
        denom = jnp.sum(p, axis=-1, keepdims=True)
        probs = p * pl.reciprocal(denom, approx=True)

        ctx_parts.append(jnp.dot(probs.astype(jnp.bfloat16), v,
                                 preferred_element_type=jnp.float32))  # (T, Dh)

        if compute_delta:
            delta_ref[0, g] = jnp.where(kp > 0.5, 0.0, s - inmask_ref[0, g])

    # Grouped out-projection: one (T, G*Dh) @ (G*Dh, E) matmul per grid step.
    ctx = jnp.concatenate(ctx_parts, axis=-1) if G > 1 else ctx_parts[0]
    contrib = jnp.dot(ctx.astype(jnp.bfloat16), wout_ref[0],
                      preferred_element_type=jnp.float32)              # (T, E) f32

    @pl.when(hg == 0)
    def _():
        acc_ref[...] = contrib

    @pl.when(hg > 0)
    def _():
        acc_ref[...] += contrib

    # Fused FFN tail on the last head-group step: proj never touches HBM.
    @pl.when(hg == pl.num_programs(1) - 1)
    def _():
        x = xres_ref[0] + acc_ref[...] + outb_ref[...]                 # (T, E) f32
        residual = x
        xl2 = _layer_norm(x, ln2w_ref[...], ln2b_ref[...])
        h1 = jnp.dot(xl2.astype(jnp.bfloat16), fc1w_ref[...],
                     preferred_element_type=jnp.float32) + fc1b_ref[...]
        h1 = _gelu_exact(h1)
        y = jnp.dot(h1.astype(jnp.bfloat16), fc2w_ref[...],
                    preferred_element_type=jnp.float32) + fc2b_ref[...]
        xo = residual + y
        xout_ref[0] = xo
        xlnout_ref[0] = _layer_norm(xo, nlnw_ref[...],
                                    nlnb_ref[...]).astype(jnp.bfloat16)


# --------------------------------- wrappers -----------------------------------

def emb_prep_call(emb, pad_col, emb_w, emb_b, ln1_w, ln1_b):
    B, T, E = emb.shape

    def vec_spec():
        return pl.BlockSpec((1, E), lambda b: (0, 0))

    return pl.pallas_call(
        emb_prep_kernel,
        out_shape=(jax.ShapeDtypeStruct((B, T, E), jnp.float32),
                   jax.ShapeDtypeStruct((B, T, E), jnp.bfloat16)),
        grid=(B,),
        in_specs=[pl.BlockSpec((1, T, E), lambda b: (b, 0, 0)),
                  pl.BlockSpec((1, T, 1), lambda b: (b, 0, 0)),
                  vec_spec(), vec_spec(), vec_spec(), vec_spec()],
        out_specs=(pl.BlockSpec((1, T, E), lambda b: (b, 0, 0)),
                   pl.BlockSpec((1, T, E), lambda b: (b, 0, 0))),
        compiler_params=pltpu.CompilerParams(
            dimension_semantics=("parallel",),
            vmem_limit_bytes=_VMEM_LIMIT_BYTES),
    )(emb, pad_col, emb_w, emb_b, ln1_w, ln1_b)


def fused_layer_call(x_ln, x_res, bias, keypad, input_mask, lp,
                     next_ln1_w, next_ln1_b, *, group_size, head_dim,
                     fill_keypad, compute_delta, bias_out_dtype, alias_bias=False):
    B, T, E = x_res.shape
    H = bias.shape[1]
    G = group_size
    HG = H // G
    GD = G * head_dim
    Fd = lp["fc1_w"].shape[1]

    kernel = functools.partial(fused_layer_kernel, group_size=G, head_dim=head_dim,
                               fill_keypad=fill_keypad, compute_delta=compute_delta)

    inputs = [x_ln, x_res, bias, lp["wqkv"], lp["bqkv"], lp["wout"], lp["out_b"],
              lp["ln2_w"], lp["ln2_b"], lp["fc1_w"], lp["fc1_b"],
              lp["fc2_w"], lp["fc2_b"], next_ln1_w, next_ln1_b]
    in_specs = [
        pl.BlockSpec((1, T, E), lambda b, g: (b, 0, 0)),
        pl.BlockSpec((1, T, E), lambda b, g: (b, 0, 0)),
        pl.BlockSpec((1, G, T, T), lambda b, g: (b, g, 0, 0)),
        pl.BlockSpec((1, E, 3 * GD), lambda b, g: (g, 0, 0)),
        pl.BlockSpec((1, 1, 3 * GD), lambda b, g: (g, 0, 0)),
        pl.BlockSpec((1, GD, E), lambda b, g: (g, 0, 0)),
        pl.BlockSpec((1, E), lambda b, g: (0, 0)),
        pl.BlockSpec((1, E), lambda b, g: (0, 0)),
        pl.BlockSpec((1, E), lambda b, g: (0, 0)),
        pl.BlockSpec((E, Fd), lambda b, g: (0, 0)),
        pl.BlockSpec((1, Fd), lambda b, g: (0, 0)),
        pl.BlockSpec((Fd, E), lambda b, g: (0, 0)),
        pl.BlockSpec((1, E), lambda b, g: (0, 0)),
        pl.BlockSpec((1, E), lambda b, g: (0, 0)),
        pl.BlockSpec((1, E), lambda b, g: (0, 0)),
    ]
    if fill_keypad or compute_delta:
        inputs.append(keypad)
        in_specs.append(pl.BlockSpec((1, 1, 1, T), lambda b, g: (b, 0, 0, 0)))
    if compute_delta:
        inputs.append(input_mask)
        in_specs.append(pl.BlockSpec((1, G, T, T), lambda b, g: (b, g, 0, 0)))

    out_shapes = [jax.ShapeDtypeStruct((B, H, T, T), bias_out_dtype),
                  jax.ShapeDtypeStruct((B, T, E), jnp.float32),
                  jax.ShapeDtypeStruct((B, T, E), jnp.bfloat16)]
    out_specs = [pl.BlockSpec((1, G, T, T), lambda b, g: (b, g, 0, 0)),
                 pl.BlockSpec((1, T, E), lambda b, g: (b, 0, 0)),
                 pl.BlockSpec((1, T, E), lambda b, g: (b, 0, 0))]
    if compute_delta:
        out_shapes.append(jax.ShapeDtypeStruct((B, H, T, T), jnp.float32))
        out_specs.append(pl.BlockSpec((1, G, T, T), lambda b, g: (b, g, 0, 0)))

    # Middle layers reuse the incoming bf16 bias buffer for the outgoing one.
    aliases = {2: 0} if (alias_bias and bias.dtype == bias_out_dtype) else {}

    return pl.pallas_call(
        kernel,
        out_shape=tuple(out_shapes),
        grid=(B, HG),
        in_specs=in_specs,
        out_specs=tuple(out_specs),
        scratch_shapes=[pltpu.VMEM((T, E), jnp.float32)],
        input_output_aliases=aliases,
        compiler_params=pltpu.CompilerParams(
            dimension_semantics=("parallel", "arbitrary"),
            vmem_limit_bytes=_VMEM_LIMIT_BYTES),
    )(*inputs)


def transformer_encoder_with_pair(emb, attn_mask, padding_mask, params, *, num_heads):
    """emb: (B,T,E) f32; attn_mask: (B*H,T,T) f32; padding_mask: (B,T) bool."""
    B, T, E = emb.shape
    H = num_heads
    Dh = E // H
    layers = params["layers"]
    L = len(layers)
    HG = layers[0]["wqkv"].shape[0]          # number of head groups (static)
    G = H // HG

    pad_f = padding_mask.astype(jnp.float32)
    pad_col = pad_f[:, :, None]                        # (B, T, 1)
    keypad = pad_f[:, None, None, :]                   # (B, 1, 1, T)
    bias0 = attn_mask.reshape(B, H, T, T)              # original (unfilled) bias

    x, x_ln = emb_prep_call(emb, pad_col,
                            params["emb_ln_w"], params["emb_ln_b"],
                            layers[0]["ln1_w"], layers[0]["ln1_b"])

    cur_bias = bias0
    delta = None
    for i, lp in enumerate(layers):
        first, last = (i == 0), (i == L - 1)
        nxt = layers[i + 1] if not last else lp        # last layer's LN1(x) is discarded
        outs = fused_layer_call(
            x_ln, x, cur_bias, keypad, bias0, lp, nxt["ln1_w"], nxt["ln1_b"],
            group_size=G, head_dim=Dh,
            fill_keypad=first, compute_delta=last,
            bias_out_dtype=(jnp.float32 if last else jnp.bfloat16),
            alias_bias=(not first and not last))
        if last:
            cur_bias, x, x_ln, delta = outs
        else:
            cur_bias, x, x_ln = outs

    # Pure layout permutes on the final pair tensors (fused by XLA under jit).
    attn_out = jnp.transpose(cur_bias, (0, 2, 3, 1))   # (B, T, T, H)
    delta_out = jnp.transpose(delta, (0, 2, 3, 1))     # (B, T, T, H)
    return x, attn_out, delta_out


# --------------------------- deterministic params -----------------------------

def init_params(key, num_layers, embed_dim, ffn_dim, num_heads, group_size=None):
    E, Fd, H = embed_dim, ffn_dim, num_heads
    Dh = E // H
    G = group_size if group_size is not None else H
    assert H % G == 0
    HG = H // G
    scale3 = jnp.array([Dh ** (-0.5), 1.0, 1.0], jnp.float32)   # fold scaling into Q

    def nrm(k, shape, scale=0.02):
        return scale * jax.random.normal(k, shape, dtype=jnp.float32)

    keys = iter(jax.random.split(key, num_layers * 8))
    params = {
        "emb_ln_w": jnp.ones((1, E), jnp.float32),
        "emb_ln_b": jnp.zeros((1, E), jnp.float32),
        "layers": [],
    }
    for _ in range(num_layers):
        in_w = nrm(next(keys), (E, 3 * E))      # y = x @ W + b layout, cols = [q|k|v]
        in_b = nrm(next(keys), (1, 3 * E))
        out_w = nrm(next(keys), (E, E))
        out_b = nrm(next(keys), (1, E))
        fc1_w = nrm(next(keys), (E, Fd))
        fc1_b = nrm(next(keys), (1, Fd))
        fc2_w = nrm(next(keys), (Fd, E))
        fc2_b = nrm(next(keys), (1, E))

        # pack per head-group: wqkv[g] = [Q_g | K_g | V_g], each (E, G*Dh), Q pre-scaled
        w3 = in_w.reshape(E, 3, H, Dh) * scale3[None, :, None, None]
        wqkv = (w3.reshape(E, 3, HG, G, Dh)
                  .transpose(2, 0, 1, 3, 4)
                  .reshape(HG, E, 3 * G * Dh)).astype(jnp.bfloat16)
        b3 = in_b.reshape(1, 3, H, Dh) * scale3[None, :, None, None]
        bqkv = (b3.reshape(1, 3, HG, G, Dh)
                  .transpose(2, 0, 1, 3, 4)
                  .reshape(HG, 1, 3 * G * Dh))                       # f32
        wout = out_w.reshape(HG, G * Dh, E).astype(jnp.bfloat16)

        params["layers"].append({
            "ln1_w": jnp.ones((1, E), jnp.float32),
            "ln1_b": jnp.zeros((1, E), jnp.float32),
            "wqkv": wqkv, "bqkv": bqkv,
            "wout": wout, "out_b": out_b,
            "ln2_w": jnp.ones((1, E), jnp.float32),
            "ln2_b": jnp.zeros((1, E), jnp.float32),
            "fc1_w": fc1_w.astype(jnp.bfloat16), "fc1_b": fc1_b,
            "fc2_w": fc2_w.astype(jnp.bfloat16), "fc2_b": fc2_b,
        })
    return params


# ------------------------- pure-JAX reference (checking) -----------------------

def _reference_forward(emb, attn_mask, padding_mask, params, num_heads):
    B, T, E = emb.shape
    H = num_heads
    Dh = E // H
    layers = params["layers"]
    HG = layers[0]["wqkv"].shape[0]
    G = H // HG
    GD = G * Dh

    def ln(x, w, b, eps=1e-5):
        mu = jnp.mean(x, axis=-1, keepdims=True)
        xc = x - mu
        var = jnp.mean(xc * xc, axis=-1, keepdims=True)
        return xc * jax.lax.rsqrt(var + eps) * w + b

    pad = padding_mask.astype(jnp.float32)
    x = ln(emb, params["emb_ln_w"], params["emb_ln_b"]) * (1.0 - pad[:, :, None])

    bias = attn_mask.reshape(B, H, T, T)
    keypad = padding_mask[:, None, None, :]
    filled = jnp.where(keypad, -jnp.inf, bias)
    cur = filled

    def split_heads(a):                       # (B,HG,T,GD) -> (B,H,T,Dh)
        return (a.reshape(B, HG, T, G, Dh)
                 .transpose(0, 1, 3, 2, 4)
                 .reshape(B, H, T, Dh))

    for lp in layers:
        xl = ln(x, lp["ln1_w"], lp["ln1_b"])
        wqkv = lp["wqkv"].astype(jnp.float32)               # (HG, E, 3GD), Q pre-scaled
        qkv = jnp.einsum("bte,gef->bgtf", xl, wqkv) + lp["bqkv"][None]
        q = split_heads(qkv[..., :GD])
        k = split_heads(qkv[..., GD:2 * GD])
        v = split_heads(qkv[..., 2 * GD:])
        scores = jnp.einsum("bhtd,bhsd->bhts", q, k) + cur
        probs = jax.nn.softmax(scores, axis=-1)
        ctx = jnp.einsum("bhts,bhsd->bhtd", probs, v)
        ctx_g = (ctx.reshape(B, HG, G, T, Dh)
                    .transpose(0, 1, 3, 2, 4)
                    .reshape(B, HG, T, GD))
        attn = jnp.einsum("bgtf,gfe->bte", ctx_g,
                          lp["wout"].astype(jnp.float32)) + lp["out_b"]
        x = x + attn
        res = x
        xl2 = ln(x, lp["ln2_w"], lp["ln2_b"])
        h1 = jax.nn.gelu(xl2 @ lp["fc1_w"].astype(jnp.float32) + lp["fc1_b"],
                         approximate=False)
        y = h1 @ lp["fc2_w"].astype(jnp.float32) + lp["fc2_b"]
        x = res + y
        cur = scores
    delta = jnp.where(keypad, 0.0, cur - filled)
    return (x,
            jnp.transpose(cur, (0, 2, 3, 1)),
            jnp.transpose(delta, (0, 2, 3, 1)))


# ----------------------------------- main --------------------------------------

if __name__ == "__main__":
    B, T, E, H, FFN, LAYERS, GROUP = 2, 8, 32, 4, 64, 2, 2

    root = jax.random.PRNGKey(0)
    k_emb, k_bias, k_params = jax.random.split(root, 3)

    emb = jax.random.normal(k_emb, (B, T, E), dtype=jnp.float32)
    attn_mask = 0.1 * jax.random.normal(k_bias, (B * H, T, T), dtype=jnp.float32)
    # batch 1 has its last two tokens padded
    padding_mask = jnp.zeros((B, T), dtype=bool).at[1, -2:].set(True)

    params = init_params(k_params, LAYERS, E, FFN, H, group_size=GROUP)

    fwd = jax.jit(functools.partial(transformer_encoder_with_pair, num_heads=H))
    x_out, pair_attn, delta_pair = fwd(emb, attn_mask, padding_mask, params)
    jax.block_until_ready((x_out, pair_attn, delta_pair))

    assert x_out.shape == (B, T, E)
    assert pair_attn.shape == (B, T, T, H)
    assert delta_pair.shape == (B, T, T, H)
    assert bool(jnp.all(jnp.isfinite(x_out)))
    assert bool(jnp.all(jnp.isfinite(delta_pair)))

    # cross-check against a pure-JAX reference that uses the same (bf16) weights
    x_r, attn_r, delta_r = _reference_forward(emb, attn_mask, padding_mask, params, H)
    finite = jnp.isfinite(attn_r)
    assert bool(jnp.all(jnp.isfinite(pair_attn) == finite))      # same -inf pattern
    assert bool(jnp.allclose(x_out, x_r, atol=2e-2, rtol=2e-2))
    assert bool(jnp.allclose(delta_pair, delta_r, atol=2e-2, rtol=2e-2))
    assert bool(jnp.allclose(jnp.where(finite, pair_attn, 0.0),
                             jnp.where(finite, attn_r, 0.0), atol=2e-2, rtol=2e-2))

    print("KERNEL_OK")
</pallas_src>

<mosaic_0001>
module attributes {stable_mosaic.version = 11 : i64} {
  func.func @emb_prep_kernel(%arg0: i32, %arg1: memref<1x8x32xf32, #tpu.memory_space<vmem>>, %arg2: memref<1x8x1xf32, #tpu.memory_space<vmem>>, %arg3: memref<1x32xf32, #tpu.memory_space<vmem>>, %arg4: memref<1x32xf32, #tpu.memory_space<vmem>>, %arg5: memref<1x32xf32, #tpu.memory_space<vmem>>, %arg6: memref<1x32xf32, #tpu.memory_space<vmem>>, %arg7: memref<1x8x32xf32, #tpu.memory_space<vmem>>, %arg8: memref<1x8x32xbf16, #tpu.memory_space<vmem>>) attributes {dimension_semantics = [#tpu.dimension_semantics<parallel>], iteration_bounds = array<i64: 2>, scalar_prefetch = 0 : i64, scratch_operands = 0 : i64, tpu.core_type = #tpu.core_type<tc>, window_params = [{transform_indices = @transform_0, window_bounds = array<i64: 1, 8, 32>}, {transform_indices = @transform_1, window_bounds = array<i64: 1, 8, 1>}, {pipeline_mode = #tpu.pipeline_mode<synchronous>, transform_indices = @transform_2, window_bounds = array<i64: 1, 32>}, {pipeline_mode = #tpu.pipeline_mode<synchronous>, transform_indices = @transform_3, window_bounds = array<i64: 1, 32>}, {pipeline_mode = #tpu.pipeline_mode<synchronous>, transform_indices = @transform_4, window_bounds = array<i64: 1, 32>}, {pipeline_mode = #tpu.pipeline_mode<synchronous>, transform_indices = @transform_5, window_bounds = array<i64: 1, 32>}, {transform_indices = @transform_6, window_bounds = array<i64: 1, 8, 32>}, {transform_indices = @transform_7, window_bounds = array<i64: 1, 8, 32>}]} {
    %c0 = arith.constant 0 : index
    %c0_0 = arith.constant 0 : index
    %c0_1 = arith.constant 0 : index
    %0 = vector.load %arg1[%c0, %c0_0, %c0_1] : memref<1x8x32xf32, #tpu.memory_space<vmem>>, vector<1x8x32xf32>
    %1 = vector.shape_cast %0 : vector<1x8x32xf32> to vector<8x32xf32>
    %c0_2 = arith.constant 0 : index
    %c0_3 = arith.constant 0 : index
    %2 = vector.load %arg3[%c0_2, %c0_3] : memref<1x32xf32, #tpu.memory_space<vmem>>, vector<1x32xf32>
    %c0_4 = arith.constant 0 : index
    %c0_5 = arith.constant 0 : index
    %3 = vector.load %arg4[%c0_4, %c0_5] : memref<1x32xf32, #tpu.memory_space<vmem>>, vector<1x32xf32>
    %cst = arith.constant dense<0.000000e+00> : vector<8xf32>
    %4 = vector.multi_reduction <add>, %1, %cst [1] : vector<8x32xf32> to vector<8xf32>
    %5 = vector.shape_cast %4 : vector<8xf32> to vector<8x1xf32>
    %cst_6 = arith.constant 3.200000e+01 : f32
    %6 = vector.broadcast %cst_6 : f32 to vector<8x1xf32>
    %7 = arith.divf %5, %6 : vector<8x1xf32>
    %8 = vector.broadcast %7 : vector<8x1xf32> to vector<8x32xf32>
    %9 = arith.subf %1, %8 : vector<8x32xf32>
    %10 = arith.mulf %9, %9 : vector<8x32xf32>
    %cst_7 = arith.constant dense<0.000000e+00> : vector<8xf32>
    %11 = vector.multi_reduction <add>, %10, %cst_7 [1] : vector<8x32xf32> to vector<8xf32>
    %12 = vector.shape_cast %11 : vector<8xf32> to vector<8x1xf32>
    %cst_8 = arith.constant 3.200000e+01 : f32
    %13 = vector.broadcast %cst_8 : f32 to vector<8x1xf32>
    %14 = arith.divf %12, %13 : vector<8x1xf32>
    %cst_9 = arith.constant 9.99999974E-6 : f32
    %15 = vector.broadcast %cst_9 : f32 to vector<8x1xf32>
    %16 = arith.addf %14, %15 : vector<8x1xf32>
    %17 = math.rsqrt %16 : vector<8x1xf32>
    %18 = vector.broadcast %17 : vector<8x1xf32> to vector<8x32xf32>
    %19 = arith.mulf %9, %18 : vector<8x32xf32>
    %20 = vector.broadcast %2 : vector<1x32xf32> to vector<8x32xf32>
    %21 = arith.mulf %19, %20 : vector<8x32xf32>
    %22 = vector.broadcast %3 : vector<1x32xf32> to vector<8x32xf32>
    %23 = arith.addf %21, %22 : vector<8x32xf32>
    %c0_10 = arith.constant 0 : index
    %c0_11 = arith.constant 0 : index
    %c0_12 = arith.constant 0 : index
    %24 = vector.load %arg2[%c0_10, %c0_11, %c0_12] : memref<1x8x1xf32, #tpu.memory_space<vmem>>, vector<1x8x1xf32>
    %25 = vector.shape_cast %24 : vector<1x8x1xf32> to vector<8x1xf32>
    %cst_13 = arith.constant 1.000000e+00 : f32
    %26 = vector.broadcast %cst_13 : f32 to vector<8x1xf32>
    %27 = arith.subf %26, %25 : vector<8x1xf32>
    %28 = vector.broadcast %27 : vector<8x1xf32> to vector<8x32xf32>
    %29 = arith.mulf %23, %28 : vector<8x32xf32>
    %c0_14 = arith.constant 0 : index
    %c0_15 = arith.constant 0 : index
    %c0_16 = arith.constant 0 : index
    %30 = vector.load %arg7[%c0_14, %c0_15, %c0_16] : memref<1x8x32xf32, #tpu.memory_space<vmem>>, vector<1x8x32xf32>
    %31 = vector.shape_cast %30 : vector<1x8x32xf32> to vector<8x32xf32>
    %32 = vector.shape_cast %29 : vector<8x32xf32> to vector<1x8x32xf32>
    tpu.vector_store %arg7[%c0_14, %c0_15, %c0_16], %32 {strides = array<i32>} : memref<1x8x32xf32, #tpu.memory_space<vmem>>, vector<1x8x32xf32>,
    %c0_17 = arith.constant 0 : index
    %c0_18 = arith.constant 0 : index
    %33 = vector.load %arg5[%c0_17, %c0_18] : memref<1x32xf32, #tpu.memory_space<vmem>>, vector<1x32xf32>
    %c0_19 = arith.constant 0 : index
    %c0_20 = arith.constant 0 : index
    %34 = vector.load %arg6[%c0_19, %c0_20] : memref<1x32xf32, #tpu.memory_space<vmem>>, vector<1x32xf32>
    %cst_21 = arith.constant dense<0.000000e+00> : vector<8xf32>
    %35 = vector.multi_reduction <add>, %29, %cst_21 [1] : vector<8x32xf32> to vector<8xf32>
    %36 = vector.shape_cast %35 : vector<8xf32> to vector<8x1xf32>
    %cst_22 = arith.constant 3.200000e+01 : f32
    %37 = vector.broadcast %cst_22 : f32 to vector<8x1xf32>
    %38 = arith.divf %36, %37 : vector<8x1xf32>
    %39 = vector.broadcast %38 : vector<8x1xf32> to vector<8x32xf32>
    %40 = arith.subf %29, %39 : vector<8x32xf32>
    %41 = arith.mulf %40, %40 : vector<8x32xf32>
    %cst_23 = arith.constant dense<0.000000e+00> : vector<8xf32>
    %42 = vector.multi_reduction <add>, %41, %cst_23 [1] : vector<8x32xf32> to vector<8xf32>
    %43 = vector.shape_cast %42 : vector<8xf32> to vector<8x1xf32>
    %cst_24 = arith.constant 3.200000e+01 : f32
    %44 = vector.broadcast %cst_24 : f32 to vector<8x1xf32>
    %45 = arith.divf %43, %44 : vector<8x1xf32>
    %cst_25 = arith.constant 9.99999974E-6 : f32
    %46 = vector.broadcast %cst_25 : f32 to vector<8x1xf32>
    %47 = arith.addf %45, %46 : vector<8x1xf32>
    %48 = math.rsqrt %47 : vector<8x1xf32>
    %49 = vector.broadcast %48 : vector<8x1xf32> to vector<8x32xf32>
    %50 = arith.mulf %40, %49 : vector<8x32xf32>
    %51 = vector.broadcast %33 : vector<1x32xf32> to vector<8x32xf32>
    %52 = arith.mulf %50, %51 : vector<8x32xf32>
    %53 = vector.broadcast %34 : vector<1x32xf32> to vector<8x32xf32>
    %54 = arith.addf %52, %53 : vector<8x32xf32>
    %55 = arith.truncf %54 : vector<8x32xf32> to vector<8x32xbf16>
    %c0_26 = arith.constant 0 : index
    %c0_27 = arith.constant 0 : index
    %c0_28 = arith.constant 0 : index
    %56 = vector.load %arg8[%c0_26, %c0_27, %c0_28] : memref<1x8x32xbf16, #tpu.memory_space<vmem>>, vector<1x8x32xbf16>
    %57 = vector.shape_cast %56 : vector<1x8x32xbf16> to vector<8x32xbf16>
    %58 = vector.shape_cast %55 : vector<8x32xbf16> to vector<1x8x32xbf16>
    tpu.vector_store %arg8[%c0_26, %c0_27, %c0_28], %58 {strides = array<i32>} : memref<1x8x32xbf16, #tpu.memory_space<vmem>>, vector<1x8x32xbf16>,
    return
  }
  func.func @transform_0(%arg0: i32) -> (i32, i32, i32) {
    %c0_i32 = arith.constant 0 : i32
    %c0_i32_0 = arith.constant 0 : i32
    %c0_i32_1 = arith.constant 0 : i32
    return %arg0, %c0_i32, %c0_i32_0 : i32, i32, i32
  }
  func.func @transform_1(%arg0: i32) -> (i32, i32, i32) {
    %c0_i32 = arith.constant 0 : i32
    %c0_i32_0 = arith.constant 0 : i32
    %c0_i32_1 = arith.constant 0 : i32
    return %arg0, %c0_i32, %c0_i32_0 : i32, i32, i32
  }
  func.func @transform_2(%arg0: i32) -> (i32, i32) {
    %c0_i32 = arith.constant 0 : i32
    %c0_i32_0 = arith.constant 0 : i32
    %c0_i32_1 = arith.constant 0 : i32
    return %c0_i32, %c0_i32_0 : i32, i32
  }
  func.func @transform_3(%arg0: i32) -> (i32, i32) {
    %c0_i32 = arith.constant 0 : i32
    %c0_i32_0 = arith.constant 0 : i32
    %c0_i32_1 = arith.constant 0 : i32
    return %c0_i32, %c0_i32_0 : i32, i32
  }
  func.func @transform_4(%arg0: i32) -> (i32, i32) {
    %c0_i32 = arith.constant 0 : i32
    %c0_i32_0 = arith.constant 0 : i32
    %c0_i32_1 = arith.constant 0 : i32
    return %c0_i32, %c0_i32_0 : i32, i32
  }
  func.func @transform_5(%arg0: i32) -> (i32, i32) {
    %c0_i32 = arith.constant 0 : i32
    %c0_i32_0 = arith.constant 0 : i32
    %c0_i32_1 = arith.constant 0 : i32
    return %c0_i32, %c0_i32_0 : i32, i32
  }
  func.func @transform_6(%arg0: i32) -> (i32, i32, i32) {
    %c0_i32 = arith.constant 0 : i32
    %c0_i32_0 = arith.constant 0 : i32
    %c0_i32_1 = arith.constant 0 : i32
    return %arg0, %c0_i32, %c0_i32_0 : i32, i32, i32
  }
  func.func @transform_7(%arg0: i32) -> (i32, i32, i32) {
    %c0_i32 = arith.constant 0 : i32
    %c0_i32_0 = arith.constant 0 : i32
    %c0_i32_1 = arith.constant 0 : i32
    return %arg0, %c0_i32, %c0_i32_0 : i32, i32, i32
  }
}

module attributes {stable_mosaic.version = 11 : i64} {
  func.func @fused_layer_kernel(%arg0: i32, %arg1: i32, %arg2: memref<1x8x32xbf16, #tpu.memory_space<vmem>>, %arg3: memref<1x8x32xf32, #tpu.memory_space<vmem>>, %arg4: memref<1x2x8x8xf32, #tpu.memory_space<vmem>>, %arg5: memref<1x32x48xbf16, #tpu.memory_space<vmem>>, %arg6: memref<1x1x48xf32, #tpu.memory_space<vmem>>, %arg7: memref<1x16x32xbf16, #tpu.memory_space<vmem>>, %arg8: memref<1x32xf32, #tpu.memory_space<vmem>>, %arg9: memref<1x32xf32, #tpu.memory_space<vmem>>, %arg10: memref<1x32xf32, #tpu.memory_space<vmem>>, %arg11: memref<32x64xbf16, #tpu.memory_space<vmem>>, %arg12: memref<1x64xf32, #tpu.memory_space<vmem>>, %arg13: memref<64x32xbf16, #tpu.memory_space<vmem>>, %arg14: memref<1x32xf32, #tpu.memory_space<vmem>>, %arg15: memref<1x32xf32, #tpu.memory_space<vmem>>, %arg16: memref<1x32xf32, #tpu.memory_space<vmem>>, %arg17: memref<1x1x1x8xf32, #tpu.memory_space<vmem>>, %arg18: memref<1x2x8x8xbf16, #tpu.memory_space<vmem>>, %arg19: memref<1x8x32xf32, #tpu.memory_space<vmem>>, %arg20: memref<1x8x32xbf16, #tpu.memory_space<vmem>>, %arg21: memref<8x32xf32, #tpu.memory_space<vmem>>) attributes {dimension_semantics = [#tpu.dimension_semantics<parallel>, #tpu.dimension_semantics<arbitrary>], iteration_bounds = array<i64: 2, 2>, scalar_prefetch = 0 : i64, scratch_operands = 1 : i64, tpu.core_type = #tpu.core_type<tc>, window_params = [{transform_indices = @transform_0, window_bounds = array<i64: 1, 8, 32>}, {transform_indices = @transform_1, window_bounds = array<i64: 1, 8, 32>}, {transform_indices = @transform_2, window_bounds = array<i64: 1, 2, 8, 8>}, {transform_indices = @transform_3, window_bounds = array<i64: 1, 32, 48>}, {transform_indices = @transform_4, window_bounds = array<i64: 1, 1, 48>}, {transform_indices = @transform_5, window_bounds = array<i64: 1, 16, 32>}, {pipeline_mode = #tpu.pipeline_mode<synchronous>, transform_indices = @transform_6, window_bounds = array<i64: 1, 32>}, {pipeline_mode = #tpu.pipeline_mode<synchronous>, transform_indices = @transform_7, window_bounds = array<i64: 1, 32>}, {pipeline_mode = #tpu.pipeline_mode<synchronous>, transform_indices = @transform_8, window_bounds = array<i64: 1, 32>}, {pipeline_mode = #tpu.pipeline_mode<synchronous>, transform_indices = @transform_9, window_bounds = array<i64: 32, 64>}, {pipeline_mode = #tpu.pipeline_mode<synchronous>, transform_indices = @transform_10, window_bounds = array<i64: 1, 64>}, {pipeline_mode = #tpu.pipeline_mode<synchronous>, transform_indices = @transform_11, window_bounds = array<i64: 64, 32>}, {pipeline_mode = #tpu.pipeline_mode<synchronous>, transform_indices = @transform_12, window_bounds = array<i64: 1, 32>}, {pipeline_mode = #tpu.pipeline_mode<synchronous>, transform_indices = @transform_13, window_bounds = array<i64: 1, 32>}, {pipeline_mode = #tpu.pipeline_mode<synchronous>, transform_indices = @transform_14, window_bounds = array<i64: 1, 32>}, {transform_indices = @transform_15, window_bounds = array<i64: 1, 1, 1, 8>}, {transform_indices = @transform_16, window_bounds = array<i64: 1, 2, 8, 8>}, {transform_indices = @transform_17, window_bounds = array<i64: 1, 8, 32>}, {transform_indices = @transform_18, window_bounds = array<i64: 1, 8, 32>}]} {
    %c0 = arith.constant 0 : index
    %c0_0 = arith.constant 0 : index
    %c0_1 = arith.constant 0 : index
    %0 = vector.load %arg2[%c0, %c0_0, %c0_1] : memref<1x8x32xbf16, #tpu.memory_space<vmem>>, vector<1x8x32xbf16>
    %1 = vector.shape_cast %0 : vector<1x8x32xbf16> to vector<8x32xbf16>
    %c0_2 = arith.constant 0 : index
    %c0_3 = arith.constant 0 : index
    %c0_4 = arith.constant 0 : index
    %2 = vector.load %arg5[%c0_2, %c0_3, %c0_4] : memref<1x32x48xbf16, #tpu.memory_space<vmem>>, vector<1x32x48xbf16>
    %3 = vector.shape_cast %2 : vector<1x32x48xbf16> to vector<32x48xbf16>
    %cst = arith.constant dense<0.000000e+00> : vector<8x48xf32>
    %4 = tpu.matmul %1, %3, %cst {dimension_numbers = #tpu.dot_dimension_numbers<[1], [0], [0], [1], [0, 0, 1, 1], [], []>} : vector<8x32xbf16>, vector<32x48xbf16>, vector<8x48xf32> -> vector<8x48xf32>
    %c0_5 = arith.constant 0 : index
    %c0_6 = arith.constant 0 : index
    %c0_7 = arith.constant 0 : index
    %5 = vector.load %arg6[%c0_5, %c0_6, %c0_7] : memref<1x1x48xf32, #tpu.memory_space<vmem>>, vector<1x1x48xf32>
    %6 = vector.shape_cast %5 : vector<1x1x48xf32> to vector<1x48xf32>
    %7 = vector.broadcast %6 : vector<1x48xf32> to vector<8x48xf32>
    %8 = arith.addf %4, %7 : vector<8x48xf32>
    %c0_8 = arith.constant 0 : index
    %c0_9 = arith.constant 0 : index
    %c0_10 = arith.constant 0 : index
    %c0_11 = arith.constant 0 : index
    %9 = vector.load %arg17[%c0_8, %c0_9, %c0_10, %c0_11] : memref<1x1x1x8xf32, #tpu.memory_space<vmem>>, vector<1x1x1x8xf32>
    %10 = vector.shape_cast %9 : vector<1x1x1x8xf32> to vector<1x8xf32>
    %11 = vector.extract_strided_slice %8 {offsets = [0, 0], sizes = [8, 8], strides = [1, 1]} : vector<8x48xf32> to vector<8x8xf32>
    %12 = arith.truncf %11 : vector<8x8xf32> to vector<8x8xbf16>
    %13 = vector.extract_strided_slice %8 {offsets = [0, 16], sizes = [8, 8], strides = [1, 1]} : vector<8x48xf32> to vector<8x8xf32>
    %14 = arith.truncf %13 : vector<8x8xf32> to vector<8x8xbf16>
    %15 = vector.extract_strided_slice %8 {offsets = [0, 32], sizes = [8, 8], strides = [1, 1]} : vector<8x48xf32> to vector<8x8xf32>
    %16 = arith.truncf %15 : vector<8x8xf32> to vector<8x8xbf16>
    %c0_12 = arith.constant 0 : index
    %c0_13 = arith.constant 0 : index
    %c0_14 = arith.constant 0 : index
    %c0_15 = arith.constant 0 : index
    %17 = vector.load %arg4[%c0_12, %c0_13, %c0_14, %c0_15] : memref<1x2x8x8xf32, #tpu.memory_space<vmem>>, vector<1x1x8x8xf32>
    %18 = vector.shape_cast %17 : vector<1x1x8x8xf32> to vector<8x8xf32>
    %cst_16 = arith.constant 5.000000e-01 : f32
    %19 = vector.broadcast %cst_16 : f32 to vector<1x8xf32>
    %20 = arith.cmpf ogt, %10, %19 : vector<1x8xf32>
    %cst_17 = arith.constant 0xFF800000 : f32
    %21 = vector.shape_cast %20 : vector<1x8xi1> to vector<1x8xi1>
    %22 = vector.broadcast %21 : vector<1x8xi1> to vector<8x8xi1>
    %23 = vector.broadcast %cst_17 : f32 to vector<8x8xf32>
    %24 = arith.select %22, %23, %18 : vector<8x8xi1>, vector<8x8xf32>
    %cst_18 = arith.constant dense<0.000000e+00> : vector<8x8xf32>
    %25 = tpu.matmul %12, %14, %cst_18 {dimension_numbers = #tpu.dot_dimension_numbers<[1], [1], [0], [0], [0, 0, 1, 0], [], []>} : vector<8x8xbf16>, vector<8x8xbf16>, vector<8x8xf32> -> vector<8x8xf32>
    %26 = arith.addf %25, %24 : vector<8x8xf32>
    %27 = arith.truncf %26 : vector<8x8xf32> to vector<8x8xbf16>
    %c0_19 = arith.constant 0 : index
    %c0_20 = arith.constant 0 : index
    %c0_21 = arith.constant 0 : index
    %c0_22 = arith.constant 0 : index
    %28 = vector.load %arg18[%c0_19, %c0_20, %c0_21, %c0_22] : memref<1x2x8x8xbf16, #tpu.memory_space<vmem>>, vector<1x1x8x8xbf16>
    %29 = vector.shape_cast %28 : vector<1x1x8x8xbf16> to vector<8x8xbf16>
    %30 = vector.shape_cast %27 : vector<8x8xbf16> to vector<1x1x8x8xbf16>
    tpu.vector_store %arg18[%c0_19, %c0_20, %c0_21, %c0_22], %30 {strides = array<i32>} : memref<1x2x8x8xbf16, #tpu.memory_space<vmem>>, vector<1x1x8x8xbf16>,
    %cst_23 = arith.constant dense<0xFF800000> : vector<8xf32>
    %31 = vector.multi_reduction <maximumf>, %26, %cst_23 [1] : vector<8x8xf32> to vector<8xf32>
    %32 = vector.shape_cast %31 : vector<8xf32> to vector<8x1xf32>
    %33 = vector.broadcast %32 : vector<8x1xf32> to vector<8x8xf32>
    %34 = arith.subf %26, %33 : vector<8x8xf32>
    %35 = math.exp %34 : vector<8x8xf32>
    %cst_24 = arith.constant dense<0.000000e+00> : vector<8xf32>
    %36 = vector.multi_reduction <add>, %35, %cst_24 [1] : vector<8x8xf32> to vector<8xf32>
    %37 = vector.shape_cast %36 : vector<8xf32> to vector<8x1xf32>
    %38 = tpu.reciprocal %37 {approx = true} : vector<8x1xf32> -> vector<8x1xf32>
    %39 = vector.broadcast %38 : vector<8x1xf32> to vector<8x8xf32>
    %40 = arith.mulf %35, %39 : vector<8x8xf32>
    %41 = arith.truncf %40 : vector<8x8xf32> to vector<8x8xbf16>
    %cst_25 = arith.constant dense<0.000000e+00> : vector<8x8xf32>
    %42 = tpu.matmul %41, %16, %cst_25 {dimension_numbers = #tpu.dot_dimension_numbers<[1], [0], [0], [1], [0, 0, 1, 1], [], []>} : vector<8x8xbf16>, vector<8x8xbf16>, vector<8x8xf32> -> vector<8x8xf32>
    %43 = vector.extract_strided_slice %8 {offsets = [0, 8], sizes = [8, 8], strides = [1, 1]} : vector<8x48xf32> to vector<8x8xf32>
    %44 = arith.truncf %43 : vector<8x8xf32> to vector<8x8xbf16>
    %45 = vector.extract_strided_slice %8 {offsets = [0, 24], sizes = [8, 8], strides = [1, 1]} : vector<8x48xf32> to vector<8x8xf32>
    %46 = arith.truncf %45 : vector<8x8xf32> to vector<8x8xbf16>
    %47 = vector.extract_strided_slice %8 {offsets = [0, 40], sizes = [8, 8], strides = [1, 1]} : vector<8x48xf32> to vector<8x8xf32>
    %48 = arith.truncf %47 : vector<8x8xf32> to vector<8x8xbf16>
    %c0_26 = arith.constant 0 : index
    %c1 = arith.constant 1 : index
    %c0_27 = arith.constant 0 : index
    %c0_28 = arith.constant 0 : index
    %49 = vector.load %arg4[%c0_26, %c1, %c0_27, %c0_28] : memref<1x2x8x8xf32, #tpu.memory_space<vmem>>, vector<1x1x8x8xf32>
    %50 = vector.shape_cast %49 : vector<1x1x8x8xf32> to vector<8x8xf32>
    %cst_29 = arith.constant 5.000000e-01 : f32
    %51 = vector.broadcast %cst_29 : f32 to vector<1x8xf32>
    %52 = arith.cmpf ogt, %10, %51 : vector<1x8xf32>
    %cst_30 = arith.constant 0xFF800000 : f32
    %53 = vector.shape_cast %52 : vector<1x8xi1> to vector<1x8xi1>
    %54 = vector.broadcast %53 : vector<1x8xi1> to vector<8x8xi1>
    %55 = vector.broadcast %cst_30 : f32 to vector<8x8xf32>
    %56 = arith.select %54, %55, %50 : vector<8x8xi1>, vector<8x8xf32>
    %cst_31 = arith.constant dense<0.000000e+00> : vector<8x8xf32>
    %57 = tpu.matmul %44, %46, %cst_31 {dimension_numbers = #tpu.dot_dimension_numbers<[1], [1], [0], [0], [0, 0, 1, 0], [], []>} : vector<8x8xbf16>, vector<8x8xbf16>, vector<8x8xf32> -> vector<8x8xf32>
    %58 = arith.addf %57, %56 : vector<8x8xf32>
    %59 = arith.truncf %58 : vector<8x8xf32> to vector<8x8xbf16>
    %c0_32 = arith.constant 0 : index
    %c1_33 = arith.constant 1 : index
    %c0_34 = arith.constant 0 : index
    %c0_35 = arith.constant 0 : index
    %60 = vector.load %arg18[%c0_32, %c1_33, %c0_34, %c0_35] : memref<1x2x8x8xbf16, #tpu.memory_space<vmem>>, vector<1x1x8x8xbf16>
    %61 = vector.shape_cast %60 : vector<1x1x8x8xbf16> to vector<8x8xbf16>
    %62 = vector.shape_cast %59 : vector<8x8xbf16> to vector<1x1x8x8xbf16>
    tpu.vector_store %arg18[%c0_32, %c1_33, %c0_34, %c0_35], %62 {strides = array<i32>} : memref<1x2x8x8xbf16, #tpu.memory_space<vmem>>, vector<1x1x8x8xbf16>,
    %cst_36 = arith.constant dense<0xFF800000> : vector<8xf32>
    %63 = vector.multi_reduction <maximumf>, %58, %cst_36 [1] : vector<8x8xf32> to vector<8xf32>
    %64 = vector.shape_cast %63 : vector<8xf32> to vector<8x1xf32>
    %65 = vector.broadcast %64 : vector<8x1xf32> to vector<8x8xf32>
    %66 = arith.subf %58, %65 : vector<8x8xf32>
    %67 = math.exp %66 : vector<8x8xf32>
    %cst_37 = arith.constant dense<0.000000e+00> : vector<8xf32>
    %68 = vector.multi_reduction <add>, %67, %cst_37 [1] : vector<8x8xf32> to vector<8xf32>
    %69 = vector.shape_cast %68 : vector<8xf32> to vector<8x1xf32>
    %70 = tpu.reciprocal %69 {approx = true} : vector<8x1xf32> -> vector<8x1xf32>
    %71 = vector.broadcast %70 : vector<8x1xf32> to vector<8x8xf32>
    %72 = arith.mulf %67, %71 : vector<8x8xf32>
    %73 = arith.truncf %72 : vector<8x8xf32> to vector<8x8xbf16>
    %cst_38 = arith.constant dense<0.000000e+00> : vector<8x8xf32>
    %74 = tpu.matmul %73, %48, %cst_38 {dimension_numbers = #tpu.dot_dimension_numbers<[1], [0], [0], [1], [0, 0, 1, 1], [], []>} : vector<8x8xbf16>, vector<8x8xbf16>, vector<8x8xf32> -> vector<8x8xf32>
    %75 = tpu.concatenate %42, %74 in 1 : vector<8x8xf32>, vector<8x8xf32> -> vector<8x16xf32>
    %76 = arith.truncf %75 : vector<8x16xf32> to vector<8x16xbf16>
    %c0_39 = arith.constant 0 : index
    %c0_40 = arith.constant 0 : index
    %c0_41 = arith.constant 0 : index
    %77 = vector.load %arg7[%c0_39, %c0_40, %c0_41] : memref<1x16x32xbf16, #tpu.memory_space<vmem>>, vector<1x16x32xbf16>
    %78 = vector.shape_cast %77 : vector<1x16x32xbf16> to vector<16x32xbf16>
    %cst_42 = arith.constant dense<0.000000e+00> : vector<8x32xf32>
    %79 = tpu.matmul %76, %78, %cst_42 {dimension_numbers = #tpu.dot_dimension_numbers<[1], [0], [0], [1], [0, 0, 1, 1], [], []>} : vector<8x16xbf16>, vector<16x32xbf16>, vector<8x32xf32> -> vector<8x32xf32>
    %c0_i32 = arith.constant 0 : i32
    %80 = arith.cmpi eq, %arg1, %c0_i32 : i32
    %81 = arith.extui %80 : i1 to i32
    %c0_i32_43 = arith.constant 0 : i32
    %82 = arith.cmpi ne, %81, %c0_i32_43 : i32
    scf.if %82 {
      %c0_47 = arith.constant 0 : index
      %c0_48 = arith.constant 0 : index
      %89 = vector.load %arg21[%c0_47, %c0_48] : memref<8x32xf32, #tpu.memory_space<vmem>>, vector<8x32xf32>
      tpu.vector_store %arg21[%c0_47, %c0_48], %79 {strides = array<i32>} : memref<8x32xf32, #tpu.memory_space<vmem>>, vector<8x32xf32>,
    } else {
    }
    %c0_i32_44 = arith.constant 0 : i32
    %83 = arith.cmpi sgt, %arg1, %c0_i32_44 : i32
    %84 = arith.extui %83 : i1 to i32
    %c0_i32_45 = arith.constant 0 : i32
    %85 = arith.cmpi ne, %84, %c0_i32_45 : i32
    scf.if %85 {
      %c0_47 = arith.constant 0 : index
      %c0_48 = arith.constant 0 : index
      %89 = vector.load %arg21[%c0_47, %c0_48] : memref<8x32xf32, #tpu.memory_space<vmem>>, vector<8x32xf32>
      %90 = arith.addf %89, %79 : vector<8x32xf32>
      %c0_49 = arith.constant 0 : index
      %c0_50 = arith.constant 0 : index
      %91 = vector.load %arg21[%c0_49, %c0_50] : memref<8x32xf32, #tpu.memory_space<vmem>>, vector<8x32xf32>
      tpu.vector_store %arg21[%c0_49, %c0_50], %90 {strides = array<i32>} : memref<8x32xf32, #tpu.memory_space<vmem>>, vector<8x32xf32>,
    } else {
    }
    %c1_i32 = arith.constant 1 : i32
    %86 = arith.cmpi eq, %arg1, %c1_i32 : i32
    %87 = arith.extui %86 : i1 to i32
    %c0_i32_46 = arith.constant 0 : i32
    %88 = arith.cmpi ne, %87, %c0_i32_46 : i32
    scf.if %88 {
      %c0_47 = arith.constant 0 : index
      %c0_48 = arith.constant 0 : index
      %c0_49 = arith.constant 0 : index
      %89 = vector.load %arg3[%c0_47, %c0_48, %c0_49] : memref<1x8x32xf32, #tpu.memory_space<vmem>>, vector<1x8x32xf32>
      %90 = vector.shape_cast %89 : vector<1x8x32xf32> to vector<8x32xf32>
      %c0_50 = arith.constant 0 : index
      %c0_51 = arith.constant 0 : index
      %91 = vector.load %arg21[%c0_50, %c0_51] : memref<8x32xf32, #tpu.memory_space<vmem>>, vector<8x32xf32>
      %92 = arith.addf %90, %91 : vector<8x32xf32>
      %c0_52 = arith.constant 0 : index
      %c0_53 = arith.constant 0 : index
      %93 = vector.load %arg8[%c0_52, %c0_53] : memref<1x32xf32, #tpu.memory_space<vmem>>, vector<1x32xf32>
      %94 = vector.broadcast %93 : vector<1x32xf32> to vector<8x32xf32>
      %95 = arith.addf %92, %94 : vector<8x32xf32>
      %c0_54 = arith.constant 0 : index
      %c0_55 = arith.constant 0 : index
      %96 = vector.load %arg9[%c0_54, %c0_55] : memref<1x32xf32, #tpu.memory_space<vmem>>, vector<1x32xf32>
      %c0_56 = arith.constant 0 : index
      %c0_57 = arith.constant 0 : index
      %97 = vector.load %arg10[%c0_56, %c0_57] : memref<1x32xf32, #tpu.memory_space<vmem>>, vector<1x32xf32>
      %cst_58 = arith.constant dense<0.000000e+00> : vector<8xf32>
      %98 = vector.multi_reduction <add>, %95, %cst_58 [1] : vector<8x32xf32> to vector<8xf32>
      %99 = vector.shape_cast %98 : vector<8xf32> to vector<8x1xf32>
      %cst_59 = arith.constant 3.200000e+01 : f32
      %100 = vector.broadcast %cst_59 : f32 to vector<8x1xf32>
      %101 = arith.divf %99, %100 : vector<8x1xf32>
      %102 = vector.broadcast %101 : vector<8x1xf32> to vector<8x32xf32>
      %103 = arith.subf %95, %102 : vector<8x32xf32>
      %104 = arith.mulf %103, %103 : vector<8x32xf32>
      %cst_60 = arith.constant dense<0.000000e+00> : vector<8xf32>
      %105 = vector.multi_reduction <add>, %104, %cst_60 [1] : vector<8x32xf32> to vector<8xf32>
      %106 = vector.shape_cast %105 : vector<8xf32> to vector<8x1xf32>
      %cst_61 = arith.constant 3.200000e+01 : f32
      %107 = vector.broadcast %cst_61 : f32 to vector<8x1xf32>
      %108 = arith.divf %106, %107 : vector<8x1xf32>
      %cst_62 = arith.constant 9.99999974E-6 : f32
      %109 = vector.broadcast %cst_62 : f32 to vector<8x1xf32>
      %110 = arith.addf %108, %109 : vector<8x1xf32>
      %111 = math.rsqrt %110 : vector<8x1xf32>
      %112 = vector.broadcast %111 : vector<8x1xf32> to vector<8x32xf32>
      %113 = arith.mulf %103, %112 : vector<8x32xf32>
      %114 = vector.broadcast %96 : vector<1x32xf32> to vector<8x32xf32>
      %115 = arith.mulf %113, %114 : vector<8x32xf32>
      %116 = vector.broadcast %97 : vector<1x32xf32> to vector<8x32xf32>
      %117 = arith.addf %115, %116 : vector<8x32xf32>
      %118 = arith.truncf %117 : vector<8x32xf32> to vector<8x32xbf16>
      %c0_63 = arith.constant 0 : index
      %c0_64 = arith.constant 0 : index
      %119 = vector.load %arg11[%c0_63, %c0_64] : memref<32x64xbf16, #tpu.memory_space<vmem>>, vector<32x64xbf16>
      %cst_65 = arith.constant dense<0.000000e+00> : vector<8x64xf32>
      %120 = tpu.matmul %118, %119, %cst_65 {dimension_numbers = #tpu.dot_dimension_numbers<[1], [0], [0], [1], [0, 0, 1, 1], [], []>} : vector<8x32xbf16>, vector<32x64xbf16>, vector<8x64xf32> -> vector<8x64xf32>
      %c0_66 = arith.constant 0 : index
      %c0_67 = arith.constant 0 : index
      %121 = vector.load %arg12[%c0_66, %c0_67] : memref<1x64xf32, #tpu.memory_space<vmem>>, vector<1x64xf32>
      %122 = vector.broadcast %121 : vector<1x64xf32> to vector<8x64xf32>
      %123 = arith.addf %120, %122 : vector<8x64xf32>
      %cst_68 = arith.constant 5.000000e-01 : f32
      %124 = vector.broadcast %cst_68 : f32 to vector<8x64xf32>
      %125 = arith.mulf %124, %123 : vector<8x64xf32>
      %cst_69 = arith.constant 0.707106769 : f32
      %126 = vector.broadcast %cst_69 : f32 to vector<8x64xf32>
      %127 = arith.mulf %123, %126 : vector<8x64xf32>
      %128 = math.erf %127 : vector<8x64xf32>
      %cst_70 = arith.constant 1.000000e+00 : f32
      %129 = vector.broadcast %cst_70 : f32 to vector<8x64xf32>
      %130 = arith.addf %129, %128 : vector<8x64xf32>
      %131 = arith.mulf %125, %130 : vector<8x64xf32>
      %132 = arith.truncf %131 : vector<8x64xf32> to vector<8x64xbf16>
      %c0_71 = arith.constant 0 : index
      %c0_72 = arith.constant 0 : index
      %133 = vector.load %arg13[%c0_71, %c0_72] : memref<64x32xbf16, #tpu.memory_space<vmem>>, vector<64x32xbf16>
      %cst_73 = arith.constant dense<0.000000e+00> : vector<8x32xf32>
      %134 = tpu.matmul %132, %133, %cst_73 {dimension_numbers = #tpu.dot_dimension_numbers<[1], [0], [0], [1], [0, 0, 1, 1], [], []>} : vector<8x64xbf16>, vector<64x32xbf16>, vector<8x32xf32> -> vector<8x32xf32>
      %c0_74 = arith.constant 0 : index
      %c0_75 = arith.constant 0 : index
      %135 = vector.load %arg14[%c0_74, %c0_75] : memref<1x32xf32, #tpu.memory_space<vmem>>, vector<1x32xf32>
      %136 = vector.broadcast %135 : vector<1x32xf32> to vector<8x32xf32>
      %137 = arith.addf %134, %136 : vector<8x32xf32>
      %138 = arith.addf %95, %137 : vector<8x32xf32>
      %c0_76 = arith.constant 0 : index
      %c0_77 = arith.constant 0 : index
      %c0_78 = arith.constant 0 : index
      %139 = vector.load %arg19[%c0_76, %c0_77, %c0_78] : memref<1x8x32xf32, #tpu.memory_space<vmem>>, vector<1x8x32xf32>
      %140 = vector.shape_cast %139 : vector<1x8x32xf32> to vector<8x32xf32>
      %141 = vector.shape_cast %138 : vector<8x32xf32> to vector<1x8x32xf32>
      tpu.vector_store %arg19[%c0_76, %c0_77, %c0_78], %141 {strides = array<i32>} : memref<1x8x32xf32, #tpu.memory_space<vmem>>, vector<1x8x32xf32>,
      %c0_79 = arith.constant 0 : index
      %c0_80 = arith.constant 0 : index
      %142 = vector.load %arg15[%c0_79, %c0_80] : memref<1x32xf32, #tpu.memory_space<vmem>>, vector<1x32xf32>
      %c0_81 = arith.constant 0 : index
      %c0_82 = arith.constant 0 : index
      %143 = vector.load %arg16[%c0_81, %c0_82] : memref<1x32xf32, #tpu.memory_space<vmem>>, vector<1x32xf32>
      %cst_83 = arith.constant dense<0.000000e+00> : vector<8xf32>
      %144 = vector.multi_reduction <add>, %138, %cst_83 [1] : vector<8x32xf32> to vector<8xf32>
      %145 = vector.shape_cast %144 : vector<8xf32> to vector<8x1xf32>
      %cst_84 = arith.constant 3.200000e+01 : f32
      %146 = vector.broadcast %cst_84 : f32 to vector<8x1xf32>
      %147 = arith.divf %145, %146 : vector<8x1xf32>
      %148 = vector.broadcast %147 : vector<8x1xf32> to vector<8x32xf32>
      %149 = arith.subf %138, %148 : vector<8x32xf32>
      %150 = arith.mulf %149, %149 : vector<8x32xf32>
      %cst_85 = arith.constant dense<0.000000e+00> : vector<8xf32>
      %151 = vector.multi_reduction <add>, %150, %cst_85 [1] : vector<8x32xf32> to vector<8xf32>
      %152 = vector.shape_cast %151 : vector<8xf32> to vector<8x1xf32>
      %cst_86 = arith.constant 3.200000e+01 : f32
      %153 = vector.broadcast %cst_86 : f32 to vector<8x1xf32>
      %154 = arith.divf %152, %153 : vector<8x1xf32>
      %cst_87 = arith.constant 9.99999974E-6 : f32
      %155 = vector.broadcast %cst_87 : f32 to vector<8x1xf32>
      %156 = arith.addf %154, %155 : vector<8x1xf32>
      %157 = math.rsqrt %156 : vector<8x1xf32>
      %158 = vector.broadcast %157 : vector<8x1xf32> to vector<8x32xf32>
      %159 = arith.mulf %149, %158 : vector<8x32xf32>
      %160 = vector.broadcast %142 : vector<1x32xf32> to vector<8x32xf32>
      %161 = arith.mulf %159, %160 : vector<8x32xf32>
      %162 = vector.broadcast %143 : vector<1x32xf32> to vector<8x32xf32>
      %163 = arith.addf %161, %162 : vector<8x32xf32>
      %164 = arith.truncf %163 : vector<8x32xf32> to vector<8x32xbf16>
      %c0_88 = arith.constant 0 : index
      %c0_89 = arith.constant 0 : index
      %c0_90 = arith.constant 0 : index
      %165 = vector.load %arg20[%c0_88, %c0_89, %c0_90] : memref<1x8x32xbf16, #tpu.memory_space<vmem>>, vector<1x8x32xbf16>
      %166 = vector.shape_cast %165 : vector<1x8x32xbf16> to vector<8x32xbf16>
      %167 = vector.shape_cast %164 : vector<8x32xbf16> to vector<1x8x32xbf16>
      tpu.vector_store %arg20[%c0_88, %c0_89, %c0_90], %167 {strides = array<i32>} : memref<1x8x32xbf16, #tpu.memory_space<vmem>>, vector<1x8x32xbf16>,
    } else {
    }
    return
  }
  func.func @transform_0(%arg0: i32, %arg1: i32) -> (i32, i32, i32) {
    %c0_i32 = arith.constant 0 : i32
    %c0_i32_0 = arith.constant 0 : i32
    %c0_i32_1 = arith.constant 0 : i32
    return %arg0, %c0_i32, %c0_i32_0 : i32, i32, i32
  }
  func.func @transform_1(%arg0: i32, %arg1: i32) -> (i32, i32, i32) {
    %c0_i32 = arith.constant 0 : i32
    %c0_i32_0 = arith.constant 0 : i32
    %c0_i32_1 = arith.constant 0 : i32
    return %arg0, %c0_i32, %c0_i32_0 : i32, i32, i32
  }
  func.func @transform_2(%arg0: i32, %arg1: i32) -> (i32, i32, i32, i32) {
    %c0_i32 = arith.constant 0 : i32
    %c0_i32_0 = arith.constant 0 : i32
    %c0_i32_1 = arith.constant 0 : i32
    return %arg0, %arg1, %c0_i32, %c0_i32_0 : i32, i32, i32, i32
  }
  func.func @transform_3(%arg0: i32, %arg1: i32) -> (i32, i32, i32) {
    %c0_i32 = arith.constant 0 : i32
    %c0_i32_0 = arith.constant 0 : i32
    %c0_i32_1 = arith.constant 0 : i32
    return %arg1, %c0_i32, %c0_i32_0 : i32, i32, i32
  }
  func.func @transform_4(%arg0: i32, %arg1: i32) -> (i32, i32, i32) {
    %c0_i32 = arith.constant 0 : i32
    %c0_i32_0 = arith.constant 0 : i32
    %c0_i32_1 = arith.constant 0 : i32
    return %arg1, %c0_i32, %c0_i32_0 : i32, i32, i32
  }
  func.func @transform_5(%arg0: i32, %arg1: i32) -> (i32, i32, i32) {
    %c0_i32 = arith.constant 0 : i32
    %c0_i32_0 = arith.constant 0 : i32
    %c0_i32_1 = arith.constant 0 : i32
    return %arg1, %c0_i32, %c0_i32_0 : i32, i32, i32
  }
  func.func @transform_6(%arg0: i32, %arg1: i32) -> (i32, i32) {
    %c0_i32 = arith.constant 0 : i32
    %c0_i32_0 = arith.constant 0 : i32
    %c0_i32_1 = arith.constant 0 : i32
    return %c0_i32, %c0_i32_0 : i32, i32
  }
  func.func @transform_7(%arg0: i32, %arg1: i32) -> (i32, i32) {
    %c0_i32 = arith.constant 0 : i32
    %c0_i32_0 = arith.constant 0 : i32
    %c0_i32_1 = arith.constant 0 : i32
    return %c0_i32, %c0_i32_0 : i32, i32
  }
  func.func @transform_8(%arg0: i32, %arg1: i32) -> (i32, i32) {
    %c0_i32 = arith.constant 0 : i32
    %c0_i32_0 = arith.constant 0 : i32
    %c0_i32_1 = arith.constant 0 : i32
    return %c0_i32, %c0_i32_0 : i32, i32
  }
  func.func @transform_9(%arg0: i32, %arg1: i32) -> (i32, i32) {
    %c0_i32 = arith.constant 0 : i32
    %c0_i32_0 = arith.constant 0 : i32
    %c0_i32_1 = arith.constant 0 : i32
    return %c0_i32, %c0_i32_0 : i32, i32
  }
  func.func @transform_10(%arg0: i32, %arg1: i32) -> (i32, i32) {
    %c0_i32 = arith.constant 0 : i32
    %c0_i32_0 = arith.constant 0 : i32
    %c0_i32_1 = arith.constant 0 : i32
    return %c0_i32, %c0_i32_0 : i32, i32
  }
  func.func @transform_11(%arg0: i32, %arg1: i32) -> (i32, i32) {
    %c0_i32 = arith.constant 0 : i32
    %c0_i32_0 = arith.constant 0 : i32
    %c0_i32_1 = arith.constant 0 : i32
    return %c0_i32, %c0_i32_0 : i32, i32
  }
  func.func @transform_12(%arg0: i32, %arg1: i32) -> (i32, i32) {
    %c0_i32 = arith.constant 0 : i32
    %c0_i32_0 = arith.constant 0 : i32
    %c0_i32_1 = arith.constant 0 : i32
    return %c0_i32, %c0_i32_0 : i32, i32
  }
  func.func @transform_13(%arg0: i32, %arg1: i32) -> (i32, i32) {
    %c0_i32 = arith.constant 0 : i32
    %c0_i32_0 = arith.constant 0 : i32
    %c0_i32_1 = arith.constant 0 : i32
    return %c0_i32, %c0_i32_0 : i32, i32
  }
  func.func @transform_14(%arg0: i32, %arg1: i32) -> (i32, i32) {
    %c0_i32 = arith.constant 0 : i32
    %c0_i32_0 = arith.constant 0 : i32
    %c0_i32_1 = arith.constant 0 : i32
    return %c0_i32, %c0_i32_0 : i32, i32
  }
  func.func @transform_15(%arg0: i32, %arg1: i32) -> (i32, i32, i32, i32) {
    %c0_i32 = arith.constant 0 : i32
    %c0_i32_0 = arith.constant 0 : i32
    %c0_i32_1 = arith.constant 0 : i32
    %c0_i32_2 = arith.constant 0 : i32
    return %arg0, %c0_i32, %c0_i32_0, %c0_i32_1 : i32, i32, i32, i32
  }
  func.func @transform_16(%arg0: i32, %arg1: i32) -> (i32, i32, i32, i32) {
    %c0_i32 = arith.constant 0 : i32
    %c0_i32_0 = arith.constant 0 : i32
    %c0_i32_1 = arith.constant 0 : i32
    return %arg0, %arg1, %c0_i32, %c0_i32_0 : i32, i32, i32, i32
  }
  func.func @transform_17(%arg0: i32, %arg1: i32) -> (i32, i32, i32) {
    %c0_i32 = arith.constant 0 : i32
    %c0_i32_0 = arith.constant 0 : i32
    %c0_i32_1 = arith.constant 0 : i32
    return %arg0, %c0_i32, %c0_i32_0 : i32, i32, i32
  }
  func.func @transform_18(%arg0: i32, %arg1: i32) -> (i32, i32, i32) {
    %c0_i32 = arith.constant 0 : i32
    %c0_i32_0 = arith.constant 0 : i32
    %c0_i32_1 = arith.constant 0 : i32
    return %arg0, %c0_i32, %c0_i32_0 : i32, i32, i32
  }
}

module attributes {stable_mosaic.version = 11 : i64} {
  func.func @fused_layer_kernel(%arg0: i32, %arg1: i32, %arg2: memref<1x8x32xbf16, #tpu.memory_space<vmem>>, %arg3: memref<1x8x32xf32, #tpu.memory_space<vmem>>, %arg4: memref<1x2x8x8xbf16, #tpu.memory_space<vmem>>, %arg5: memref<1x32x48xbf16, #tpu.memory_space<vmem>>, %arg6: memref<1x1x48xf32, #tpu.memory_space<vmem>>, %arg7: memref<1x16x32xbf16, #tpu.memory_space<vmem>>, %arg8: memref<1x32xf32, #tpu.memory_space<vmem>>, %arg9: memref<1x32xf32, #tpu.memory_space<vmem>>, %arg10: memref<1x32xf32, #tpu.memory_space<vmem>>, %arg11: memref<32x64xbf16, #tpu.memory_space<vmem>>, %arg12: memref<1x64xf32, #tpu.memory_space<vmem>>, %arg13: memref<64x32xbf16, #tpu.memory_space<vmem>>, %arg14: memref<1x32xf32, #tpu.memory_space<vmem>>, %arg15: memref<1x32xf32, #tpu.memory_space<vmem>>, %arg16: memref<1x32xf32, #tpu.memory_space<vmem>>, %arg17: memref<1x1x1x8xf32, #tpu.memory_space<vmem>>, %arg18: memref<1x2x8x8xf32, #tpu.memory_space<vmem>>, %arg19: memref<1x2x8x8xf32, #tpu.memory_space<vmem>>, %arg20: memref<1x8x32xf32, #tpu.memory_space<vmem>>, %arg21: memref<1x8x32xbf16, #tpu.memory_space<vmem>>, %arg22: memref<1x2x8x8xf32, #tpu.memory_space<vmem>>, %arg23: memref<8x32xf32, #tpu.memory_space<vmem>>) attributes {dimension_semantics = [#tpu.dimension_semantics<parallel>, #tpu.dimension_semantics<arbitrary>], iteration_bounds = array<i64: 2, 2>, scalar_prefetch = 0 : i64, scratch_operands = 1 : i64, tpu.core_type = #tpu.core_type<tc>, window_params = [{transform_indices = @transform_0, window_bounds = array<i64: 1, 8, 32>}, {transform_indices = @transform_1, window_bounds = array<i64: 1, 8, 32>}, {transform_indices = @transform_2, window_bounds = array<i64: 1, 2, 8, 8>}, {transform_indices = @transform_3, window_bounds = array<i64: 1, 32, 48>}, {transform_indices = @transform_4, window_bounds = array<i64: 1, 1, 48>}, {transform_indices = @transform_5, window_bounds = array<i64: 1, 16, 32>}, {pipeline_mode = #tpu.pipeline_mode<synchronous>, transform_indices = @transform_6, window_bounds = array<i64: 1, 32>}, {pipeline_mode = #tpu.pipeline_mode<synchronous>, transform_indices = @transform_7, window_bounds = array<i64: 1, 32>}, {pipeline_mode = #tpu.pipeline_mode<synchronous>, transform_indices = @transform_8, window_bounds = array<i64: 1, 32>}, {pipeline_mode = #tpu.pipeline_mode<synchronous>, transform_indices = @transform_9, window_bounds = array<i64: 32, 64>}, {pipeline_mode = #tpu.pipeline_mode<synchronous>, transform_indices = @transform_10, window_bounds = array<i64: 1, 64>}, {pipeline_mode = #tpu.pipeline_mode<synchronous>, transform_indices = @transform_11, window_bounds = array<i64: 64, 32>}, {pipeline_mode = #tpu.pipeline_mode<synchronous>, transform_indices = @transform_12, window_bounds = array<i64: 1, 32>}, {pipeline_mode = #tpu.pipeline_mode<synchronous>, transform_indices = @transform_13, window_bounds = array<i64: 1, 32>}, {pipeline_mode = #tpu.pipeline_mode<synchronous>, transform_indices = @transform_14, window_bounds = array<i64: 1, 32>}, {transform_indices = @transform_15, window_bounds = array<i64: 1, 1, 1, 8>}, {transform_indices = @transform_16, window_bounds = array<i64: 1, 2, 8, 8>}, {transform_indices = @transform_17, window_bounds = array<i64: 1, 2, 8, 8>}, {transform_indices = @transform_18, window_bounds = array<i64: 1, 8, 32>}, {transform_indices = @transform_19, window_bounds = array<i64: 1, 8, 32>}, {transform_indices = @transform_20, window_bounds = array<i64: 1, 2, 8, 8>}]} {
    %c0 = arith.constant 0 : index
    %c0_0 = arith.constant 0 : index
    %c0_1 = arith.constant 0 : index
    %0 = vector.load %arg2[%c0, %c0_0, %c0_1] : memref<1x8x32xbf16, #tpu.memory_space<vmem>>, vector<1x8x32xbf16>
    %1 = vector.shape_cast %0 : vector<1x8x32xbf16> to vector<8x32xbf16>
    %c0_2 = arith.constant 0 : index
    %c0_3 = arith.constant 0 : index
    %c0_4 = arith.constant 0 : index
    %2 = vector.load %arg5[%c0_2, %c0_3, %c0_4] : memref<1x32x48xbf16, #tpu.memory_space<vmem>>, vector<1x32x48xbf16>
    %3 = vector.shape_cast %2 : vector<1x32x48xbf16> to vector<32x48xbf16>
    %cst = arith.constant dense<0.000000e+00> : vector<8x48xf32>
    %4 = tpu.matmul %1, %3, %cst {dimension_numbers = #tpu.dot_dimension_numbers<[1], [0], [0], [1], [0, 0, 1, 1], [], []>} : vector<8x32xbf16>, vector<32x48xbf16>, vector<8x48xf32> -> vector<8x48xf32>
    %c0_5 = arith.constant 0 : index
    %c0_6 = arith.constant 0 : index
    %c0_7 = arith.constant 0 : index
    %5 = vector.load %arg6[%c0_5, %c0_6, %c0_7] : memref<1x1x48xf32, #tpu.memory_space<vmem>>, vector<1x1x48xf32>
    %6 = vector.shape_cast %5 : vector<1x1x48xf32> to vector<1x48xf32>
    %7 = vector.broadcast %6 : vector<1x48xf32> to vector<8x48xf32>
    %8 = arith.addf %4, %7 : vector<8x48xf32>
    %c0_8 = arith.constant 0 : index
    %c0_9 = arith.constant 0 : index
    %c0_10 = arith.constant 0 : index
    %c0_11 = arith.constant 0 : index
    %9 = vector.load %arg17[%c0_8, %c0_9, %c0_10, %c0_11] : memref<1x1x1x8xf32, #tpu.memory_space<vmem>>, vector<1x1x1x8xf32>
    %10 = vector.shape_cast %9 : vector<1x1x1x8xf32> to vector<1x8xf32>
    %11 = vector.extract_strided_slice %8 {offsets = [0, 0], sizes = [8, 8], strides = [1, 1]} : vector<8x48xf32> to vector<8x8xf32>
    %12 = arith.truncf %11 : vector<8x8xf32> to vector<8x8xbf16>
    %13 = vector.extract_strided_slice %8 {offsets = [0, 16], sizes = [8, 8], strides = [1, 1]} : vector<8x48xf32> to vector<8x8xf32>
    %14 = arith.truncf %13 : vector<8x8xf32> to vector<8x8xbf16>
    %15 = vector.extract_strided_slice %8 {offsets = [0, 32], sizes = [8, 8], strides = [1, 1]} : vector<8x48xf32> to vector<8x8xf32>
    %16 = arith.truncf %15 : vector<8x8xf32> to vector<8x8xbf16>
    %c0_12 = arith.constant 0 : index
    %c0_13 = arith.constant 0 : index
    %c0_14 = arith.constant 0 : index
    %c0_15 = arith.constant 0 : index
    %17 = vector.load %arg4[%c0_12, %c0_13, %c0_14, %c0_15] : memref<1x2x8x8xbf16, #tpu.memory_space<vmem>>, vector<1x1x8x8xbf16>
    %18 = vector.shape_cast %17 : vector<1x1x8x8xbf16> to vector<8x8xbf16>
    %19 = arith.extf %18 : vector<8x8xbf16> to vector<8x8xf32>
    %cst_16 = arith.constant dense<0.000000e+00> : vector<8x8xf32>
    %20 = tpu.matmul %12, %14, %cst_16 {dimension_numbers = #tpu.dot_dimension_numbers<[1], [1], [0], [0], [0, 0, 1, 0], [], []>} : vector<8x8xbf16>, vector<8x8xbf16>, vector<8x8xf32> -> vector<8x8xf32>
    %21 = arith.addf %20, %19 : vector<8x8xf32>
    %c0_17 = arith.constant 0 : index
    %c0_18 = arith.constant 0 : index
    %c0_19 = arith.constant 0 : index
    %c0_20 = arith.constant 0 : index
    %22 = vector.load %arg19[%c0_17, %c0_18, %c0_19, %c0_20] : memref<1x2x8x8xf32, #tpu.memory_space<vmem>>, vector<1x1x8x8xf32>
    %23 = vector.shape_cast %22 : vector<1x1x8x8xf32> to vector<8x8xf32>
    %24 = vector.shape_cast %21 : vector<8x8xf32> to vector<1x1x8x8xf32>
    tpu.vector_store %arg19[%c0_17, %c0_18, %c0_19, %c0_20], %24 {strides = array<i32>} : memref<1x2x8x8xf32, #tpu.memory_space<vmem>>, vector<1x1x8x8xf32>,
    %cst_21 = arith.constant dense<0xFF800000> : vector<8xf32>
    %25 = vector.multi_reduction <maximumf>, %21, %cst_21 [1] : vector<8x8xf32> to vector<8xf32>
    %26 = vector.shape_cast %25 : vector<8xf32> to vector<8x1xf32>
    %27 = vector.broadcast %26 : vector<8x1xf32> to vector<8x8xf32>
    %28 = arith.subf %21, %27 : vector<8x8xf32>
    %29 = math.exp %28 : vector<8x8xf32>
    %cst_22 = arith.constant dense<0.000000e+00> : vector<8xf32>
    %30 = vector.multi_reduction <add>, %29, %cst_22 [1] : vector<8x8xf32> to vector<8xf32>
    %31 = vector.shape_cast %30 : vector<8xf32> to vector<8x1xf32>
    %32 = tpu.reciprocal %31 {approx = true} : vector<8x1xf32> -> vector<8x1xf32>
    %33 = vector.broadcast %32 : vector<8x1xf32> to vector<8x8xf32>
    %34 = arith.mulf %29, %33 : vector<8x8xf32>
    %35 = arith.truncf %34 : vector<8x8xf32> to vector<8x8xbf16>
    %cst_23 = arith.constant dense<0.000000e+00> : vector<8x8xf32>
    %36 = tpu.matmul %35, %16, %cst_23 {dimension_numbers = #tpu.dot_dimension_numbers<[1], [0], [0], [1], [0, 0, 1, 1], [], []>} : vector<8x8xbf16>, vector<8x8xbf16>, vector<8x8xf32> -> vector<8x8xf32>
    %cst_24 = arith.constant 5.000000e-01 : f32
    %37 = vector.broadcast %cst_24 : f32 to vector<1x8xf32>
    %38 = arith.cmpf ogt, %10, %37 : vector<1x8xf32>
    %c0_25 = arith.constant 0 : index
    %c0_26 = arith.constant 0 : index
    %c0_27 = arith.constant 0 : index
    %c0_28 = arith.constant 0 : index
    %39 = vector.load %arg18[%c0_25, %c0_26, %c0_27, %c0_28] : memref<1x2x8x8xf32, #tpu.memory_space<vmem>>, vector<1x1x8x8xf32>
    %40 = vector.shape_cast %39 : vector<1x1x8x8xf32> to vector<8x8xf32>
    %41 = arith.subf %21, %40 : vector<8x8xf32>
    %cst_29 = arith.constant 0.000000e+00 : f32
    %42 = vector.shape_cast %38 : vector<1x8xi1> to vector<1x8xi1>
    %43 = vector.broadcast %42 : vector<1x8xi1> to vector<8x8xi1>
    %44 = vector.broadcast %cst_29 : f32 to vector<8x8xf32>
    %45 = arith.select %43, %44, %41 : vector<8x8xi1>, vector<8x8xf32>
    %c0_30 = arith.constant 0 : index
    %c0_31 = arith.constant 0 : index
    %c0_32 = arith.constant 0 : index
    %c0_33 = arith.constant 0 : index
    %46 = vector.load %arg22[%c0_30, %c0_31, %c0_32, %c0_33] : memref<1x2x8x8xf32, #tpu.memory_space<vmem>>, vector<1x1x8x8xf32>
    %47 = vector.shape_cast %46 : vector<1x1x8x8xf32> to vector<8x8xf32>
    %48 = vector.shape_cast %45 : vector<8x8xf32> to vector<1x1x8x8xf32>
    tpu.vector_store %arg22[%c0_30, %c0_31, %c0_32, %c0_33], %48 {strides = array<i32>} : memref<1x2x8x8xf32, #tpu.memory_space<vmem>>, vector<1x1x8x8xf32>,
    %49 = vector.extract_strided_slice %8 {offsets = [0, 8], sizes = [8, 8], strides = [1, 1]} : vector<8x48xf32> to vector<8x8xf32>
    %50 = arith.truncf %49 : vector<8x8xf32> to vector<8x8xbf16>
    %51 = vector.extract_strided_slice %8 {offsets = [0, 24], sizes = [8, 8], strides = [1, 1]} : vector<8x48xf32> to vector<8x8xf32>
    %52 = arith.truncf %51 : vector<8x8xf32> to vector<8x8xbf16>
    %53 = vector.extract_strided_slice %8 {offsets = [0, 40], sizes = [8, 8], strides = [1, 1]} : vector<8x48xf32> to vector<8x8xf32>
    %54 = arith.truncf %53 : vector<8x8xf32> to vector<8x8xbf16>
    %c0_34 = arith.constant 0 : index
    %c1 = arith.constant 1 : index
    %c0_35 = arith.constant 0 : index
    %c0_36 = arith.constant 0 : index
    %55 = vector.load %arg4[%c0_34, %c1, %c0_35, %c0_36] : memref<1x2x8x8xbf16, #tpu.memory_space<vmem>>, vector<1x1x8x8xbf16>
    %56 = vector.shape_cast %55 : vector<1x1x8x8xbf16> to vector<8x8xbf16>
    %57 = arith.extf %56 : vector<8x8xbf16> to vector<8x8xf32>
    %cst_37 = arith.constant dense<0.000000e+00> : vector<8x8xf32>
    %58 = tpu.matmul %50, %52, %cst_37 {dimension_numbers = #tpu.dot_dimension_numbers<[1], [1], [0], [0], [0, 0, 1, 0], [], []>} : vector<8x8xbf16>, vector<8x8xbf16>, vector<8x8xf32> -> vector<8x8xf32>
    %59 = arith.addf %58, %57 : vector<8x8xf32>
    %c0_38 = arith.constant 0 : index
    %c1_39 = arith.constant 1 : index
    %c0_40 = arith.constant 0 : index
    %c0_41 = arith.constant 0 : index
    %60 = vector.load %arg19[%c0_38, %c1_39, %c0_40, %c0_41] : memref<1x2x8x8xf32, #tpu.memory_space<vmem>>, vector<1x1x8x8xf32>
    %61 = vector.shape_cast %60 : vector<1x1x8x8xf32> to vector<8x8xf32>
    %62 = vector.shape_cast %59 : vector<8x8xf32> to vector<1x1x8x8xf32>
    tpu.vector_store %arg19[%c0_38, %c1_39, %c0_40, %c0_41], %62 {strides = array<i32>} : memref<1x2x8x8xf32, #tpu.memory_space<vmem>>, vector<1x1x8x8xf32>,
    %cst_42 = arith.constant dense<0xFF800000> : vector<8xf32>
    %63 = vector.multi_reduction <maximumf>, %59, %cst_42 [1] : vector<8x8xf32> to vector<8xf32>
    %64 = vector.shape_cast %63 : vector<8xf32> to vector<8x1xf32>
    %65 = vector.broadcast %64 : vector<8x1xf32> to vector<8x8xf32>
    %66 = arith.subf %59, %65 : vector<8x8xf32>
    %67 = math.exp %66 : vector<8x8xf32>
    %cst_43 = arith.constant dense<0.000000e+00> : vector<8xf32>
    %68 = vector.multi_reduction <add>, %67, %cst_43 [1] : vector<8x8xf32> to vector<8xf32>
    %69 = vector.shape_cast %68 : vector<8xf32> to vector<8x1xf32>
    %70 = tpu.reciprocal %69 {approx = true} : vector<8x1xf32> -> vector<8x1xf32>
    %71 = vector.broadcast %70 : vector<8x1xf32> to vector<8x8xf32>
    %72 = arith.mulf %67, %71 : vector<8x8xf32>
    %73 = arith.truncf %72 : vector<8x8xf32> to vector<8x8xbf16>
    %cst_44 = arith.constant dense<0.000000e+00> : vector<8x8xf32>
    %74 = tpu.matmul %73, %54, %cst_44 {dimension_numbers = #tpu.dot_dimension_numbers<[1], [0], [0], [1], [0, 0, 1, 1], [], []>} : vector<8x8xbf16>, vector<8x8xbf16>, vector<8x8xf32> -> vector<8x8xf32>
    %cst_45 = arith.constant 5.000000e-01 : f32
    %75 = vector.broadcast %cst_45 : f32 to vector<1x8xf32>
    %76 = arith.cmpf ogt, %10, %75 : vector<1x8xf32>
    %c0_46 = arith.constant 0 : index
    %c1_47 = arith.constant 1 : index
    %c0_48 = arith.constant 0 : index
    %c0_49 = arith.constant 0 : index
    %77 = vector.load %arg18[%c0_46, %c1_47, %c0_48, %c0_49] : memref<1x2x8x8xf32, #tpu.memory_space<vmem>>, vector<1x1x8x8xf32>
    %78 = vector.shape_cast %77 : vector<1x1x8x8xf32> to vector<8x8xf32>
    %79 = arith.subf %59, %78 : vector<8x8xf32>
    %cst_50 = arith.constant 0.000000e+00 : f32
    %80 = vector.shape_cast %76 : vector<1x8xi1> to vector<1x8xi1>
    %81 = vector.broadcast %80 : vector<1x8xi1> to vector<8x8xi1>
    %82 = vector.broadcast %cst_50 : f32 to vector<8x8xf32>
    %83 = arith.select %81, %82, %79 : vector<8x8xi1>, vector<8x8xf32>
    %c0_51 = arith.constant 0 : index
    %c1_52 = arith.constant 1 : index
    %c0_53 = arith.constant 0 : index
    %c0_54 = arith.constant 0 : index
    %84 = vector.load %arg22[%c0_51, %c1_52, %c0_53, %c0_54] : memref<1x2x8x8xf32, #tpu.memory_space<vmem>>, vector<1x1x8x8xf32>
    %85 = vector.shape_cast %84 : vector<1x1x8x8xf32> to vector<8x8xf32>
    %86 = vector.shape_cast %83 : vector<8x8xf32> to vector<1x1x8x8xf32>
    tpu.vector_store %arg22[%c0_51, %c1_52, %c0_53, %c0_54], %86 {strides = array<i32>} : memref<1x2x8x8xf32, #tpu.memory_space<vmem>>, vector<1x1x8x8xf32>,
    %87 = tpu.concatenate %36, %74 in 1 : vector<8x8xf32>, vector<8x8xf32> -> vector<8x16xf32>
    %88 = arith.truncf %87 : vector<8x16xf32> to vector<8x16xbf16>
    %c0_55 = arith.constant 0 : index
    %c0_56 = arith.constant 0 : index
    %c0_57 = arith.constant 0 : index
    %89 = vector.load %arg7[%c0_55, %c0_56, %c0_57] : memref<1x16x32xbf16, #tpu.memory_space<vmem>>, vector<1x16x32xbf16>
    %90 = vector.shape_cast %89 : vector<1x16x32xbf16> to vector<16x32xbf16>
    %cst_58 = arith.constant dense<0.000000e+00> : vector<8x32xf32>
    %91 = tpu.matmul %88, %90, %cst_58 {dimension_numbers = #tpu.dot_dimension_numbers<[1], [0], [0], [1], [0, 0, 1, 1], [], []>} : vector<8x16xbf16>, vector<16x32xbf16>, vector<8x32xf32> -> vector<8x32xf32>
    %c0_i32 = arith.constant 0 : i32
    %92 = arith.cmpi eq, %arg1, %c0_i32 : i32
    %93 = arith.extui %92 : i1 to i32
    %c0_i32_59 = arith.constant 0 : i32
    %94 = arith.cmpi ne, %93, %c0_i32_59 : i32
    scf.if %94 {
      %c0_63 = arith.constant 0 : index
      %c0_64 = arith.constant 0 : index
      %101 = vector.load %arg23[%c0_63, %c0_64] : memref<8x32xf32, #tpu.memory_space<vmem>>, vector<8x32xf32>
      tpu.vector_store %arg23[%c0_63, %c0_64], %91 {strides = array<i32>} : memref<8x32xf32, #tpu.memory_space<vmem>>, vector<8x32xf32>,
    } else {
    }
    %c0_i32_60 = arith.constant 0 : i32
    %95 = arith.cmpi sgt, %arg1, %c0_i32_60 : i32
    %96 = arith.extui %95 : i1 to i32
    %c0_i32_61 = arith.constant 0 : i32
    %97 = arith.cmpi ne, %96, %c0_i32_61 : i32
    scf.if %97 {
      %c0_63 = arith.constant 0 : index
      %c0_64 = arith.constant 0 : index
      %101 = vector.load %arg23[%c0_63, %c0_64] : memref<8x32xf32, #tpu.memory_space<vmem>>, vector<8x32xf32>
      %102 = arith.addf %101, %91 : vector<8x32xf32>
      %c0_65 = arith.constant 0 : index
      %c0_66 = arith.constant 0 : index
      %103 = vector.load %arg23[%c0_65, %c0_66] : memref<8x32xf32, #tpu.memory_space<vmem>>, vector<8x32xf32>
      tpu.vector_store %arg23[%c0_65, %c0_66], %102 {strides = array<i32>} : memref<8x32xf32, #tpu.memory_space<vmem>>, vector<8x32xf32>,
    } else {
    }
    %c1_i32 = arith.constant 1 : i32
    %98 = arith.cmpi eq, %arg1, %c1_i32 : i32
    %99 = arith.extui %98 : i1 to i32
    %c0_i32_62 = arith.constant 0 : i32
    %100 = arith.cmpi ne, %99, %c0_i32_62 : i32
    scf.if %100 {
      %c0_63 = arith.constant 0 : index
      %c0_64 = arith.constant 0 : index
      %c0_65 = arith.constant 0 : index
      %101 = vector.load %arg3[%c0_63, %c0_64, %c0_65] : memref<1x8x32xf32, #tpu.memory_space<vmem>>, vector<1x8x32xf32>
      %102 = vector.shape_cast %101 : vector<1x8x32xf32> to vector<8x32xf32>
      %c0_66 = arith.constant 0 : index
      %c0_67 = arith.constant 0 : index
      %103 = vector.load %arg23[%c0_66, %c0_67] : memref<8x32xf32, #tpu.memory_space<vmem>>, vector<8x32xf32>
      %104 = arith.addf %102, %103 : vector<8x32xf32>
      %c0_68 = arith.constant 0 : index
      %c0_69 = arith.constant 0 : index
      %105 = vector.load %arg8[%c0_68, %c0_69] : memref<1x32xf32, #tpu.memory_space<vmem>>, vector<1x32xf32>
      %106 = vector.broadcast %105 : vector<1x32xf32> to vector<8x32xf32>
      %107 = arith.addf %104, %106 : vector<8x32xf32>
      %c0_70 = arith.constant 0 : index
      %c0_71 = arith.constant 0 : index
      %108 = vector.load %arg9[%c0_70, %c0_71] : memref<1x32xf32, #tpu.memory_space<vmem>>, vector<1x32xf32>
      %c0_72 = arith.constant 0 : index
      %c0_73 = arith.constant 0 : index
      %109 = vector.load %arg10[%c0_72, %c0_73] : memref<1x32xf32, #tpu.memory_space<vmem>>, vector<1x32xf32>
      %cst_74 = arith.constant dense<0.000000e+00> : vector<8xf32>
      %110 = vector.multi_reduction <add>, %107, %cst_74 [1] : vector<8x32xf32> to vector<8xf32>
      %111 = vector.shape_cast %110 : vector<8xf32> to vector<8x1xf32>
      %cst_75 = arith.constant 3.200000e+01 : f32
      %112 = vector.broadcast %cst_75 : f32 to vector<8x1xf32>
      %113 = arith.divf %111, %112 : vector<8x1xf32>
      %114 = vector.broadcast %113 : vector<8x1xf32> to vector<8x32xf32>
      %115 = arith.subf %107, %114 : vector<8x32xf32>
      %116 = arith.mulf %115, %115 : vector<8x32xf32>
      %cst_76 = arith.constant dense<0.000000e+00> : vector<8xf32>
      %117 = vector.multi_reduction <add>, %116, %cst_76 [1] : vector<8x32xf32> to vector<8xf32>
      %118 = vector.shape_cast %117 : vector<8xf32> to vector<8x1xf32>
      %cst_77 = arith.constant 3.200000e+01 : f32
      %119 = vector.broadcast %cst_77 : f32 to vector<8x1xf32>
      %120 = arith.divf %118, %119 : vector<8x1xf32>
      %cst_78 = arith.constant 9.99999974E-6 : f32
      %121 = vector.broadcast %cst_78 : f32 to vector<8x1xf32>
      %122 = arith.addf %120, %121 : vector<8x1xf32>
      %123 = math.rsqrt %122 : vector<8x1xf32>
      %124 = vector.broadcast %123 : vector<8x1xf32> to vector<8x32xf32>
      %125 = arith.mulf %115, %124 : vector<8x32xf32>
      %126 = vector.broadcast %108 : vector<1x32xf32> to vector<8x32xf32>
      %127 = arith.mulf %125, %126 : vector<8x32xf32>
      %128 = vector.broadcast %109 : vector<1x32xf32> to vector<8x32xf32>
      %129 = arith.addf %127, %128 : vector<8x32xf32>
      %130 = arith.truncf %129 : vector<8x32xf32> to vector<8x32xbf16>
      %c0_79 = arith.constant 0 : index
      %c0_80 = arith.constant 0 : index
      %131 = vector.load %arg11[%c0_79, %c0_80] : memref<32x64xbf16, #tpu.memory_space<vmem>>, vector<32x64xbf16>
      %cst_81 = arith.constant dense<0.000000e+00> : vector<8x64xf32>
      %132 = tpu.matmul %130, %131, %cst_81 {dimension_numbers = #tpu.dot_dimension_numbers<[1], [0], [0], [1], [0, 0, 1, 1], [], []>} : vector<8x32xbf16>, vector<32x64xbf16>, vector<8x64xf32> -> vector<8x64xf32>
      %c0_82 = arith.constant 0 : index
      %c0_83 = arith.constant 0 : index
      %133 = vector.load %arg12[%c0_82, %c0_83] : memref<1x64xf32, #tpu.memory_space<vmem>>, vector<1x64xf32>
      %134 = vector.broadcast %133 : vector<1x64xf32> to vector<8x64xf32>
      %135 = arith.addf %132, %134 : vector<8x64xf32>
      %cst_84 = arith.constant 5.000000e-01 : f32
      %136 = vector.broadcast %cst_84 : f32 to vector<8x64xf32>
      %137 = arith.mulf %136, %135 : vector<8x64xf32>
      %cst_85 = arith.constant 0.707106769 : f32
      %138 = vector.broadcast %cst_85 : f32 to vector<8x64xf32>
      %139 = arith.mulf %135, %138 : vector<8x64xf32>
      %140 = math.erf %139 : vector<8x64xf32>
      %cst_86 = arith.constant 1.000000e+00 : f32
      %141 = vector.broadcast %cst_86 : f32 to vector<8x64xf32>
      %142 = arith.addf %141, %140 : vector<8x64xf32>
      %143 = arith.mulf %137, %142 : vector<8x64xf32>
      %144 = arith.truncf %143 : vector<8x64xf32> to vector<8x64xbf16>
      %c0_87 = arith.constant 0 : index
      %c0_88 = arith.constant 0 : index
      %145 = vector.load %arg13[%c0_87, %c0_88] : memref<64x32xbf16, #tpu.memory_space<vmem>>, vector<64x32xbf16>
      %cst_89 = arith.constant dense<0.000000e+00> : vector<8x32xf32>
      %146 = tpu.matmul %144, %145, %cst_89 {dimension_numbers = #tpu.dot_dimension_numbers<[1], [0], [0], [1], [0, 0, 1, 1], [], []>} : vector<8x64xbf16>, vector<64x32xbf16>, vector<8x32xf32> -> vector<8x32xf32>
      %c0_90 = arith.constant 0 : index
      %c0_91 = arith.constant 0 : index
      %147 = vector.load %arg14[%c0_90, %c0_91] : memref<1x32xf32, #tpu.memory_space<vmem>>, vector<1x32xf32>
      %148 = vector.broadcast %147 : vector<1x32xf32> to vector<8x32xf32>
      %149 = arith.addf %146, %148 : vector<8x32xf32>
      %150 = arith.addf %107, %149 : vector<8x32xf32>
      %c0_92 = arith.constant 0 : index
      %c0_93 = arith.constant 0 : index
      %c0_94 = arith.constant 0 : index
      %151 = vector.load %arg20[%c0_92, %c0_93, %c0_94] : memref<1x8x32xf32, #tpu.memory_space<vmem>>, vector<1x8x32xf32>
      %152 = vector.shape_cast %151 : vector<1x8x32xf32> to vector<8x32xf32>
      %153 = vector.shape_cast %150 : vector<8x32xf32> to vector<1x8x32xf32>
      tpu.vector_store %arg20[%c0_92, %c0_93, %c0_94], %153 {strides = array<i32>} : memref<1x8x32xf32, #tpu.memory_space<vmem>>, vector<1x8x32xf32>,
      %c0_95 = arith.constant 0 : index
      %c0_96 = arith.constant 0 : index
      %154 = vector.load %arg15[%c0_95, %c0_96] : memref<1x32xf32, #tpu.memory_space<vmem>>, vector<1x32xf32>
      %c0_97 = arith.constant 0 : index
      %c0_98 = arith.constant 0 : index
      %155 = vector.load %arg16[%c0_97, %c0_98] : memref<1x32xf32, #tpu.memory_space<vmem>>, vector<1x32xf32>
      %cst_99 = arith.constant dense<0.000000e+00> : vector<8xf32>
      %156 = vector.multi_reduction <add>, %150, %cst_99 [1] : vector<8x32xf32> to vector<8xf32>
      %157 = vector.shape_cast %156 : vector<8xf32> to vector<8x1xf32>
      %cst_100 = arith.constant 3.200000e+01 : f32
      %158 = vector.broadcast %cst_100 : f32 to vector<8x1xf32>
      %159 = arith.divf %157, %158 : vector<8x1xf32>
      %160 = vector.broadcast %159 : vector<8x1xf32> to vector<8x32xf32>
      %161 = arith.subf %150, %160 : vector<8x32xf32>
      %162 = arith.mulf %161, %161 : vector<8x32xf32>
      %cst_101 = arith.constant dense<0.000000e+00> : vector<8xf32>
      %163 = vector.multi_reduction <add>, %162, %cst_101 [1] : vector<8x32xf32> to vector<8xf32>
      %164 = vector.shape_cast %163 : vector<8xf32> to vector<8x1xf32>
      %cst_102 = arith.constant 3.200000e+01 : f32
      %165 = vector.broadcast %cst_102 : f32 to vector<8x1xf32>
      %166 = arith.divf %164, %165 : vector<8x1xf32>
      %cst_103 = arith.constant 9.99999974E-6 : f32
      %167 = vector.broadcast %cst_103 : f32 to vector<8x1xf32>
      %168 = arith.addf %166, %167 : vector<8x1xf32>
      %169 = math.rsqrt %168 : vector<8x1xf32>
      %170 = vector.broadcast %169 : vector<8x1xf32> to vector<8x32xf32>
      %171 = arith.mulf %161, %170 : vector<8x32xf32>
      %172 = vector.broadcast %154 : vector<1x32xf32> to vector<8x32xf32>
      %173 = arith.mulf %171, %172 : vector<8x32xf32>
      %174 = vector.broadcast %155 : vector<1x32xf32> to vector<8x32xf32>
      %175 = arith.addf %173, %174 : vector<8x32xf32>
      %176 = arith.truncf %175 : vector<8x32xf32> to vector<8x32xbf16>
      %c0_104 = arith.constant 0 : index
      %c0_105 = arith.constant 0 : index
      %c0_106 = arith.constant 0 : index
      %177 = vector.load %arg21[%c0_104, %c0_105, %c0_106] : memref<1x8x32xbf16, #tpu.memory_space<vmem>>, vector<1x8x32xbf16>
      %178 = vector.shape_cast %177 : vector<1x8x32xbf16> to vector<8x32xbf16>
      %179 = vector.shape_cast %176 : vector<8x32xbf16> to vector<1x8x32xbf16>
      tpu.vector_store %arg21[%c0_104, %c0_105, %c0_106], %179 {strides = array<i32>} : memref<1x8x32xbf16, #tpu.memory_space<vmem>>, vector<1x8x32xbf16>,
    } else {
    }
    return
  }
  func.func @transform_0(%arg0: i32, %arg1: i32) -> (i32, i32, i32) {
    %c0_i32 = arith.constant 0 : i32
    %c0_i32_0 = arith.constant 0 : i32
    %c0_i32_1 = arith.constant 0 : i32
    return %arg0, %c0_i32, %c0_i32_0 : i32, i32, i32
  }
  func.func @transform_1(%arg0: i32, %arg1: i32) -> (i32, i32, i32) {
    %c0_i32 = arith.constant 0 : i32
    %c0_i32_0 = arith.constant 0 : i32
    %c0_i32_1 = arith.constant 0 : i32
    return %arg0, %c0_i32, %c0_i32_0 : i32, i32, i32
  }
  func.func @transform_2(%arg0: i32, %arg1: i32) -> (i32, i32, i32, i32) {
    %c0_i32 = arith.constant 0 : i32
    %c0_i32_0 = arith.constant 0 : i32
    %c0_i32_1 = arith.constant 0 : i32
    return %arg0, %arg1, %c0_i32, %c0_i32_0 : i32, i32, i32, i32
  }
  func.func @transform_3(%arg0: i32, %arg1: i32) -> (i32, i32, i32) {
    %c0_i32 = arith.constant 0 : i32
    %c0_i32_0 = arith.constant 0 : i32
    %c0_i32_1 = arith.constant 0 : i32
    return %arg1, %c0_i32, %c0_i32_0 : i32, i32, i32
  }
  func.func @transform_4(%arg0: i32, %arg1: i32) -> (i32, i32, i32) {
    %c0_i32 = arith.constant 0 : i32
    %c0_i32_0 = arith.constant 0 : i32
    %c0_i32_1 = arith.constant 0 : i32
    return %arg1, %c0_i32, %c0_i32_0 : i32, i32, i32
  }
  func.func @transform_5(%arg0: i32, %arg1: i32) -> (i32, i32, i32) {
    %c0_i32 = arith.constant 0 : i32
    %c0_i32_0 = arith.constant 0 : i32
    %c0_i32_1 = arith.constant 0 : i32
    return %arg1, %c0_i32, %c0_i32_0 : i32, i32, i32
  }
  func.func @transform_6(%arg0: i32, %arg1: i32) -> (i32, i32) {
    %c0_i32 = arith.constant 0 : i32
    %c0_i32_0 = arith.constant 0 : i32
    %c0_i32_1 = arith.constant 0 : i32
    return %c0_i32, %c0_i32_0 : i32, i32
  }
  func.func @transform_7(%arg0: i32, %arg1: i32) -> (i32, i32) {
    %c0_i32 = arith.constant 0 : i32
    %c0_i32_0 = arith.constant 0 : i32
    %c0_i32_1 = arith.constant 0 : i32
    return %c0_i32, %c0_i32_0 : i32, i32
  }
  func.func @transform_8(%arg0: i32, %arg1: i32) -> (i32, i32) {
    %c0_i32 = arith.constant 0 : i32
    %c0_i32_0 = arith.constant 0 : i32
    %c0_i32_1 = arith.constant 0 : i32
    return %c0_i32, %c0_i32_0 : i32, i32
  }
  func.func @transform_9(%arg0: i32, %arg1: i32) -> (i32, i32) {
    %c0_i32 = arith.constant 0 : i32
    %c0_i32_0 = arith.constant 0 : i32
    %c0_i32_1 = arith.constant 0 : i32
    return %c0_i32, %c0_i32_0 : i32, i32
  }
  func.func @transform_10(%arg0: i32, %arg1: i32) -> (i32, i32) {
    %c0_i32 = arith.constant 0 : i32
    %c0_i32_0 = arith.constant 0 : i32
    %c0_i32_1 = arith.constant 0 : i32
    return %c0_i32, %c0_i32_0 : i32, i32
  }
  func.func @transform_11(%arg0: i32, %arg1: i32) -> (i32, i32) {
    %c0_i32 = arith.constant 0 : i32
    %c0_i32_0 = arith.constant 0 : i32
    %c0_i32_1 = arith.constant 0 : i32
    return %c0_i32, %c0_i32_0 : i32, i32
  }
  func.func @transform_12(%arg0: i32, %arg1: i32) -> (i32, i32) {
    %c0_i32 = arith.constant 0 : i32
    %c0_i32_0 = arith.constant 0 : i32
    %c0_i32_1 = arith.constant 0 : i32
    return %c0_i32, %c0_i32_0 : i32, i32
  }
  func.func @transform_13(%arg0: i32, %arg1: i32) -> (i32, i32) {
    %c0_i32 = arith.constant 0 : i32
    %c0_i32_0 = arith.constant 0 : i32
    %c0_i32_1 = arith.constant 0 : i32
    return %c0_i32, %c0_i32_0 : i32, i32
  }
  func.func @transform_14(%arg0: i32, %arg1: i32) -> (i32, i32) {
    %c0_i32 = arith.constant 0 : i32
    %c0_i32_0 = arith.constant 0 : i32
    %c0_i32_1 = arith.constant 0 : i32
    return %c0_i32, %c0_i32_0 : i32, i32
  }
  func.func @transform_15(%arg0: i32, %arg1: i32) -> (i32, i32, i32, i32) {
    %c0_i32 = arith.constant 0 : i32
    %c0_i32_0 = arith.constant 0 : i32
    %c0_i32_1 = arith.constant 0 : i32
    %c0_i32_2 = arith.constant 0 : i32
    return %arg0, %c0_i32, %c0_i32_0, %c0_i32_1 : i32, i32, i32, i32
  }
  func.func @transform_16(%arg0: i32, %arg1: i32) -> (i32, i32, i32, i32) {
    %c0_i32 = arith.constant 0 : i32
    %c0_i32_0 = arith.constant 0 : i32
    %c0_i32_1 = arith.constant 0 : i32
    return %arg0, %arg1, %c0_i32, %c0_i32_0 : i32, i32, i32, i32
  }
  func.func @transform_17(%arg0: i32, %arg1: i32) -> (i32, i32, i32, i32) {
    %c0_i32 = arith.constant 0 : i32
    %c0_i32_0 = arith.constant 0 : i32
    %c0_i32_1 = arith.constant 0 : i32
    return %arg0, %arg1, %c0_i32, %c0_i32_0 : i32, i32, i32, i32
  }
  func.func @transform_18(%arg0: i32, %arg1: i32) -> (i32, i32, i32) {
    %c0_i32 = arith.constant 0 : i32
    %c0_i32_0 = arith.constant 0 : i32
    %c0_i32_1 = arith.constant 0 : i32
    return %arg0, %c0_i32, %c0_i32_0 : i32, i32, i32
  }
  func.func @transform_19(%arg0: i32, %arg1: i32) -> (i32, i32, i32) {
    %c0_i32 = arith.constant 0 : i32
    %c0_i32_0 = arith.constant 0 : i32
    %c0_i32_1 = arith.constant 0 : i32
    return %arg0, %c0_i32, %c0_i32_0 : i32, i32, i32
  }
  func.func @transform_20(%arg0: i32, %arg1: i32) -> (i32, i32, i32, i32) {
    %c0_i32 = arith.constant 0 : i32
    %c0_i32_0 = arith.constant 0 : i32
    %c0_i32_1 = arith.constant 0 : i32
    return %arg0, %arg1, %c0_i32, %c0_i32_0 : i32, i32, i32, i32
  }
}

</mosaic_0001>

<bundles_post_ra>
// kernel: transformer_encoder_with_pair.3
= control target key start
LH: loop header
LB: loop body
LE: loop exit
PB: predicated region body
PF: predicated region fallthrough
CT: control target
= control target key end

     0   :  { %13 = vsyncpa [#allocation3], 0  ;;  %s1001_s0 = inlined_call_operand.hbm [shape: f32[2,8,32], index: 0, kind: input, shape index: {}]   ;;  %s1002_s1 = inlined_call_operand.vmem [shape: f32[2,8,1], index: 1, kind: input, shape index: {}]   ;;  %s1003_s2 = inlined_call_operand.hbm [shape: f32[1,32], index: 2, kind: input, shape index: {}]   ;;  %s1004_s3 = inlined_call_operand.hbm [shape: f32[1,32], index: 3, kind: input, shape index: {}]   ;;  %s1005_s4 = inlined_call_operand.vmem [shape: f32[1,32], index: 4, kind: input, shape index: {}]   ;;  %s1006_s5 = inlined_call_operand.vmem [shape: f32[1,32], index: 5, kind: input, shape index: {}]   ;;  %s1007_s6 = inlined_call_operand.vmem [shape: f32[2,8,32], index: 6, kind: output, shape index: {0}]   ;;  %s1008_s7 = inlined_call_operand.vmem [shape: bf16[2,8,32], index: 7, kind: output, shape index: {1}]  }
   0x1   :  { %15 = vsyncpa [#allocation3 + $0x1], 0 }
   0x2   :  { %16 = vsyncpa [#allocation5], 0  ;;  %s804_s24 = smov 0   ;;  %s806_s25 = smov 0  }
   0x3   :  { %s808_s26 = smov 0   ;;  %s810_s27 = smov 0  }
   0x4 LB: > { %s823_s28 = sadd.s32 4294967295, %s758_s27   ;;  %p42_p0 = scmp.ne.s32.totalorder %s750_s25, %s746_s24  ;;  %s758_s27 = sphi %s810_s27, %s1023_s27   ;;  %s754_s26 = sphi %s808_s26, %s1022_s26   ;;  %s750_s25 = sphi %s806_s25, %s1021_s25   ;;  %s746_s24 = sphi %s804_s24, %s1020_s24  }
   0x5   : > { %p1009_p1 = scmp.eq.s32.totalorder %s823_s28, 0  ;;  %p548_p2 = scmp.ge.s32.totalorder %s758_s27, 1 }
   0x6   : > { %p215_p3 = scmp.lt.s32.totalorder %s758_s27, 3  ;;  %s760_s8 = smov [#allocation4]  }
   0x7   : > { %p831_p4 = por %p1009_p1, %p42_p0  ;;  %s228_s9 = sshll.u32 %s760_s8, 4  ;;  %s229_s9 = int_to_ptr.vmem [resolvable:$true] %s228_s9 }
   0x8   : > { %p835_p5 = pnand %p548_p2, %p215_p3  ;;  %s761_s10 = smov [#allocation6]  }
   0x9   : > { %s1012_s29 = scalar_select %p831_p4, 1, 0 }
   0xa   : > { %s1013_s30 = scalar_select %p835_p5, 1, 0 }
   0xb   : > { %p577_p6 = pneg %p835_p5  ;;  %s239_s11 = sshll.u32 %s761_s10, 4  ;;  %s847_s11 = int_to_ptr.vmem [resolvable:$true] %s239_s11 }
   0xc   : > { %s850_s13 = sadd.s32 1, %s758_s27   ;;  %s634_s17 = scalar_lea.hbm %s1003_s2, 16 }
   0xd   : > { %p843_p7 = pnand %p577_p6, %p1009_p1  ;;  %s26_s14 = ssub.s32 %s758_s27, %s850_s13 }
   0xe   : > { %p635_p8 = scmp.ne.s32.totalorder %s1003_s2, %s634_s17  ;;  %p641_p12 = scmp.lt.u32.totalorder %s634_s17, %s1003_s2 }
   0xf   : > { %p636_p9 = pneg %p843_p7 }
  0x11   : > { %p637_p10 = pnand %p636_p9, %p635_p8 }
  0x13   : > { %p638_p11 = pneg %p637_p10 }
  0x15   : > { %p643_p13 = pnand %p641_p12, %p638_p11 }
  0x17   : > { %646 = shalt.err (!%p643_p13)
}
  0x18   : > { %s647_s22 = scalar_lea.vmem %s229_s9, 16  ;;  %s654_s23 = scalar_lea.vmem %s229_s9, 32 }
  0x19   : > { %p648_p0 = scmp.ne.s32.totalorder %s229_s9, %s647_s22  ;;  %p655_p6 = scmp.lt.s32.totalorder %s229_s9, %s229_s9 }
  0x1a   : > { %p656_p1 = scmp.lt.s32.totalorder %s654_s23, %s647_s22 }
  0x1b   : > { %p650_p2 = pnand %p648_p0, %p636_p9 }
  0x1c   : > { %p657_p4 = por %p656_p1, %p655_p6 }
  0x1d   : > { %p651_p3 = pneg %p650_p2 }
  0x1f   : > { %p658_p5 = pnand %p657_p4, %p651_p3 }
  0x21   : > { %661 = shalt.err (!%p658_p5)
}
  0x22   : > { %580 = dma.hbm_to_vmem [thread:$0]  (!%p843_p7), %s1003_s2, 16, %s229_s9, [#allocation5]  }
  0x23   : > { %s662_s16 = scalar_lea.hbm %s1004_s3, 16 }
  0x24   : > { %p663_p8 = scmp.ne.s32.totalorder %s1004_s3, %s662_s16  ;;  %p669_p5 = scmp.lt.u32.totalorder %s662_s16, %s1004_s3 }
  0x26   : > { %p665_p1 = pnand %p663_p8, %p636_p9 }
  0x28   : > { %p666_p4 = pneg %p665_p1 }
  0x2a   : > { %p671_p10 = pnand %p669_p5, %p666_p4 }
  0x2c   : > { %674 = shalt.err (!%p671_p10)
}
  0x2d   : > { %s675_s9 = scalar_lea.vmem %s847_s11, 16  ;;  %s682_s21 = scalar_lea.vmem %s847_s11, 32 }
  0x2e   : > { %p676_p11 = scmp.ne.s32.totalorder %s847_s11, %s675_s9  ;;  %p683_p0 = scmp.lt.s32.totalorder %s847_s11, %s847_s11 }
  0x2f   : > { %p684_p2 = scmp.lt.s32.totalorder %s682_s21, %s675_s9 }
  0x30   : > { %p678_p12 = pnand %p676_p11, %p636_p9 }
  0x31   : > { %p685_p3 = por %p684_p2, %p683_p0 }
  0x32   : > { %p679_p13 = pneg %p678_p12 }
  0x34   : > { %p686_p6 = pnand %p685_p3, %p679_p13 }
  0x36   : > { %689 = shalt.err (!%p686_p6)
}
  0x37   : > { %583 = dma.hbm_to_vmem [thread:$0]  (!%p843_p7), %s1004_s3, 16, %s847_s11, [#allocation5]  }
  0x38   : > { %p27_p9 = scmp.eq.s32.totalorder %s26_s14, 0  ;;  %s29_s24 = sadd.s32 1, %s754_s26 }
  0x39   : > { %p36_p8 = scmp.ne.s32.totalorder %s754_s26, %s750_s25  ;;  %p37_p1 = scmp.eq.s32.totalorder %s758_s27, 0 }
  0x3a   : > { %s910_s12 = scalar_select %p27_p9, %s754_s26, %s29_s24  }
  0x3b   : > { %p38_p4 = por %p37_p1, %p36_p8  ;;  %p590_p5 = scmp.lt.s32.totalorder %s758_s27, 2 }
  0x3c   : > { %s256_s8 = sand.u32 1, %s754_s26   ;;  %s553_s10 = sshll.u32 %s758_s27, 7 }
  0x3d   : > { %s552_s15 = sshll.u32 %s256_s8, 3  ;;  %s918_s18 = scalar_lea.hbm %s1001_s0, %s553_s10 }
  0x3e   : > { %s260_s11 = scalar_lea.vmem [#allocation2], %s552_s15  ;;  %p920_p7 = pnand %p590_p5, %p38_p4 }
  0x3f   : > { %s267_s14 = sshll.u32 %s260_s11, 4  ;;  %s257_s27 = scalar_lea.sflag [#allocation3], %s256_s8  ;;  %s924_s14 = int_to_ptr.vmem [resolvable:$true] %s267_s14 }
  0x40   : > { %s690_s20 = scalar_lea.hbm %s918_s18, 128  ;;  %p692_p11 = pneg %p920_p7 }
  0x41   : > { %p691_p10 = scmp.ne.s32.totalorder %s918_s18, %s690_s20  ;;  %s695_s22 = scalar_lea.hbm %s1001_s0, 256 }
  0x42   : > { %p696_p0 = scmp.lt.u32.totalorder %s918_s18, %s1001_s0  ;;  %p697_p2 = scmp.lt.u32.totalorder %s695_s22, %s690_s20 }
  0x43   : > { %p693_p12 = pnand %p692_p11, %p691_p10  ;;  %p699_p6 = scmp.lt.u32.totalorder %s690_s20, %s918_s18 }
  0x44   : > { %p698_p3 = por %p697_p2, %p696_p0 }
  0x45   : > { %p694_p13 = pneg %p693_p12 }
  0x46   : > { %p700_p9 = por %p699_p6, %p698_p3 }
  0x48   : > { %p701_p8 = pnand %p700_p9, %p694_p13 }
  0x4a   : > { %704 = shalt.err (!%p701_p8)
}
  0x4b   : > { %s705_s8 = scalar_lea.vmem %s924_s14, 128  ;;  %s762_s10 = smov [#allocation2]  }
  0x4c   : > { %p706_p1 = scmp.ne.s32.totalorder %s924_s14, %s705_s8  ;;  %s710_s15 = sshll.u32 %s762_s10, 4  ;;  %s711_s15 = int_to_ptr.vmem [resolvable:$false] %s710_s15 }
  0x4d   : > { %s712_s16 = scalar_lea.vmem %s711_s15, 256  ;;  %p713_p10 = scmp.lt.s32.totalorder %s924_s14, %s711_s15 }
  0x4e   : > { %p708_p4 = pnand %p706_p1, %p692_p11  ;;  %p714_p12 = scmp.lt.s32.totalorder %s712_s16, %s705_s8 }
  0x50   : > { %p709_p5 = pneg %p708_p4  ;;  %p715_p0 = por %p714_p12, %p713_p10 }
  0x52   : > { %p716_p2 = pnand %p715_p0, %p709_p5 }
  0x54   : > { %719 = shalt.err (!%p716_p2)
}
  0x55   : > { %587 = dma.hbm_to_vmem [thread:$0]  (!%p920_p7), %s918_s18, 128, %s924_s14, %s257_s27  }
  0x56   : > { %p1016_p13 = scmp.ne.s32.totalorder %s1013_s30, 0 }
  0x57   : > { %s285_s17 = sand.u32 (!%p1016_p13), 1, %s750_s25   ;;  %p1017_p11 = scmp.ne.s32.totalorder (!%p1016_p13), %s1012_s29, 0 }
  0x58   : > { %283 = sbr.rel (%p1016_p13) target bundleno = 731 (0x2db), region = 44  ;;  %s555_s11 = sshll.u32 (!%p1016_p13), %s285_s17, 3 }
  0x59   : > { %s286_s20 = scalar_lea.sflag (!%p1016_p13), [#allocation3], %s285_s17  ;;  %s289_s9 = scalar_lea.vmem (!%p1016_p13), [#allocation2], %s555_s11 }
  0x5f   : > { %737 = dma.done.wait (%p1017_p11), %s286_s20, 128  }
  0x60   : > { %739 = vsyncadd (%p1017_p11), %s286_s20, 4294967168  ;;  %p1018_p3 = scmp.eq.s32.totalorder %s823_s28, 0 }
  0x62   : > { %741 = dma.done.wait (%p1018_p3), [#allocation5], 32   ;;  %p1019_p6 = pmov %p1018_p3 }
  0x63   : > { %vm350_vm0 = vcmask 261120   ;;  %v347_v0 = vld [vmem:[%s289_s9] sm:$0xff]  ;;  %p335_p7 = scmp.lt.s32.totalorder %s823_s28, 1  ;;  %v763_v2 = vmov 0   ;;  %v561_v14 = vld [vmem:[#allocation4] ss:$0 sm:$0xff] }
  0x64   : > { %743 = vsyncadd (%p1019_p6), [#allocation5], 4294967264  ;;  %v351_v1 = vsel %vm350_vm0, %v347_v0, 0.0  ;;  %628 = vset.pattern.permute.xlu1 %v763_v2  ;;  %629 = vset.pattern.permute.xlu0 %v763_v2  ;;  %v562_v16 = vld [vmem:[#allocation6] ss:$0 sm:$0xff]  ;;  %vm418_vm1 = vcmask 257024  }
  0x65   : > { %352 = vadd.xlane.f32.xlu0 %v351_v1  ;;  %s1025_s28 = smov (!%p335_p7, %s823_s28), 1  ;;  %v563_v31 = vld [vmem:[%s1005_s4] ss:$0 sm:$0xff] }
  0x66   : > { %s558_s29 = sshll.u32 %s1025_s28, 3  ;;  %v564_v33 = vld [vmem:[%s1006_s5] ss:$0 sm:$0xff]  ;;  %s560_s10 = sshll.u32 %s1025_s28, 2 }
  0x67   : > { %s338_s14 = scalar_lea.vmem %s1002_s1, %s558_s29  ;;  %s342_s21 = scalar_lea.vmem %s1007_s6, %s558_s29 }
  0x68   : > { %v379_v3 = vld [vmem:[%s338_s14] sm:$0xff]  ;;  %s346_s17 = scalar_lea.vmem %s1008_s7, %s560_s10 }
  0x69   : > { %v380_v4 = vsub.f32 1.0, %v379_v3 }
  0x6b   : > { %383 = vperm.xlu1 %628, %v380_v4  }
  0xea   : > { %v384_v18 = vpop.permute.xlu1 %383 }
  0xf2   : > { %v353_v5 = vpop.xlane.xlu0 %352 }
  0xf3   : > { %v355_v6 = vmul.f32 0.03125, %v353_v5 }
  0xf5   : > { %v356_v7 = vsub.f32 %v347_v0, %v355_v6 }
  0xf7   : > { %v357_v8 = vmul.f32 %v356_v7, %v356_v7 }
  0xf9   : > { %v358_v9 = vsel %vm350_vm0, %v357_v8, 0.0 }
  0xfa   : > { %359 = vadd.xlane.f32.xlu0 %v358_v9 }
 0x187   : > { %v360_v10 = vpop.xlane.xlu0 %359 }
 0x188   : > { %v361_v11 = vmul.f32 0.03125, %v360_v10 }
 0x18a   : > { %v362_v12 = vadd.f32 1e-05, %v361_v11 }
 0x18c   : > { %630 = vrsqrt.f32 %v362_v12 }
 0x196   : > { %v631_v13 = vpop.eup %630 }
 0x197   : > { %v364_v15 = vmul.f32 %v631_v13, %v356_v7 }
 0x199   : > { %v371_v17 = vmul.f32 %v561_v14, %v364_v15 }
 0x19b   : > { %v378_v19 = vadd.f32 %v562_v16, %v371_v17 }
 0x19d   : > { %v386_v20 = vmul.f32 %v384_v18, %v378_v19 }
 0x19f   : > { %387 = vst.msk [vmem:[%s342_s21] sm:$0xff] %vm350_vm0, %v386_v20  ;;  %v390_v21 = vsel %vm350_vm0, %v386_v20, 0.0 }
 0x1a0   : > { %391 = vadd.xlane.f32.xlu1 %v390_v21 }
 0x22d   : > { %v392_v22 = vpop.xlane.xlu1 %391 }
 0x22e   : > { %v393_v23 = vmul.f32 0.03125, %v392_v22 }
 0x230   : > { %v394_v24 = vsub.f32 %v386_v20, %v393_v23 }
 0x232   : > { %v395_v25 = vmul.f32 %v394_v24, %v394_v24 }
 0x234   : > { %v396_v26 = vsel %vm350_vm0, %v395_v25, 0.0 }
 0x235   : > { %397 = vadd.xlane.f32.xlu0 %v396_v26 }
 0x2c2   : > { %v398_v27 = vpop.xlane.xlu0 %397 }
 0x2c3   : > { %v399_v28 = vmul.f32 0.03125, %v398_v27 }
 0x2c5   : > { %v400_v29 = vadd.f32 1e-05, %v399_v28 }
 0x2c7   : > { %632 = vrsqrt.f32 %v400_v29 }
 0x2d1   : > { %v633_v30 = vpop.eup %632 }
 0x2d2   : > { %v402_v32 = vmul.f32 %v633_v30, %v394_v24 }
 0x2d4   : > { %v409_v34 = vmul.f32 %v563_v31, %v402_v32 }
 0x2d6   : > { %v416_v35 = vadd.f32 %v564_v33, %v409_v34 }
 0x2d8   : > { %v417_v36 = vpack.c.bf16 %v416_v35, %v416_v35 }
 0x2da   : > { %419 = vst.msk [vmem:[%s346_s17] sm:$0xf] %vm418_vm1, %v417_v36 }
 0x2db PF: > { %p19_p9 = scmp.ge.s32.totalorder %s850_s13, 4   ;;  %s1020_s24 = smov %s750_s25 }
 0x2dc   : > { %s1021_s25 = smov %s754_s26  ;;  %s1022_s26 = smov %s910_s12 }
 0x2dd   : > { %s1023_s27 = smov %s850_s13  ;;  %21 = sbr.rel (!%p19_p9) target bundleno = 4 (0x4), region = 107 }
 0x2e4   :  { %453 = vsyncpa [#allocation3], 1 }
 0x2e5   :  { %455 = vsyncpa [#allocation3 + $0x1], 1 }
 0x2e6   :  { %456 = vsyncpa [#allocation5], 1 }

// kernel: transformer_encoder_with_pair.5
= control target key start
LH: loop header
LB: loop body
LE: loop exit
PB: predicated region body
PF: predicated region fallthrough
CT: control target
= control target key end

     0   :  { %s2611_s0 = inlined_call_operand.vmem [shape: bf16[2,8,32], index: 0, kind: input, shape index: {}]   ;;  %s2612_s1 = inlined_call_operand.vmem [shape: f32[2,8,32], index: 1, kind: input, shape index: {}]   ;;  %s2613_s2 = inlined_call_operand.vmem [shape: bf16[2,4,8,8], index: 2, kind: input, shape index: {}]   ;;  %s2614_s3 = inlined_call_operand.vmem [shape: bf16[2,32,48], index: 3, kind: input, shape index: {}]   ;;  %s2615_s4 = inlined_call_operand.vmem [shape: f32[2,1,48], index: 4, kind: input, shape index: {}]   ;;  %s2616_s5 = inlined_call_operand.vmem [shape: bf16[2,16,32], index: 5, kind: input, shape index: {}]   ;;  %s2617_s6 = inlined_call_operand.vmem [shape: f32[1,32], index: 6, kind: input, shape index: {}]   ;;  %s2618_s7 = inlined_call_operand.vmem [shape: f32[1,32], index: 7, kind: input, shape index: {}]   ;;  %s2619_s8 = inlined_call_operand.vmem [shape: f32[1,32], index: 8, kind: input, shape index: {}]   ;;  %s2620_s9 = inlined_call_operand.vmem [shape: bf16[32,64], index: 9, kind: input, shape index: {}]   ;;  %s2621_s10 = inlined_call_operand.vmem [shape: f32[1,64], index: 10, kind: input, shape index: {}]   ;;  %s2622_s11 = inlined_call_operand.vmem [shape: bf16[64,32], index: 11, kind: input, shape index: {}]   ;;  %s2623_s12 = inlined_call_operand.vmem [shape: f32[1,32], index: 12, kind: input, shape index: {}]   ;;  %s2624_s13 = inlined_call_operand.vmem [shape: f32[1,32], index: 13, kind: input, shape index: {}]   ;;  %s2625_s14 = inlined_call_operand.vmem [shape: f32[1,32], index: 14, kind: input, shape index: {}]   ;;  %s2626_s15 = inlined_call_operand.vmem [shape: f32[2,1,1,8], index: 15, kind: input, shape index: {}]   ;;  %s2627_s16 = inlined_call_operand.vmem [shape: f32[2,4,8,8], index: 16, kind: input, shape index: {}]   ;;  %s2628_s17 = inlined_call_operand.vmem [shape: f32[2,4,8,8], index: 17, kind: output, shape index: {0}]   ;;  %s2629_s18 = inlined_call_operand.hbm [shape: f32[2,8,32], index: 18, kind: output, shape index: {1}]   ;;  %s2630_s19 = inlined_call_operand.hbm [shape: bf16[2,8,32], index: 19, kind: output, shape index: {2}]   ;;  %s2631_s20 = inlined_call_operand.vmem [shape: f32[2,4,8,8], index: 20, kind: output, shape index: {3}]  }
   0x1   :  { %2647 = sst [smem:[#allocation21_spill]] %s2611_s0 }
   0x2   :  { %2648 = sst [smem:[#allocation22_spill]] %s2612_s1 }
   0x3   :  { %2649 = sst [smem:[#allocation23_spill]] %s2613_s2 }
   0x4   :  { %2650 = sst [smem:[#allocation24_spill]] %s2614_s3 }
   0x5   :  { %2651 = sst [smem:[#allocation25_spill]] %s2615_s4 }
   0x6   :  { %2652 = sst [smem:[#allocation26_spill]] %s2616_s5 }
   0x7   :  { %2653 = sst [smem:[#allocation27_spill]] %s2617_s6 }
   0x8   :  { %2654 = sst [smem:[#allocation28_spill]] %s2625_s14 }
   0x9   :  { %2655 = sst [smem:[#allocation29_spill]] %s2629_s18 }
   0xa   :  { %2656 = sst [smem:[#allocation30_spill]] %s2630_s19 }
   0xb   :  { %26 = vsyncpa [#allocation4], 0 }
   0xc   :  { %28 = vsyncpa [#allocation4 + $0x1], 0 }
   0xd   :  { %29 = vsyncpa [#allocation6], 0 }
   0xe   :  { %31 = vsyncpa [#allocation6 + $0x1], 0  ;;  %s2297_s1 = smov 0   ;;  %s2299_s22 = smov 0  }
   0xf   :  { %s2301_s23 = smov 0   ;;  %s2303_s24 = smov 0  }
  0x10   :  { %s2305_s2 = smov 0   ;;  %s2307_s25 = smov 0  }
  0x11   :  { %s2309_s3 = smov 0   ;;  %s2311_s26 = smov 0  }
  0x12 LB: > { %2657 = sst [smem:[#allocation9_spill]] %s2149_s1  ;;  %s1797_s27 = sadd.s32 4294967295, %s2177_s26   ;;  %s2177_s26 = sphi %s2311_s26, %s37_s26   ;;  %s2173_s3 = sphi %s2309_s3, %s2696_s3   ;;  %s2169_s25 = sphi %s2307_s25, %s2695_s25   ;;  %s2165_s2 = sphi %s2305_s2, %s2694_s2   ;;  %s2161_s24 = sphi %s2303_s24, %s2693_s24   ;;  %s2157_s23 = sphi %s2301_s23, %s2692_s23   ;;  %s2153_s22 = sphi %s2299_s22, %s2691_s22   ;;  %s2149_s1 = sphi %s2297_s1, %s2690_s1  }
  0x13   : > { %2658 = sst [smem:[#allocation10_spill]] %s2153_s22  ;;  %s1798_s28 = sadd.s32 4294967294, %s2177_s26  }
  0x14   : > { %2659 = sst [smem:[#allocation11_spill]] %s2157_s23  ;;  %s46_s4 = sadd.s32 1, %s2169_s25 }
  0x15   : > { %2660 = sst [smem:[#allocation12_spill]] %s2165_s2  ;;  %p47_p0 = scmp.ge.s32.totalorder %s46_s4, 2 }
  0x16   : > { %2661 = sst [smem:[#allocation13_spill]] %s2169_s25  ;;  %s49_s29 = sadd.s32 1, %s2173_s3 }
  0x17   : > { %2662 = sst [smem:[#allocation14_spill]] %s2173_s3  ;;  %p495_p1 = scmp.ne.s32.totalorder %s2157_s23, %s2153_s22 }
  0x18   : > { %2663 = sst [smem:[#allocation15_spill]] %s2177_s26  ;;  %p496_p2 = scmp.eq.s32.totalorder %s1797_s27, 3 }
  0x19   : > { %s2698_s4 = smov (%p47_p0, %s46_s4), 0  ;;  %s2700_s29 = smov (!%p47_p0, %s49_s29), %s2173_s3 }
  0x1a   : > { %2664 = sst [smem:[#allocation16_spill]] %s2698_s4  ;;  %p2346_p3 = por %p496_p2, %p495_p1 }
  0x1b   : > { %p501_p4 = scmp.ne.s32.totalorder %s2153_s22, %s2149_s1  ;;  %p51_p5 = scmp.ge.s32.totalorder %s2700_s29, 2 }
  0x1c   : > { %s2665_s30 = scalar_select %p2346_p3, 1, 0 }
  0x1d   : > { %p502_p6 = scmp.eq.s32.totalorder %s1798_s28, 3  ;;  %p1801_p7 = scmp.ge.s32.totalorder %s2177_s26, 1 }
  0x1e   : > { %2666 = sst [smem:[#allocation17_spill]] %s2665_s30  ;;  %p669_p8 = scmp.lt.s32.totalorder %s2177_s26, 5 }
  0x1f   : > { %s2702_s29 = smov (%p51_p5, %s2700_s29), 0  ;;  %p2356_p9 = por %p502_p6, %p501_p4 }
  0x20   : > { %2667 = sst [smem:[#allocation18_spill]] %s2702_s29  ;;  %p670_p10 = pnand %p1801_p7, %p669_p8 }
  0x21   : > { %s2668_s0 = scalar_select %p2356_p9, 1, 0 }
  0x22   : > { %s482_s21 = ssub.s32 %s2173_s3, %s2702_s29  ;;  %s485_s27 = sadd.s32 1, %s2157_s23  ;;  %v2179_v0 = vmov (!%p670_p10), 0.0   ;;  %vm2180_vm0 = vmmov (!%p670_p10), 0   ;;  %vm876_vm1 = vcmask (!%p670_p10), 261120   ;;  %vm927_vm2 = vcmask (!%p670_p10), 64512  }
  0x23   : > { %2669 = sst [smem:[#allocation19_spill]] %s2668_s0  ;;  %p483_p11 = scmp.eq.s32.totalorder %s482_s21, 0  ;;  %1883 = vmatprep.subr.bf16.mxu0 (!%p670_p10), %v2179_v0  ;;  %1887 = vmatprep.mubr.msk.bf16.mxu0 (!%p670_p10), %vm2180_vm0, %v2179_v0  ;;  %v1040_v16 = vlaneseq (!%p670_p10)  ;;  %v2184_v21 = vmov (!%p670_p10), 0   ;;  %vm992_vm5 = vcmask (!%p670_p10), 1043456   ;;  %vm1182_vm6 = vcmask (!%p670_p10), 130048  }
  0x24   : > { %673 = sbr.rel (%p670_p10) target bundleno = 2626 (0xa42), region = 88  ;;  %s2367_s28 = sand.u32 (!%p670_p10), 1, %s2153_s22   ;;  %1891 = vmatprep.subr.bf16.mxu1 (!%p670_p10), %v2179_v0  ;;  %1893 = vmatprep.mubr.msk.bf16.mxu1 (!%p670_p10), %vm2180_vm0, %v2179_v0 }
  0x25   : > { %s2364_s4 = scalar_select %p483_p11, %s2157_s23, %s485_s27  }
  0x26   : > { %p805_p12 = scmp.lt.s32.totalorder (!%p670_p10), %s2161_s24, 1  ;;  %p787_p13 = scmp.lt.s32.totalorder (!%p670_p10), %s2165_s2, 1  ;;  %v1041_v18 = vshrl.u32 (!%p670_p10), %v1040_v16, 7 }
  0x27   : > { %2670 = sst [smem:[#allocation20_spill]] %s2364_s4  ;;  %s2671_s1 = sld [smem:[#allocation24_spill]] (!%p670_p10) }
  0x28   : > { %s2672_s19 = sld [smem:[#allocation21_spill]] (!%p670_p10)  ;;  %s2673_s29 = sld [smem:[#allocation22_spill]] (!%p670_p10)  ;;  %v1042_v20 = vsub.s32 (!%p670_p10), 0, %v1041_v18 }
  0x29   : > { %s2185_s14 = smov (!%p670_p10), 96   ;;  %s2676_s5 = sld [smem:[#allocation26_spill]] (!%p670_p10) }
  0x2a   : > { %p1836_p1 = scmp.ne.s32.totalorder (!%p670_p10), %s2161_s24, 0 }
  0x2b   : > { %s2379_s21 = scalar_select %p805_p12, %s2161_s24, 1 }
  0x2c   : > { %s2387_s4 = scalar_select %p787_p13, %s2165_s2, 1 }
  0x2d   : > { %s1860_s27 = sshll.u32 %s2379_s21, 4  ;;  %s2674_s2 = sld [smem:[#allocation25_spill]] }
  0x2e   : > { %s809_s3 = scalar_lea.vmem %s2671_s1, %s1860_s27  ;;  %s1804_s23 = sshll.u32 %s2387_s4, 2 }
  0x2f   : > { %v2028_v1 = vld [vmem:[%s809_s3] sm:$0xff]   ;;  %v2029_v2 = vld [vmem:[%s809_s3 + $0x8] sm:$0xff]   ;;  %s1805_s22 = sshll.u32 %s2387_s4, 3  ;;  %s790_s18 = scalar_lea.vmem %s2672_s19, %s1804_s23 }
  0x30   : > { %1884 = vmatpush3.bf16.msra.mxu0 %v2028_v1  ;;  %s2400_s27 = scalar_lea.vmem %s2673_s29, %s1805_s22  ;;  %v852_v3 = vld [vmem:[%s790_s18] sm:$0xf]  ;;  %s2181_s18 = smov 120  }
  0x31   : > { %1885 = vmatprep.subr.bf16.mxu0 %v2179_v0  ;;  %s2182_s19 = smov 112   ;;  %s2183_s22 = smov 104  }
  0x32   : > { %s820_s1 = scalar_lea.vmem %s2626_s15, %s2387_s4  ;;  %s2186_s3 = smov 88  }
  0x33   : > { %s812_s26 = scalar_lea.vmem %s2674_s2, %s2379_s21  ;;  %s1806_s2 = sshll.u32 %s2161_s24, 1  ;;  %v920_v17 = vld [vmem:[%s820_s1] sm:$0x1] }
  0x34   : > { %1886 = vmatpush3.bf16.msra.mxu0 %v2029_v2  ;;  %v1822_v4 = vld [vmem:[%s812_s26] ss:$0 sm:$0xff]  ;;  %p798_p0 = scmp.lt.s32.totalorder %s1806_s2, 3  ;;  %vm1036_vm3 = vcmp.gt.f32.partialorder %v920_v17, 0.5  ;;  %s1861_s26 = sshll.u32 %s2379_s21, 3 }
  0x35   : > { %1897 = vmatprep.subr.bf16.mxu0 %v2179_v0  ;;  %v1039_v22 = vsel %vm1036_vm3, 1, %v2184_v21  ;;  %s2677_s21 = sshll.u32 %s2367_s28, 3  ;;  %s2678_s4 = sshll.u32 %s2367_s28, 2 }
  0x36   : > { %s2704_s2 = smov (!%p798_p0, %s1806_s2), 3  ;;  %v1043_v24 = vrot.slane %v1039_v22, %v1042_v20  ;;  %s2473_s0 = scalar_lea.vmem [#allocation5], %s2678_s4 }
  0x37   : > { %1888 = vmatmul.mubr.msk.bf16.vlgmr.msra.gmra.mrb[0].mxu0 %vm876_vm1, %v852_v3  ;;  %s801_s30 = sadd.s32 %s1804_s23, %s2704_s2  ;;  %s2187_s23 = smov 8  }
  0x38   : > { %1899 = vmatprep.mubr.msk.bf16.mxu0 %vm2180_vm0, %v2179_v0  ;;  %s1808_s29 = sshll.u32 %s801_s30, 2  ;;  %vm1044_vm4 = vcmp.eq.s32.totalorder %v1043_v24, 1 }
 0x10a   : > { %v914_v5 = vpop.f32.mrb[0].mxu0 }
 0x10b   : > { %v915_v6 = vadd.f32 %v1822_v4, %v914_v5  ;;  %v1889_v7 = vpop.f32.mrb[1].mxu0 }
 0x10c   : > { %v917_v8 = vpop.f32.mrb[2].mxu0 }
 0x10d   : > { %v2410_v9 = vpack.c.bf16 %v915_v6, %v915_v6  ;;  %v1890_v10 = vpop.f32.mrb[3].mxu0 }
 0x10f   : > { %1050 = vrot.lane.b32.xlu1 %v2410_v9, %s2181_s18  ;;  %925 = vrot.lane.b32.xlu0 %v2410_v9, %s2182_s19  ;;  %s2675_s18 = sld [smem:[#allocation23_spill]] }
 0x113   : > { %1052 = vrot.lane.b32.xlu0 %v2410_v9, %s2183_s22  ;;  %s1815_s22 = sshll.u32 %s801_s30, 3 }
 0x114   : > { %s829_s2 = scalar_lea.vmem %s2627_s16, %s1815_s22  ;;  %s839_s25 = scalar_lea.vmem %s2628_s17, %s1815_s22 }
 0x115   : > { %s803_s19 = scalar_lea.vmem %s2675_s18, %s1808_s29  ;;  %v1037_v26 = vld [vmem:[%s829_s2] sm:$0xff]  ;;  %s849_s29 = scalar_lea.vmem %s2631_s20, %s1815_s22  ;;  %v1832_v35 = vld [vmem:[%s829_s2 + $0x8] sm:$0xff] }
 0x116   : > { %v922_v19 = vld [vmem:[%s803_s19] sm:$0xff]   ;;  %s817_s22 = scalar_lea.vmem %s2676_s5, %s1861_s26  ;;  %s2469_s2 = scalar_lea.vmem [#allocation3], %s2677_s21 }
 0x117   : > { %v923_v23 = vunpack.c.l.bf16 %v922_v19  ;;  %v1049_v34 = vunpack.c.h.bf16 %v922_v19  ;;  %v2030_v3 = vld [vmem:[%s817_s22] sm:$0xff]  }
 0x181   : > { %v926_v11 = vpop.permute.xlu0 %925  ;;  %v1051_v15 = vpop.permute.xlu1 %1050 }
 0x182   : > { %v932_v12 = vsel %vm927_vm2, %v926_v11, 0 }
 0x183   : > { %1892 = vmatpush3.bf16.xpose.msra.mxu1 %v932_v12 }
 0x184   : > { %1903 = vmatprep.subr.bf16.mxu1 %v2179_v0 }
 0x185   : > { %v1053_v13 = vpop.permute.xlu0 %1052 }
 0x186   : > { %v1058_v14 = vsel %vm927_vm2, %v1053_v13, 0 }
 0x18a   : > { %1894 = vmatmul.mubr.msk.bf16.vlgmr.msra.gmra.mrb[0].mxu1 %vm927_vm2, %v2410_v9 }
 0x18b   : > { %1904 = vmatpush3.bf16.xpose.msra.mxu1 %v1058_v14  ;;  %1905 = vmatprep.mubr.msk.bf16.mxu1 %vm2180_vm0, %v2179_v0 }
 0x18c   : > { %1915 = vmatprep.subr.bf16.mxu1 %v2179_v0 }
 0x192   : > { %1906 = vmatmul.mubr.msk.bf16.vlgmr.msra.gmra.mrb[4].mxu1 %vm927_vm2, %v1051_v15 }
 0x193   : > { %1917 = vmatprep.mubr.msk.bf16.mxu1 %vm2180_vm0, %v2179_v0  ;;  %1916 = vmatpush3.bf16.msra.mxu1 %v2030_v3 }
 0x25d   : > { %v968_v25 = vpop.f32.mrb[0].mxu1 }
 0x25e   : > { %v969_v27 = vadd.f32 %v968_v25, %v923_v23  ;;  %v1895_v28 = vpop.f32.mrb[1].mxu1 }
 0x25f   : > { %v971_v29 = vpop.f32.mrb[2].mxu1 }
 0x260   : > { %974 = vst.msk [vmem:[%s839_s25] sm:$0xff] %vm927_vm2, %v969_v27  ;;  %v1038_v30 = vsub.f32 %v969_v27, %v1037_v26  ;;  %v1896_v31 = vpop.f32.mrb[3].mxu1  ;;  %v975_v32 = vsel %vm927_vm2, %v969_v27, -inf }
 0x261   : > { %976 = vmax.xlane.f32.xlu1 %v975_v32 }
 0x262   : > { %v1045_v33 = vsel %vm1044_vm4, 0.0, %v1038_v30 }
 0x263   : > { %1046 = vst.msk [vmem:[%s849_s29] sm:$0xff] %vm927_vm2, %v1045_v33 }
 0x265   : > { %v1094_v36 = vpop.f32.mrb[4].mxu1 }
 0x266   : > { %v1095_v37 = vadd.f32 %v1094_v36, %v1049_v34  ;;  %v1907_v38 = vpop.f32.mrb[5].mxu1 }
 0x267   : > { %v1097_v39 = vpop.f32.mrb[6].mxu1 }
 0x268   : > { %1830 = vst.msk [vmem:[%s839_s25 + $0x8] sm:$0xff] %vm927_vm2, %v1095_v37  ;;  %v1164_v40 = vsub.f32 %v1095_v37, %v1832_v35  ;;  %v1908_v41 = vpop.f32.mrb[7].mxu1  ;;  %v1102_v42 = vsel %vm927_vm2, %v1095_v37, -inf }
 0x269   : > { %1103 = vmax.xlane.f32.xlu0 %v1102_v42 }
 0x26a   : > { %v1165_v43 = vsel %vm1044_vm4, 0.0, %v1164_v40 }
 0x26b   : > { %1833 = vst.msk [vmem:[%s849_s29 + $0x8] sm:$0xff] %vm927_vm2, %v1165_v43 }
 0x2ee   : > { %v977_v44 = vpop.xlane.xlu1 %976 }
 0x2ef   : > { %v978_v45 = vsub.f32 %v969_v27, %v977_v44 }
 0x2f1   : > { %v979_v46 = vmul.f32 1.442695, %v978_v45 }
 0x2f3   : > { %2031 = vpow2.f32 %v979_v46 }
 0x2f6   : > { %v1104_v47 = vpop.xlane.xlu0 %1103 }
 0x2f7   : > { %v1105_v48 = vsub.f32 %v1095_v37, %v1104_v47 }
 0x2f9   : > { %v1106_v49 = vmul.f32 1.442695, %v1105_v48 }
 0x2fb   : > { %2033 = vpow2.f32 %v1106_v49 }
 0x2fd   : > { %v2032_v50 = vpop.eup %2031 }
 0x2fe   : > { %v981_v51 = vsel %vm927_vm2, %v2032_v50, 0.0 }
 0x2ff   : > { %982 = vadd.xlane.f32.xlu0 %v981_v51 }
 0x305   : > { %v2034_v52 = vpop.eup %2033 }
 0x306   : > { %v1108_v53 = vsel %vm927_vm2, %v2034_v52, 0.0 }
 0x307   : > { %1109 = vadd.xlane.f32.xlu1 %v1108_v53 }
 0x315   : > { %987 = vrot.lane.b32.xlu0 %v2410_v9, %s2185_s14 }
 0x318   : > { %1114 = vrot.lane.b32.xlu1 %v2410_v9, %s2186_s3 }
 0x38c   : > { %v983_v54 = vpop.xlane.xlu0 %982 }
 0x38d   : > { %2035 = vrcp.f32 %v983_v54 }
 0x390   : > { %v988_v55 = vpop.permute.xlu0 %987 }
 0x391   : > { %v994_v56 = vsel %vm992_vm5, %v988_v55, 0 }
 0x392   : > { %1898 = vmatpush3.bf16.msra.mxu0 %v994_v56 }
 0x393   : > { %1909 = vmatprep.subr.bf16.mxu0 %v2179_v0 }
 0x394   : > { %v1110_v57 = vpop.xlane.xlu1 %1109 }
 0x395   : > { %2037 = vrcp.f32 %v1110_v57 }
 0x397   : > { %v2036_v58 = vpop.eup %2035 }
 0x398   : > { %v985_v59 = vmul.f32 %v2036_v58, %v2032_v50  ;;  %v1115_v60 = vpop.permute.xlu1 %1114 }
 0x399   : > { %v1120_v62 = vsel %vm992_vm5, %v1115_v60, 0 }
 0x39a   : > { %v986_v61 = vpack.c.bf16 %v985_v59, %v985_v59 }
 0x39c   : > { %1900 = vmatmul.mubr.msk.bf16.vlgmr.msra.gmra.mrb[4].mxu0 %vm927_vm2, %v986_v61 }
 0x39d   : > { %1910 = vmatpush3.bf16.msra.mxu0 %v1120_v62  ;;  %1911 = vmatprep.mubr.msk.bf16.mxu0 %vm2180_vm0, %v2179_v0 }
 0x39f   : > { %v2038_v63 = vpop.eup %2037 }
 0x3a0   : > { %v1112_v1 = vmul.f32 %v2038_v63, %v2034_v52 }
 0x3a2   : > { %v1113_v2 = vpack.c.bf16 %v1112_v1, %v1112_v1 }
 0x3a4   : > { %1912 = vmatmul.mubr.msk.bf16.vlgmr.msra.gmra.mrb[8].mxu0 %vm927_vm2, %v1113_v2 }
 0x46f   : > { %v1030_v4 = vpop.f32.mrb[4].mxu0 }
 0x470   : > { %v1901_v5 = vpop.f32.mrb[5].mxu0 }
 0x471   : > { %v1033_v6 = vpop.f32.mrb[6].mxu0 }
 0x472   : > { %v1902_v7 = vpop.f32.mrb[7].mxu0 }
 0x477   : > { %v1156_v8 = vpop.f32.mrb[8].mxu0 }
 0x478   : > { %1169 = vrot.lane.b32.xlu1 %v1156_v8, %s2187_s23  ;;  %v1913_v0 = vpop.f32.mrb[9].mxu0 }
 0x479   : > { %v1159_v9 = vpop.f32.mrb[10].mxu0 }
 0x47a   : > { %v1914_v10 = vpop.f32.mrb[11].mxu0 }
 0x4ea   : > { %v1170_v11 = vpop.permute.xlu1 %1169 }
 0x4eb   : > { %v1172_v12 = vsel %vm927_vm2, %v1030_v4, %v1170_v11 }
 0x4ec   : > { %v1173_v13 = vpack.c.bf16 %v1172_v12, %v1172_v12 }
 0x4ee   : > { %1918 = vmatmul.mubr.msk.bf16.vlgmr.msra.gmra.mrb[8].mxu1 %vm1182_vm6, %v1173_v13 }
 0x5be   : > { %1229 = sbr.rel (%p1836_p1) target bundleno = 1477 (0x5c5), region = 92 }
 0x5c1   : > { %v1220_v14 = vpop.f32.mrb[8].mxu1 }
 0x5c2   : > { %v1919_v15 = vpop.f32.mrb[9].mxu1  ;;  %1230 = vst.msk [vmem:[#allocation2] sm:$0xff] (!%p1836_p1), %vm876_vm1, %v1220_v14 }
 0x5c3   : > { %v1223_v16 = vpop.f32.mrb[10].mxu1 }
 0x5c4   : > { %v1920_v17 = vpop.f32.mrb[11].mxu1 }
 0x5c5 PF: > { %p1837_p2 = scmp.le.s32.totalorder %s2161_s24, 0 }
 0x5c7   : > { %1234 = sbr.rel (%p1837_p2) target bundleno = 1486 (0x5ce), region = 96 }
 0x5c9   : > { %v1235_v18 = vld [vmem:[#allocation2] sm:$0xff] (!%p1837_p2) }
 0x5ca   : > { %v1236_v19 = vadd.f32 (!%p1837_p2), %v1235_v18, %v1220_v14 }
 0x5cc   : > { %1237 = vst.msk [vmem:[#allocation2] sm:$0xff] (!%p1837_p2), %vm876_vm1, %v1236_v19 }
 0x5ce PF: > { %p1838_p4 = scmp.ne.s32.totalorder %s2161_s24, 1 }
 0x5cf   : > { %v1242_v20 = vld [vmem:[%s2400_s27] sm:$0xff] (!%p1838_p4)  ;;  %s2679_s6 = sld [smem:[#allocation27_spill]] (!%p1838_p4)  ;;  %v2188_v32 = vmov (!%p1838_p4), 0.0   ;;  %vm2189_vm7 = vmmov (!%p1838_p4), 0   ;;  %v2040_v33 = vld [vmem:[%s2620_s9 + $0x8] sm:$0xff] (!%p1838_p4)   ;;  %v2043_v46 = vld [vmem:[%s2622_s11 + $0x10] sm:$0xff] (!%p1838_p4)  }
 0x5d0   : > { %1241 = sbr.rel (%p1838_p4) target bundleno = 2576 (0xa10), region = 100  ;;  %v2039_v31 = vld [vmem:[%s2620_s9] sm:$0xff] (!%p1838_p4)   ;;  %1921 = vmatprep.subr.bf16.mxu0 (!%p1838_p4), %v2188_v32  ;;  %1925 = vmatprep.mubr.msk.bf16.mxu0 (!%p1838_p4), %vm2189_vm7, %v2188_v32  ;;  %v2042_v45 = vld [vmem:[%s2622_s11 + $0x8] sm:$0xff] (!%p1838_p4)   ;;  %v2044_v47 = vld [vmem:[%s2622_s11 + $0x18] sm:$0xff] (!%p1838_p4)   ;;  %vm1395_vm8 = vcmask (!%p1838_p4), 523264   ;;  %s2680_s22 = sld [smem:[#allocation28_spill]] (!%p1838_p4) }
 0x5d1   : > { %1922 = vmatpush3.bf16.msra.mxu0 (!%p1838_p4), %v2039_v31  ;;  %1929 = vmatprep.subr.bf16.mxu1 (!%p1838_p4), %v2188_v32  ;;  %v1840_v38 = vld [vmem:[%s2618_s7] ss:$0 sm:$0xff] (!%p1838_p4)  ;;  %vm1471_vm9 = vcmask (!%p1838_p4), 257024  }
 0x5d2   : > { %1923 = vmatprep.subr.bf16.mxu0 (!%p1838_p4), %v2188_v32  ;;  %1937 = vmatprep.mubr.msk.bf16.mxu1 (!%p1838_p4), %vm2189_vm7, %v2188_v32  ;;  %v1841_v40 = vld [vmem:[%s2619_s8] ss:$0 sm:$0xff] (!%p1838_p4) }
 0x5d3   : > { %v1243_v21 = vld [vmem:[#allocation2] sm:$0xff] (!%p1838_p4) }
 0x5d4   : > { %v1244_v23 = vadd.f32 (!%p1838_p4), %v1243_v21, %v1242_v20  ;;  %v2041_v44 = vld [vmem:[%s2622_s11] sm:$0xff] (!%p1838_p4)  }
 0x5d5   : > { %v1839_v22 = vld [vmem:[%s2679_s6] ss:$0 sm:$0xff] (!%p1838_p4)  ;;  %1924 = vmatpush3.bf16.msra.mxu0 (!%p1838_p4), %v2040_v33  ;;  %1930 = vmatpush3.bf16.msra.mxu1 (!%p1838_p4), %v2041_v44 }
 0x5d6   : > { %v2484_v24 = vadd.f32 (!%p1838_p4), %v1839_v22, %v1244_v23  ;;  %1931 = vmatprep.subr.bf16.mxu1 (!%p1838_p4), %v2188_v32  ;;  %v1842_v48 = vld [vmem:[%s2621_s10] ss:$0 sm:$0xff] (!%p1838_p4) }
 0x5d7   : > { %v1846_v60 = vld [vmem:[%s2623_s12] ss:$0 sm:$0xff] }
 0x5d8   : > { %v1255_v25 = vsel %vm876_vm1, %v2484_v24, 0.0  ;;  %v1852_v13 = vld [vmem:[%s2624_s13] ss:$0 sm:$0xff] }
 0x5d9   : > { %1256 = vadd.xlane.f32.xlu0 %v1255_v25  ;;  %1932 = vmatpush3.bf16.msra.mxu1 %v2042_v45  ;;  %v1853_v15 = vld [vmem:[%s2680_s22] ss:$0 sm:$0xff] }
 0x5da   : > { %1933 = vmatprep.subr.bf16.mxu1 %v2188_v32 }
 0x5dd   : > { %1934 = vmatpush3.bf16.msra.mxu1 %v2043_v46 }
 0x5de   : > { %1935 = vmatprep.subr.bf16.mxu1 %v2188_v32 }
 0x5e1   : > { %1936 = vmatpush3.bf16.msra.mxu1 %v2044_v47 }
 0x666   : > { %v1257_v26 = vpop.xlane.xlu0 %1256 }
 0x667   : > { %v1259_v27 = vmul.f32 0.03125, %v1257_v26 }
 0x669   : > { %v1260_v28 = vsub.f32 %v2484_v24, %v1259_v27 }
 0x66b   : > { %v1261_v29 = vmul.f32 %v1260_v28, %v1260_v28 }
 0x66d   : > { %v1262_v30 = vsel %vm876_vm1, %v1261_v29, 0.0 }
 0x66e   : > { %1263 = vadd.xlane.f32.xlu0 %v1262_v30 }
 0x6fb   : > { %v1264_v34 = vpop.xlane.xlu0 %1263 }
 0x6fc   : > { %v1265_v35 = vmul.f32 0.03125, %v1264_v34 }
 0x6fe   : > { %v1266_v36 = vadd.f32 1e-05, %v1265_v35 }
 0x700   : > { %2045 = vrsqrt.f32 %v1266_v36 }
 0x70a   : > { %v2046_v37 = vpop.eup %2045 }
 0x70b   : > { %v1268_v39 = vmul.f32 %v2046_v37, %v1260_v28 }
 0x70d   : > { %v1275_v41 = vmul.f32 %v1840_v38, %v1268_v39 }
 0x70f   : > { %v1282_v42 = vadd.f32 %v1841_v40, %v1275_v41 }
 0x711   : > { %v1283_v43 = vpack.c.bf16 %v1282_v42, %v1282_v42 }
 0x713   : > { %1926 = vmatmul.mubr.msk.bf16.vlgmr.msra.gmra.mrb[0].mxu0 %vm876_vm1, %v1283_v43 }
 0x7e6   : > { %v1344_v49 = vpop.f32.mrb[0].mxu0 }
 0x7e7   : > { %v1345_v50 = vadd.f32 %v1842_v48, %v1344_v49  ;;  %v1927_v51 = vpop.f32.mrb[1].mxu0 }
 0x7e8   : > { %v1347_v52 = vpop.f32.mrb[2].mxu0 }
 0x7e9   : > { %v1351_v53 = vmul.f32 0.70710677, %v1345_v50  ;;  %v1928_v54 = vpop.f32.mrb[3].mxu0  ;;  %v1350_v56 = vmul.f32 0.5, %v1345_v50 }
 0x7eb   : > { %2047 = verf.f32 %v1351_v53 }
 0x7f5   : > { %v2048_v55 = vpop.eup %2047 }
 0x7f6   : > { %v1353_v57 = vadd.f32 1.0, %v2048_v55 }
 0x7f8   : > { %v1354_v58 = vmul.f32 %v1353_v57, %v1350_v56 }
 0x7fa   : > { %v1355_v59 = vpack.c.bf16 %v1354_v58, %v1354_v58 }
 0x7fc   : > { %1938 = vmatmul.mubr.msk.bf16.vlgmr.msra.gmra.mrb[0].mxu1 %vm1395_vm8, %v1355_v59 }
 0x8cf   : > { %v1433_v61 = vpop.f32.mrb[0].mxu1 }
 0x8d0   : > { %v1434_v62 = vadd.f32 %v1846_v60, %v1433_v61  ;;  %v1939_v63 = vpop.f32.mrb[1].mxu1 }
 0x8d1   : > { %v1436_v1 = vpop.f32.mrb[2].mxu1 }
 0x8d2   : > { %v1439_v2 = vadd.f32 %v1434_v62, %v2484_v24  ;;  %v1940_v3 = vpop.f32.mrb[3].mxu1 }
 0x8d4   : > { %1440 = vst.msk [vmem:[%s2469_s2] sm:$0xff] %vm876_vm1, %v1439_v2  ;;  %v1443_v4 = vsel %vm876_vm1, %v1439_v2, 0.0 }
 0x8d5   : > { %1444 = vadd.xlane.f32.xlu1 %v1443_v4 }
 0x962   : > { %v1445_v5 = vpop.xlane.xlu1 %1444 }
 0x963   : > { %v1446_v6 = vmul.f32 0.03125, %v1445_v5 }
 0x965   : > { %v1447_v7 = vsub.f32 %v1439_v2, %v1446_v6 }
 0x967   : > { %v1448_v8 = vmul.f32 %v1447_v7, %v1447_v7 }
 0x969   : > { %v1449_v0 = vsel %vm876_vm1, %v1448_v8, 0.0 }
 0x96a   : > { %1450 = vadd.xlane.f32.xlu1 %v1449_v0 }
 0x9f7   : > { %v1451_v9 = vpop.xlane.xlu1 %1450 }
 0x9f8   : > { %v1452_v10 = vmul.f32 0.03125, %v1451_v9 }
 0x9fa   : > { %v1453_v11 = vadd.f32 1e-05, %v1452_v10 }
 0x9fc   : > { %2049 = vrsqrt.f32 %v1453_v11 }
 0xa06   : > { %v2050_v12 = vpop.eup %2049 }
 0xa07   : > { %v1455_v14 = vmul.f32 %v2050_v12, %v1447_v7 }
 0xa09   : > { %v1462_v16 = vmul.f32 %v1852_v13, %v1455_v14 }
 0xa0b   : > { %v1469_v17 = vadd.f32 %v1853_v15, %v1462_v16 }
 0xa0d   : > { %v1470_v18 = vpack.c.bf16 %v1469_v17, %v1469_v17 }
 0xa0f   : > { %1472 = vst.msk [vmem:[%s2473_s0] sm:$0xf] %vm1471_vm9, %v1470_v18 }
 0xa10 PF: > { %s2681_s23 = sld [smem:[#allocation12_spill]]  ;;  %s2683_s24 = sld [smem:[#allocation29_spill]] }
 0xa11   : > { %s1514_s29 = sshll.u32 %s2469_s2, 4  ;;  %s1483_s14 = scalar_lea.sflag [#allocation4], %s2367_s28  ;;  %s1515_s29 = int_to_ptr.vmem [resolvable:$true] %s1514_s29 }
 0xa12   : > { %s2051_s3 = scalar_lea.vmem %s1515_s29, 128  ;;  %s2190_s26 = smov [#allocation3]  }
 0xa13   : > { %p2052_p5 = scmp.ne.s32.totalorder %s1515_s29, %s2051_s3  ;;  %s2055_s18 = sshll.u32 %s2190_s26, 4  ;;  %s2056_s18 = int_to_ptr.vmem [resolvable:$false] %s2055_s18 }
 0xa14   : > { %s2057_s19 = scalar_lea.vmem %s2056_s18, 256  ;;  %p2058_p8 = scmp.lt.s32.totalorder %s1515_s29, %s2056_s18 }
 0xa15   : > { %p2053_p6 = pnand %p2052_p5, %p2346_p3  ;;  %p2059_p10 = scmp.lt.s32.totalorder %s2057_s19, %s2051_s3 }
 0xa16   : > { %s1856_s4 = sshll.u32 %s2681_s23, 7  ;;  %s2684_s27 = smov %s2683_s24 }
 0xa17   : > { %s2537_s1 = scalar_lea.hbm %s2683_s24, %s1856_s4  ;;  %p2054_p7 = pneg %p2053_p6 }
 0xa18   : > { %p2060_p11 = por %p2059_p10, %p2058_p8 }
 0xa1a   : > { %p2061_p12 = pnand %p2060_p11, %p2054_p7 }
 0xa1c   : > { %2064 = shalt.err (!%p2061_p12)
}
 0xa1d   : > { %s2065_s2 = scalar_lea.hbm %s2537_s1, 128  ;;  %s2069_s25 = scalar_lea.hbm %s2684_s27, 256 }
 0xa1e   : > { %p2066_p13 = scmp.ne.s32.totalorder %s2537_s1, %s2065_s2  ;;  %p2070_p2 = scmp.lt.u32.totalorder %s2537_s1, %s2684_s27 }
 0xa1f   : > { %p2071_p4 = scmp.lt.u32.totalorder %s2069_s25, %s2065_s2  ;;  %p2073_p6 = scmp.lt.u32.totalorder %s2065_s2, %s2537_s1 }
 0xa20   : > { %p2067_p0 = pnand %p2066_p13, %p2346_p3 }
 0xa21   : > { %p2072_p5 = por %p2071_p4, %p2070_p2 }
 0xa22   : > { %p2068_p1 = pneg %p2067_p0 }
 0xa23   : > { %p2074_p7 = por %p2073_p6, %p2072_p5 }
 0xa25   : > { %p2075_p8 = pnand %p2074_p7, %p2068_p1 }
 0xa27   : > { %2078 = shalt.err (!%p2075_p8)
}
 0xa28   : > { %1941 = dma.vmem_to_hbm [thread:$0]  (%p2346_p3), %s1515_s29, 128, %s2537_s1, %s1483_s14  }
 0xa29   : > { %s1857_s3 = sshll.u32 %s2681_s23, 6  ;;  %s1527_s26 = sshll.u32 %s2473_s0, 4  ;;  %s1528_s26 = int_to_ptr.vmem [resolvable:$true] %s1527_s26 }
 0xa2a   : > { %s2685_s22 = sld [smem:[#allocation30_spill]]  ;;  %s1488_s2 = scalar_lea.sflag [#allocation6], %s2367_s28 }
 0xa2b   : > { %s2079_s25 = scalar_lea.vmem %s1528_s26, 64  ;;  %s2191_s24 = smov [#allocation5]  }
 0xa2c   : > { %p2080_p10 = scmp.ne.s32.totalorder %s1528_s26, %s2079_s25  ;;  %s2083_s5 = sshll.u32 %s2191_s24, 4  ;;  %s2084_s5 = int_to_ptr.vmem [resolvable:$false] %s2083_s5 }
 0xa2d   : > { %s2085_s6 = scalar_lea.vmem %s2084_s5, 128  ;;  %p2086_p13 = scmp.lt.s32.totalorder %s1528_s26, %s2084_s5 }
 0xa2e   : > { %p2081_p11 = pnand %p2080_p10, %p2346_p3  ;;  %p2087_p0 = scmp.lt.s32.totalorder %s2085_s6, %s2079_s25 }
 0xa30   : > { %s2686_s4 = smov %s2685_s22  ;;  %s2563_s30 = scalar_lea.hbm %s2685_s22, %s1857_s3 }
 0xa31   : > { %p2082_p12 = pneg %p2081_p11  ;;  %p2088_p1 = por %p2087_p0, %p2086_p13 }
 0xa33   : > { %p2089_p2 = pnand %p2088_p1, %p2082_p12 }
 0xa35   : > { %2092 = shalt.err (!%p2089_p2)
}
 0xa36   : > { %s2093_s28 = scalar_lea.hbm %s2563_s30, 64  ;;  %s2097_s1 = scalar_lea.hbm %s2686_s4, 128 }
 0xa37   : > { %p2094_p4 = scmp.ne.s32.totalorder %s2563_s30, %s2093_s28  ;;  %p2098_p7 = scmp.lt.u32.totalorder %s2563_s30, %s2686_s4 }
 0xa38   : > { %p2099_p8 = scmp.lt.u32.totalorder %s2097_s1, %s2093_s28  ;;  %p2101_p11 = scmp.lt.u32.totalorder %s2093_s28, %s2563_s30 }
 0xa39   : > { %p2095_p5 = pnand %p2094_p4, %p2346_p3 }
 0xa3a   : > { %p2100_p10 = por %p2099_p8, %p2098_p7 }
 0xa3b   : > { %p2096_p6 = pneg %p2095_p5 }
 0xa3c   : > { %p2102_p12 = por %p2101_p11, %p2100_p10 }
 0xa3e   : > { %p2103_p13 = pnand %p2102_p12, %p2096_p6 }
 0xa40   : > { %2106 = shalt.err (!%p2103_p13)
}
 0xa41   : > { %1942 = dma.vmem_to_hbm [thread:$0]  (%p2346_p3), %s1528_s26, 64, %s2563_s30, %s1488_s2  }
 0xa42 PF: > { %s2687_s6 = sld [smem:[#allocation15_spill]]  ;;  %s2688_s14 = sld [smem:[#allocation9_spill]] }
 0xa48   : > { %p1952_p0 = scmp.ge.s32.totalorder %s2687_s6, 2  ;;  %s1555_s18 = sand.u32 1, %s2688_s14  }
 0xa49   : > { %s1556_s19 = scalar_lea.sflag [#allocation4], %s1555_s18 }
 0xa4a   : > { %p1946_p1 = pnand %p1952_p0, %p2356_p9 }
 0xa4c   : > { %2140 = dma.done.wait (!%p1946_p1), %s1556_s19, 128  }
 0xa4d   : > { %2142 = vsyncadd (!%p1946_p1), %s1556_s19, 4294967168  ;;  %s1565_s22 = scalar_lea.sflag [#allocation6], %s1555_s18 }
 0xa4e   : > { %2144 = dma.done.wait (!%p1946_p1), %s1565_s22, 64  }
 0xa4f   : > { %2146 = vsyncadd (!%p1946_p1), %s1565_s22, 4294967232  ;;  %s37_s26 = sadd.s32 1, %s2687_s6   ;;  %s2690_s1 = sld [smem:[#allocation10_spill]] }
 0xa50   : > { %p34_p2 = scmp.ge.s32.totalorder %s37_s26, 6   ;;  %s2691_s22 = sld [smem:[#allocation11_spill]] }
 0xa51   : > { %s2692_s23 = sld [smem:[#allocation20_spill]]  ;;  %s2693_s24 = sld [smem:[#allocation13_spill]] }
 0xa52   : > { %s2694_s2 = sld [smem:[#allocation14_spill]]  ;;  %s2695_s25 = sld [smem:[#allocation16_spill]] }
 0xa53   : > { %s2696_s3 = sld [smem:[#allocation18_spill]]  ;;  %36 = sbr.rel (!%p34_p2) target bundleno = 18 (0x12), region = 201 }
 0xa5a   :  { %1582 = vsyncpa [#allocation4], 1 }
 0xa5b   :  { %1584 = vsyncpa [#allocation4 + $0x1], 1 }
 0xa5c   :  { %1585 = vsyncpa [#allocation6], 1 }
 0xa5d   :  { %1587 = vsyncpa [#allocation6 + $0x1], 1 }

// kernel: transformer_encoder_with_pair.4
= control target key start
LH: loop header
LB: loop body
LE: loop exit
PB: predicated region body
PF: predicated region fallthrough
CT: control target
= control target key end

     0   :  { %s1923_s27 = smov 0   ;;  %s1925_s28 = smov 0   ;;  %s2125_s0 = inlined_call_operand.vmem [shape: bf16[2,8,32], index: 0, kind: input, shape index: {}]   ;;  %s2126_s1 = inlined_call_operand.vmem [shape: f32[2,8,32], index: 1, kind: input, shape index: {}]   ;;  %s2127_s2 = inlined_call_operand.vmem [shape: f32[2,4,8,8], index: 2, kind: input, shape index: {}]   ;;  %s2128_s3 = inlined_call_operand.vmem [shape: bf16[2,32,48], index: 3, kind: input, shape index: {}]   ;;  %s2129_s4 = inlined_call_operand.vmem [shape: f32[2,1,48], index: 4, kind: input, shape index: {}]   ;;  %s2130_s5 = inlined_call_operand.vmem [shape: bf16[2,16,32], index: 5, kind: input, shape index: {}]   ;;  %s2131_s6 = inlined_call_operand.vmem [shape: f32[1,32], index: 6, kind: input, shape index: {}]   ;;  %s2132_s7 = inlined_call_operand.vmem [shape: f32[1,32], index: 7, kind: input, shape index: {}]   ;;  %s2133_s8 = inlined_call_operand.vmem [shape: f32[1,32], index: 8, kind: input, shape index: {}]   ;;  %s2134_s9 = inlined_call_operand.vmem [shape: bf16[32,64], index: 9, kind: input, shape index: {}]   ;;  %s2135_s10 = inlined_call_operand.vmem [shape: f32[1,64], index: 10, kind: input, shape index: {}]   ;;  %s2136_s11 = inlined_call_operand.vmem [shape: bf16[64,32], index: 11, kind: input, shape index: {}]   ;;  %s2137_s12 = inlined_call_operand.vmem [shape: f32[1,32], index: 12, kind: input, shape index: {}]   ;;  %s2138_s13 = inlined_call_operand.vmem [shape: f32[1,32], index: 13, kind: input, shape index: {}]   ;;  %s2139_s14 = inlined_call_operand.vmem [shape: f32[1,32], index: 14, kind: input, shape index: {}]   ;;  %s2140_s15 = inlined_call_operand.vmem [shape: f32[2,1,1,8], index: 15, kind: input, shape index: {}]   ;;  %s2141_s16 = inlined_call_operand.vmem [shape: bf16[2,4,8,8], index: 16, kind: output, shape index: {0}]   ;;  %s2142_s17 = inlined_call_operand.vmem [shape: f32[2,8,32], index: 17, kind: output, shape index: {1}]   ;;  %s2143_s18 = inlined_call_operand.vmem [shape: bf16[2,8,32], index: 18, kind: output, shape index: {2}]  }
   0x1   :  { %2147 = sst [smem:[#allocation8_spill]] %s2125_s0  ;;  %s1927_s29 = smov 0  }
   0x2   :  { %2148 = sst [smem:[#allocation9_spill]] %s2126_s1  ;;  %s1929_s30 = smov 0  }
   0x3   :  { %2149 = sst [smem:[#allocation10_spill]] %s2127_s2  ;;  %s1931_s0 = smov 0  }
   0x4   :  { %2150 = sst [smem:[#allocation11_spill]] %s2128_s3 }
   0x5   :  { %2151 = sst [smem:[#allocation12_spill]] %s2135_s10 }
   0x6   :  { %2152 = sst [smem:[#allocation13_spill]] %s2137_s12 }
   0x7   :  { %2153 = sst [smem:[#allocation14_spill]] %s2138_s13 }
   0x8   :  { %2154 = sst [smem:[#allocation15_spill]] %s2139_s14 }
   0x9 LB: > { %2155 = sst [smem:[#allocation3_spill]] %s1807_s29  ;;  %s38_s19 = sadd.s32 1, %s1807_s29  ;;  %s1815_s0 = sphi %s1931_s0, %s29_s0   ;;  %s1811_s30 = sphi %s1929_s30, %s2172_s30   ;;  %s1807_s29 = sphi %s1927_s29, %s2171_s29   ;;  %s1803_s28 = sphi %s1925_s28, %s2170_s28   ;;  %s1799_s27 = sphi %s1923_s27, %s2169_s27  }
   0xa   : > { %2156 = sst [smem:[#allocation4_spill]] %s1811_s30  ;;  %s41_s1 = sadd.s32 1, %s1811_s30 }
   0xb   : > { %2157 = sst [smem:[#allocation5_spill]] %s1815_s0  ;;  %p39_p0 = scmp.ge.s32.totalorder %s38_s19, 2 }
   0xc   : > { %p1575_p1 = scmp.ge.s32.totalorder %s1815_s0, 1  ;;  %p592_p2 = scmp.lt.s32.totalorder %s1815_s0, 5 }
   0xd   : > { %s2174_s19 = smov (%p39_p0, %s38_s19), 0  ;;  %s2176_s1 = smov (!%p39_p0, %s41_s1), %s1811_s30 }
   0xe   : > { %2158 = sst [smem:[#allocation6_spill]] %s2174_s19  ;;  %p593_p3 = pnand %p1575_p1, %p592_p2 }
   0xf   : > { %p43_p4 = scmp.ge.s32.totalorder %s2176_s1, 2  ;;  %p704_p5 = scmp.lt.s32.totalorder (!%p593_p3), %s1799_s27, 1  ;;  %v1817_v0 = vmov (!%p593_p3), 0.0   ;;  %vm1818_vm0 = vmmov (!%p593_p3), 0   ;;  %vm763_vm1 = vcmask (!%p593_p3), 261120   ;;  %vm821_vm2 = vcmask (!%p593_p3), 64512  }
  0x10   : > { %596 = sbr.rel (%p593_p3) target bundleno = 2556 (0x9fc), region = 84  ;;  %p686_p6 = scmp.lt.s32.totalorder (!%p593_p3), %s1803_s28, 1  ;;  %1645 = vmatprep.subr.bf16.mxu0 (!%p593_p3), %v1817_v0  ;;  %1649 = vmatprep.mubr.msk.bf16.mxu0 (!%p593_p3), %vm1818_vm0, %v1817_v0  ;;  %v812_v16 = vlaneseq (!%p593_p3)  ;;  %v1822_v20 = vmov (!%p593_p3), 0   ;;  %vm869_vm5 = vcmask (!%p593_p3), 60416   ;;  %vm888_vm6 = vcmask (!%p593_p3), 1043456  }
  0x11   : > { %s2178_s1 = smov (%p43_p4, %s2176_s1), 0  ;;  %1653 = vmatprep.subr.bf16.mxu1 (!%p593_p3), %v1817_v0  ;;  %1655 = vmatprep.mubr.msk.bf16.mxu1 (!%p593_p3), %vm1818_vm0, %v1817_v0  ;;  %s2160_s3 = sld [smem:[#allocation11_spill]] (!%p593_p3)  ;;  %vm1062_vm7 = vcmask (!%p593_p3), 130048  }
  0x12   : > { %2159 = sst [smem:[#allocation7_spill]] %s2178_s1  ;;  %s2161_s19 = sld [smem:[#allocation9_spill]] (!%p593_p3)  ;;  %v813_v18 = vshrl.u32 (!%p593_p3), %v812_v16, 7 }
  0x13   : > { %s2162_s12 = sld [smem:[#allocation8_spill]] (!%p593_p3)  ;;  %s1578_s13 = sshll.u32 (!%p593_p3), %s1799_s27, 1 }
  0x14   : > { %p697_p7 = scmp.lt.s32.totalorder (!%p593_p3), %s1578_s13, 3  ;;  %v814_v19 = vsub.s32 (!%p593_p3), 0, %v813_v18  ;;  %s2163_s0 = sld [smem:[#allocation10_spill]] (!%p593_p3) }
  0x15   : > { %s1824_s1 = smov (!%p593_p3), 88   ;;  %s1825_s22 = smov (!%p593_p3), 8  }
  0x16   : > { %p1602_p8 = scmp.ne.s32.totalorder (!%p593_p3), %s1799_s27, 0 }
  0x17   : > { %s1960_s20 = scalar_select %p704_p5, %s1799_s27, 1 }
  0x18   : > { %s2180_s28 = smov (!%p686_p6, %s1803_s28), 1  ;;  %s2182_s13 = smov (!%p697_p7, %s1578_s13), 3 }
  0x19   : > { %s1622_s21 = sshll.u32 %s1960_s20, 4  ;;  %s1972_s24 = sshll.u32 %s2180_s28, 2 }
  0x1a   : > { %s708_s23 = scalar_lea.vmem %s2160_s3, %s1622_s21  ;;  %s1577_s25 = sshll.u32 %s2180_s28, 3 }
  0x1b   : > { %v1754_v1 = vld [vmem:[%s708_s23] sm:$0xff]   ;;  %s1978_s30 = scalar_lea.vmem %s2161_s19, %s1577_s25  ;;  %s1983_s14 = scalar_lea.vmem %s2142_s17, %s1577_s25  ;;  %v1755_v2 = vld [vmem:[%s708_s23 + $0x8] sm:$0xff]  }
  0x1c   : > { %1646 = vmatpush3.bf16.msra.mxu0 %v1754_v1  ;;  %s737_s2 = scalar_lea.vmem %s2143_s18, %s1972_s24  ;;  %s689_s10 = scalar_lea.vmem %s2162_s12, %s1972_s24 }
  0x1d   : > { %1647 = vmatprep.subr.bf16.mxu0 %v1817_v0  ;;  %v739_v3 = vld [vmem:[%s689_s10] sm:$0xf]  ;;  %s711_s19 = scalar_lea.vmem %s2129_s4, %s1960_s20  ;;  %s1819_s3 = smov 120  }
  0x1e   : > { %v1590_v4 = vld [vmem:[%s711_s19] ss:$0 sm:$0xff]  ;;  %s1820_s10 = smov 112   ;;  %s1821_s12 = smov 104  }
  0x1f   : > { %s719_s25 = scalar_lea.vmem %s2140_s15, %s2180_s28  ;;  %s700_s26 = sadd.s32 %s1972_s24, %s2182_s13 }
  0x20   : > { %1648 = vmatpush3.bf16.msra.mxu0 %v1755_v2  ;;  %v807_v17 = vld [vmem:[%s719_s25] sm:$0x1]  ;;  %s1580_s21 = sshll.u32 %s700_s26, 3  ;;  %s1823_s13 = smov 96  }
  0x21   : > { %1659 = vmatprep.subr.bf16.mxu0 %v1817_v0  ;;  %vm810_vm3 = vcmp.gt.f32.partialorder %v807_v17, 0.5  ;;  %s702_s19 = scalar_lea.vmem %s2163_s0, %s1580_s21  ;;  %s1623_s23 = sshll.u32 %s1960_s20, 3 }
  0x22   : > { %v811_v21 = vsel %vm810_vm3, 1, %v1822_v20  ;;  %v809_v23 = vld [vmem:[%s702_s19] sm:$0xff]  ;;  %v1596_v32 = vld [vmem:[%s702_s19 + $0x8] sm:$0xff]  ;;  %s716_s21 = scalar_lea.vmem %s2130_s5, %s1623_s23 }
  0x23   : > { %1650 = vmatmul.mubr.msk.bf16.vlgmr.msra.gmra.mrb[0].mxu0 %vm763_vm1, %v739_v3  ;;  %v815_v22 = vrot.slane %v811_v21, %v814_v19  ;;  %v1756_v63 = vld [vmem:[%s716_s21] sm:$0xff]  }
  0x24   : > { %1661 = vmatprep.mubr.msk.bf16.mxu0 %vm1818_vm0, %v1817_v0 }
  0x25   : > { %vm816_vm4 = vcmp.eq.s32.totalorder %v815_v22, 1 }
  0x26   : > { %v817_v24 = vsel %vm816_vm4, -inf, %v809_v23  ;;  %v934_v33 = vsel %vm816_vm4, -inf, %v1596_v32 }
  0xf6   : > { %v801_v5 = vpop.f32.mrb[0].mxu0 }
  0xf7   : > { %v802_v6 = vadd.f32 %v1590_v4, %v801_v5  ;;  %v1651_v7 = vpop.f32.mrb[1].mxu0 }
  0xf8   : > { %v804_v8 = vpop.f32.mrb[2].mxu0 }
  0xf9   : > { %v2002_v9 = vpack.c.bf16 %v802_v6, %v802_v6  ;;  %v1652_v10 = vpop.f32.mrb[3].mxu0 }
  0xfb   : > { %935 = vrot.lane.b32.xlu1 %v2002_v9, %s1819_s3  ;;  %819 = vrot.lane.b32.xlu0 %v2002_v9, %s1820_s10  ;;  %s1587_s3 = sshll.u32 %s700_s26, 2 }
  0xff   : > { %937 = vrot.lane.b32.xlu0 %v2002_v9, %s1821_s12  ;;  %s728_s12 = scalar_lea.vmem %s2141_s16, %s1587_s3 }
 0x16d   : > { %v820_v11 = vpop.permute.xlu0 %819  ;;  %v936_v15 = vpop.permute.xlu1 %935 }
 0x16e   : > { %v826_v12 = vsel %vm821_vm2, %v820_v11, 0 }
 0x16f   : > { %1654 = vmatpush3.bf16.xpose.msra.mxu1 %v826_v12 }
 0x170   : > { %1665 = vmatprep.subr.bf16.mxu1 %v1817_v0 }
 0x171   : > { %v938_v13 = vpop.permute.xlu0 %937 }
 0x172   : > { %v943_v14 = vsel %vm821_vm2, %v938_v13, 0 }
 0x176   : > { %1656 = vmatmul.mubr.msk.bf16.vlgmr.msra.gmra.mrb[0].mxu1 %vm821_vm2, %v2002_v9 }
 0x177   : > { %1666 = vmatpush3.bf16.xpose.msra.mxu1 %v943_v14  ;;  %1667 = vmatprep.mubr.msk.bf16.mxu1 %vm1818_vm0, %v1817_v0 }
 0x178   : > { %1677 = vmatprep.subr.bf16.mxu1 %v1817_v0 }
 0x17e   : > { %1668 = vmatmul.mubr.msk.bf16.vlgmr.msra.gmra.mrb[4].mxu1 %vm821_vm2, %v936_v15 }
 0x17f   : > { %1679 = vmatprep.mubr.msk.bf16.mxu1 %vm1818_vm0, %v1817_v0  ;;  %1678 = vmatpush3.bf16.msra.mxu1 %v1756_v63 }
 0x249   : > { %v862_v25 = vpop.f32.mrb[0].mxu1 }
 0x24a   : > { %v863_v26 = vadd.f32 %v862_v25, %v817_v24  ;;  %v1657_v27 = vpop.f32.mrb[1].mxu1 }
 0x24b   : > { %v865_v28 = vpop.f32.mrb[2].mxu1 }
 0x24c   : > { %v868_v29 = vpack.c.bf16 %v863_v26, %v863_v26  ;;  %v1658_v30 = vpop.f32.mrb[3].mxu1  ;;  %v871_v31 = vsel %vm821_vm2, %v863_v26, -inf }
 0x24d   : > { %872 = vmax.xlane.f32.xlu1 %v871_v31 }
 0x24e   : > { %870 = vst.msk [vmem:[%s728_s12] sm:$0xf] %vm869_vm5, %v868_v29 }
 0x251   : > { %v979_v34 = vpop.f32.mrb[4].mxu1 }
 0x252   : > { %v980_v35 = vadd.f32 %v979_v34, %v934_v33  ;;  %v1669_v36 = vpop.f32.mrb[5].mxu1 }
 0x253   : > { %v982_v37 = vpop.f32.mrb[6].mxu1 }
 0x254   : > { %v985_v38 = vpack.c.bf16 %v980_v35, %v980_v35  ;;  %v1670_v39 = vpop.f32.mrb[7].mxu1  ;;  %v988_v40 = vsel %vm821_vm2, %v980_v35, -inf }
 0x255   : > { %989 = vmax.xlane.f32.xlu0 %v988_v40 }
 0x256   : > { %1598 = vst.msk [vmem:[%s728_s12 + $0x4] sm:$0xf] %vm869_vm5, %v985_v38 }
 0x2da   : > { %v873_v41 = vpop.xlane.xlu1 %872 }
 0x2db   : > { %v874_v42 = vsub.f32 %v863_v26, %v873_v41 }
 0x2dd   : > { %v875_v43 = vmul.f32 1.442695, %v874_v42 }
 0x2df   : > { %1757 = vpow2.f32 %v875_v43 }
 0x2e2   : > { %v990_v44 = vpop.xlane.xlu0 %989 }
 0x2e3   : > { %v991_v45 = vsub.f32 %v980_v35, %v990_v44 }
 0x2e5   : > { %v992_v46 = vmul.f32 1.442695, %v991_v45 }
 0x2e7   : > { %1759 = vpow2.f32 %v992_v46 }
 0x2e9   : > { %v1758_v47 = vpop.eup %1757 }
 0x2ea   : > { %v877_v48 = vsel %vm821_vm2, %v1758_v47, 0.0 }
 0x2eb   : > { %878 = vadd.xlane.f32.xlu0 %v877_v48 }
 0x2f1   : > { %v1760_v49 = vpop.eup %1759 }
 0x2f2   : > { %v994_v50 = vsel %vm821_vm2, %v1760_v49, 0.0 }
 0x2f3   : > { %995 = vadd.xlane.f32.xlu1 %v994_v50 }
 0x301   : > { %883 = vrot.lane.b32.xlu0 %v2002_v9, %s1823_s13 }
 0x304   : > { %1000 = vrot.lane.b32.xlu1 %v2002_v9, %s1824_s1 }
 0x378   : > { %v879_v51 = vpop.xlane.xlu0 %878 }
 0x379   : > { %1761 = vrcp.f32 %v879_v51 }
 0x37c   : > { %v884_v52 = vpop.permute.xlu0 %883 }
 0x37d   : > { %v890_v53 = vsel %vm888_vm6, %v884_v52, 0 }
 0x37e   : > { %1660 = vmatpush3.bf16.msra.mxu0 %v890_v53 }
 0x37f   : > { %1671 = vmatprep.subr.bf16.mxu0 %v1817_v0 }
 0x380   : > { %v996_v54 = vpop.xlane.xlu1 %995 }
 0x381   : > { %1763 = vrcp.f32 %v996_v54 }
 0x383   : > { %v1762_v55 = vpop.eup %1761 }
 0x384   : > { %v881_v56 = vmul.f32 %v1762_v55, %v1758_v47  ;;  %v1001_v57 = vpop.permute.xlu1 %1000 }
 0x385   : > { %v1006_v59 = vsel %vm888_vm6, %v1001_v57, 0 }
 0x386   : > { %v882_v58 = vpack.c.bf16 %v881_v56, %v881_v56 }
 0x388   : > { %1662 = vmatmul.mubr.msk.bf16.vlgmr.msra.gmra.mrb[4].mxu0 %vm821_vm2, %v882_v58 }
 0x389   : > { %1672 = vmatpush3.bf16.msra.mxu0 %v1006_v59  ;;  %1673 = vmatprep.mubr.msk.bf16.mxu0 %vm1818_vm0, %v1817_v0 }
 0x38b   : > { %v1764_v60 = vpop.eup %1763 }
 0x38c   : > { %v998_v61 = vmul.f32 %v1764_v60, %v1760_v49 }
 0x38e   : > { %v999_v62 = vpack.c.bf16 %v998_v61, %v998_v61 }
 0x390   : > { %1674 = vmatmul.mubr.msk.bf16.vlgmr.msra.gmra.mrb[8].mxu0 %vm821_vm2, %v999_v62 }
 0x45b   : > { %v926_v1 = vpop.f32.mrb[4].mxu0 }
 0x45c   : > { %v1663_v2 = vpop.f32.mrb[5].mxu0 }
 0x45d   : > { %v929_v3 = vpop.f32.mrb[6].mxu0 }
 0x45e   : > { %v1664_v4 = vpop.f32.mrb[7].mxu0 }
 0x463   : > { %v1042_v5 = vpop.f32.mrb[8].mxu0 }
 0x464   : > { %1049 = vrot.lane.b32.xlu1 %v1042_v5, %s1825_s22  ;;  %v1675_v0 = vpop.f32.mrb[9].mxu0 }
 0x465   : > { %v1045_v6 = vpop.f32.mrb[10].mxu0 }
 0x466   : > { %v1676_v7 = vpop.f32.mrb[11].mxu0 }
 0x4d6   : > { %v1050_v8 = vpop.permute.xlu1 %1049 }
 0x4d7   : > { %v1052_v9 = vsel %vm821_vm2, %v926_v1, %v1050_v8 }
 0x4d8   : > { %v1053_v10 = vpack.c.bf16 %v1052_v9, %v1052_v9 }
 0x4da   : > { %1680 = vmatmul.mubr.msk.bf16.vlgmr.msra.gmra.mrb[8].mxu1 %vm1062_vm7, %v1053_v10 }
 0x5aa   : > { %1109 = sbr.rel (%p1602_p8) target bundleno = 1457 (0x5b1), region = 88 }
 0x5ad   : > { %v1100_v11 = vpop.f32.mrb[8].mxu1 }
 0x5ae   : > { %v1681_v12 = vpop.f32.mrb[9].mxu1  ;;  %1110 = vst.msk [vmem:[#allocation2] sm:$0xff] (!%p1602_p8), %vm763_vm1, %v1100_v11 }
 0x5af   : > { %v1103_v13 = vpop.f32.mrb[10].mxu1 }
 0x5b0   : > { %v1682_v14 = vpop.f32.mrb[11].mxu1 }
 0x5b1 PF: > { %p1603_p9 = scmp.le.s32.totalorder %s1799_s27, 0 }
 0x5b3   : > { %1114 = sbr.rel (%p1603_p9) target bundleno = 1466 (0x5ba), region = 92 }
 0x5b5   : > { %v1115_v15 = vld [vmem:[#allocation2] sm:$0xff] (!%p1603_p9) }
 0x5b6   : > { %v1116_v16 = vadd.f32 (!%p1603_p9), %v1115_v15, %v1100_v11 }
 0x5b8   : > { %1117 = vst.msk [vmem:[#allocation2] sm:$0xff] (!%p1603_p9), %vm763_vm1, %v1116_v16 }
 0x5ba PF: > { %p1604_p10 = scmp.ne.s32.totalorder %s1799_s27, 1 }
 0x5bb   : > { %v1122_v17 = vld [vmem:[%s1978_s30] sm:$0xff] (!%p1604_p10)  ;;  %v1826_v29 = vmov (!%p1604_p10), 0.0   ;;  %vm1827_vm8 = vmmov (!%p1604_p10), 0   ;;  %v1766_v30 = vld [vmem:[%s2134_s9 + $0x8] sm:$0xff] (!%p1604_p10)   ;;  %v1769_v43 = vld [vmem:[%s2136_s11 + $0x10] sm:$0xff] (!%p1604_p10)   ;;  %s2164_s30 = sld [smem:[#allocation12_spill]] (!%p1604_p10) }
 0x5bc   : > { %1121 = sbr.rel (%p1604_p10) target bundleno = 2556 (0x9fc), region = 96  ;;  %v1605_v19 = vld [vmem:[%s2131_s6] ss:$0 sm:$0xff] (!%p1604_p10)  ;;  %1683 = vmatprep.subr.bf16.mxu0 (!%p1604_p10), %v1826_v29  ;;  %1687 = vmatprep.mubr.msk.bf16.mxu0 (!%p1604_p10), %vm1827_vm8, %v1826_v29  ;;  %v1768_v42 = vld [vmem:[%s2136_s11 + $0x8] sm:$0xff] (!%p1604_p10)   ;;  %v1770_v44 = vld [vmem:[%s2136_s11 + $0x18] sm:$0xff] (!%p1604_p10)   ;;  %vm1275_vm9 = vcmask (!%p1604_p10), 523264  }
 0x5bd   : > { %v1765_v28 = vld [vmem:[%s2134_s9] sm:$0xff] (!%p1604_p10)   ;;  %1691 = vmatprep.subr.bf16.mxu1 (!%p1604_p10), %v1826_v29  ;;  %1699 = vmatprep.mubr.msk.bf16.mxu1 (!%p1604_p10), %vm1827_vm8, %v1826_v29  ;;  %s2165_s3 = sld [smem:[#allocation13_spill]] (!%p1604_p10)  ;;  %s2166_s12 = sld [smem:[#allocation14_spill]] (!%p1604_p10)  ;;  %vm1351_vm10 = vcmask (!%p1604_p10), 257024  }
 0x5be   : > { %1684 = vmatpush3.bf16.msra.mxu0 (!%p1604_p10), %v1765_v28  ;;  %v1606_v35 = vld [vmem:[%s2132_s7] ss:$0 sm:$0xff] (!%p1604_p10)  ;;  %s2167_s1 = sld [smem:[#allocation15_spill]] (!%p1604_p10) }
 0x5bf   : > { %v1123_v18 = vld [vmem:[#allocation2] sm:$0xff] (!%p1604_p10)  ;;  %1685 = vmatprep.subr.bf16.mxu0 (!%p1604_p10), %v1826_v29 }
 0x5c0   : > { %v1124_v20 = vadd.f32 (!%p1604_p10), %v1123_v18, %v1122_v17  ;;  %v1607_v37 = vld [vmem:[%s2133_s8] ss:$0 sm:$0xff] (!%p1604_p10) }
 0x5c1   : > { %v1767_v41 = vld [vmem:[%s2136_s11] sm:$0xff] (!%p1604_p10)  }
 0x5c2   : > { %v2057_v21 = vadd.f32 (!%p1604_p10), %v1605_v19, %v1124_v20  ;;  %1686 = vmatpush3.bf16.msra.mxu0 (!%p1604_p10), %v1766_v30  ;;  %1692 = vmatpush3.bf16.msra.mxu1 (!%p1604_p10), %v1767_v41  ;;  %v1608_v45 = vld [vmem:[%s2164_s30] ss:$0 sm:$0xff] (!%p1604_p10) }
 0x5c3   : > { %1693 = vmatprep.subr.bf16.mxu1 %v1826_v29  ;;  %v1612_v57 = vld [vmem:[%s2165_s3] ss:$0 sm:$0xff] }
 0x5c4   : > { %v1135_v22 = vsel %vm763_vm1, %v2057_v21, 0.0  ;;  %v1618_v10 = vld [vmem:[%s2166_s12] ss:$0 sm:$0xff] }
 0x5c5   : > { %1136 = vadd.xlane.f32.xlu0 %v1135_v22  ;;  %v1619_v12 = vld [vmem:[%s2167_s1] ss:$0 sm:$0xff] }
 0x5c6   : > { %1694 = vmatpush3.bf16.msra.mxu1 %v1768_v42 }
 0x5c7   : > { %1695 = vmatprep.subr.bf16.mxu1 %v1826_v29 }
 0x5ca   : > { %1696 = vmatpush3.bf16.msra.mxu1 %v1769_v43 }
 0x5cb   : > { %1697 = vmatprep.subr.bf16.mxu1 %v1826_v29 }
 0x5ce   : > { %1698 = vmatpush3.bf16.msra.mxu1 %v1770_v44 }
 0x652   : > { %v1137_v23 = vpop.xlane.xlu0 %1136 }
 0x653   : > { %v1139_v24 = vmul.f32 0.03125, %v1137_v23 }
 0x655   : > { %v1140_v25 = vsub.f32 %v2057_v21, %v1139_v24 }
 0x657   : > { %v1141_v26 = vmul.f32 %v1140_v25, %v1140_v25 }
 0x659   : > { %v1142_v27 = vsel %vm763_vm1, %v1141_v26, 0.0 }
 0x65a   : > { %1143 = vadd.xlane.f32.xlu0 %v1142_v27 }
 0x6e7   : > { %v1144_v31 = vpop.xlane.xlu0 %1143 }
 0x6e8   : > { %v1145_v32 = vmul.f32 0.03125, %v1144_v31 }
 0x6ea   : > { %v1146_v33 = vadd.f32 1e-05, %v1145_v32 }
 0x6ec   : > { %1771 = vrsqrt.f32 %v1146_v33 }
 0x6f6   : > { %v1772_v34 = vpop.eup %1771 }
 0x6f7   : > { %v1148_v36 = vmul.f32 %v1772_v34, %v1140_v25 }
 0x6f9   : > { %v1155_v38 = vmul.f32 %v1606_v35, %v1148_v36 }
 0x6fb   : > { %v1162_v39 = vadd.f32 %v1607_v37, %v1155_v38 }
 0x6fd   : > { %v1163_v40 = vpack.c.bf16 %v1162_v39, %v1162_v39 }
 0x6ff   : > { %1688 = vmatmul.mubr.msk.bf16.vlgmr.msra.gmra.mrb[0].mxu0 %vm763_vm1, %v1163_v40 }
 0x7d2   : > { %v1224_v46 = vpop.f32.mrb[0].mxu0 }
 0x7d3   : > { %v1225_v47 = vadd.f32 %v1608_v45, %v1224_v46  ;;  %v1689_v48 = vpop.f32.mrb[1].mxu0 }
 0x7d4   : > { %v1227_v49 = vpop.f32.mrb[2].mxu0 }
 0x7d5   : > { %v1231_v50 = vmul.f32 0.70710677, %v1225_v47  ;;  %v1690_v51 = vpop.f32.mrb[3].mxu0  ;;  %v1230_v53 = vmul.f32 0.5, %v1225_v47 }
 0x7d7   : > { %1773 = verf.f32 %v1231_v50 }
 0x7e1   : > { %v1774_v52 = vpop.eup %1773 }
 0x7e2   : > { %v1233_v54 = vadd.f32 1.0, %v1774_v52 }
 0x7e4   : > { %v1234_v55 = vmul.f32 %v1233_v54, %v1230_v53 }
 0x7e6   : > { %v1235_v56 = vpack.c.bf16 %v1234_v55, %v1234_v55 }
 0x7e8   : > { %1700 = vmatmul.mubr.msk.bf16.vlgmr.msra.gmra.mrb[0].mxu1 %vm1275_vm9, %v1235_v56 }
 0x8bb   : > { %v1313_v58 = vpop.f32.mrb[0].mxu1 }
 0x8bc   : > { %v1314_v59 = vadd.f32 %v1612_v57, %v1313_v58  ;;  %v1701_v60 = vpop.f32.mrb[1].mxu1 }
 0x8bd   : > { %v1316_v61 = vpop.f32.mrb[2].mxu1 }
 0x8be   : > { %v1319_v62 = vadd.f32 %v1314_v59, %v2057_v21  ;;  %v1702_v63 = vpop.f32.mrb[3].mxu1 }
 0x8c0   : > { %1320 = vst.msk [vmem:[%s1983_s14] sm:$0xff] %vm763_vm1, %v1319_v62  ;;  %v1323_v1 = vsel %vm763_vm1, %v1319_v62, 0.0 }
 0x8c1   : > { %1324 = vadd.xlane.f32.xlu1 %v1323_v1 }
 0x94e   : > { %v1325_v2 = vpop.xlane.xlu1 %1324 }
 0x94f   : > { %v1326_v3 = vmul.f32 0.03125, %v1325_v2 }
 0x951   : > { %v1327_v4 = vsub.f32 %v1319_v62, %v1326_v3 }
 0x953   : > { %v1328_v5 = vmul.f32 %v1327_v4, %v1327_v4 }
 0x955   : > { %v1329_v0 = vsel %vm763_vm1, %v1328_v5, 0.0 }
 0x956   : > { %1330 = vadd.xlane.f32.xlu1 %v1329_v0 }
 0x9e3   : > { %v1331_v6 = vpop.xlane.xlu1 %1330 }
 0x9e4   : > { %v1332_v7 = vmul.f32 0.03125, %v1331_v6 }
 0x9e6   : > { %v1333_v8 = vadd.f32 1e-05, %v1332_v7 }
 0x9e8   : > { %1775 = vrsqrt.f32 %v1333_v8 }
 0x9f2   : > { %v1776_v9 = vpop.eup %1775 }
 0x9f3   : > { %v1335_v11 = vmul.f32 %v1776_v9, %v1327_v4 }
 0x9f5   : > { %v1342_v13 = vmul.f32 %v1618_v10, %v1335_v11 }
 0x9f7   : > { %v1349_v14 = vadd.f32 %v1619_v12, %v1342_v13 }
 0x9f9   : > { %v1350_v15 = vpack.c.bf16 %v1349_v14, %v1349_v14 }
 0x9fb   : > { %1352 = vst.msk [vmem:[%s737_s2] sm:$0xf] %vm1351_vm10, %v1350_v15 }
 0x9fc PF: > { %s2168_s26 = sld [smem:[#allocation5_spill]]  ;;  %s2169_s27 = sld [smem:[#allocation3_spill]] }
 0x9fd   : > { %s2170_s28 = sld [smem:[#allocation4_spill]]  ;;  %s2171_s29 = sld [smem:[#allocation6_spill]] }
 0x9fe   : > { %s2172_s30 = sld [smem:[#allocation7_spill]] }
 0xa02   : > { %s29_s0 = sadd.s32 1, %s2168_s26  }
 0xa03   : > { %p26_p11 = scmp.ge.s32.totalorder %s29_s0, 6  }
 0xa05   :  { %28 = sbr.rel (!%p26_p11) target bundleno = 9 (0x9), region = 170 }

</bundles_post_ra>
